<compile_context>
chip_gen: v6e
topology: v6e:2x2x1
jax: 0.10.0
libtpu: 0.0.40
codegen_flags: <defaults>
</compile_context>

<pallas_src>
import jax
import jax.numpy as jnp
from jax.experimental import pallas as pl
from jax.experimental.pallas import tpu as pltpu


def _linreg_kernel(x_ref, w_ref, b_ref, o_ref):
    # Weight arrives as bf16 (half the HBM bytes). Upcast on the VPU (free,
    # kernel is DMA-bound) and run the MXU matmul at HIGHEST precision with an
    # f32 accumulator so the output matches an f32 reference tightly.
    w = w_ref[...].astype(jnp.float32)
    y = jnp.dot(
        x_ref[...],
        w,
        preferred_element_type=jnp.float32,
        precision=jax.lax.Precision.HIGHEST,
    )
    o_ref[...] = (y + b_ref[...]).astype(o_ref.dtype)


def prepare_linreg_params(weight, bias, weight_dtype=jnp.bfloat16):
    """One-time parameter prep (hoisted out of the per-call path).

    weight: (n_outputs, n_inputs)  ->  w_t: (n_inputs, n_outputs) in `weight_dtype`
    bias:   (n_outputs,)           ->  b_row: (1, n_outputs) f32
    """
    n_outputs, n_inputs = weight.shape
    w_t = jnp.transpose(weight).astype(weight_dtype)
    b_row = jnp.reshape(bias, (1, n_outputs)).astype(jnp.float32)
    return w_t, b_row


def linreg_forward(x, w_t, b_row):
    """Exact LinRegNet.forward: flatten x to one row and apply the Linear.

    x: any shape with prod(shape) == n_inputs
    w_t: (n_inputs, n_outputs) [bf16], b_row: (1, n_outputs) [f32]
    """
    n_inputs, n_outputs = w_t.shape
    # Reshape of a contiguous array is metadata-only; no HBM traffic.
    x_flat = jnp.reshape(x, (1, n_inputs)).astype(jnp.float32)

    cost = pl.CostEstimate(
        flops=2 * n_inputs * n_outputs,
        transcendentals=0,
        bytes_accessed=(
            n_inputs * n_outputs * jnp.dtype(w_t.dtype).itemsize  # weight
            + n_inputs * 4                                        # x row
            + n_outputs * 4                                       # bias
            + n_outputs * 4                                       # output
        ),
    )

    out = pl.pallas_call(
        _linreg_kernel,
        out_shape=jax.ShapeDtypeStruct((1, n_outputs), jnp.float32),
        # No grid: single invocation, every operand is one full VMEM-resident block.
        in_specs=[
            pl.BlockSpec((1, n_inputs), lambda: (0, 0)),          # x row
            pl.BlockSpec((n_inputs, n_outputs), lambda: (0, 0)),  # W_T (whole, bf16)
            pl.BlockSpec((1, n_outputs), lambda: (0, 0)),         # bias row
        ],
        out_specs=pl.BlockSpec((1, n_outputs), lambda: (0, 0)),
        cost_estimate=cost,
    )(x_flat, w_t, b_row)

    return out[0]  # (n_outputs,) — matches torch Linear applied to a 1-D input


def linreg_forward_batched(x_rows, w_t, b_row, *, tile_m=8):
    """Amortized path: apply the same Linear to M pre-flattened rows at once.

    x_rows: (M, n_inputs). The weight block index is constant across the grid,
    so its DMA happens once; the M axis is "parallel" so v7x's two TensorCores
    split the batch. N=128 output stays a single lane-dense block.
    """
    n_inputs, n_outputs = w_t.shape
    m, k = x_rows.shape
    assert k == n_inputs
    pad = (-m) % tile_m
    if pad:
        x_rows = jnp.pad(x_rows, ((0, pad), (0, 0)))
    m_pad = m + pad
    x_rows = x_rows.astype(jnp.float32)

    cost = pl.CostEstimate(
        flops=2 * m_pad * n_inputs * n_outputs,
        transcendentals=0,
        bytes_accessed=(
            n_inputs * n_outputs * jnp.dtype(w_t.dtype).itemsize
            + m_pad * n_inputs * 4
            + n_outputs * 4
            + m_pad * n_outputs * 4
        ),
    )

    out = pl.pallas_call(
        _linreg_kernel,
        out_shape=jax.ShapeDtypeStruct((m_pad, n_outputs), jnp.float32),
        grid=(m_pad // tile_m,),
        in_specs=[
            pl.BlockSpec((tile_m, n_inputs), lambda i: (i, 0)),     # x tile
            pl.BlockSpec((n_inputs, n_outputs), lambda i: (0, 0)),  # W_T (resident)
            pl.BlockSpec((1, n_outputs), lambda i: (0, 0)),         # bias row
        ],
        out_specs=pl.BlockSpec((tile_m, n_outputs), lambda i: (i, 0)),
        compiler_params=pltpu.CompilerParams(dimension_semantics=("parallel",)),
        cost_estimate=cost,
    )(x_rows, w_t, b_row)

    return out[:m]


if __name__ == "__main__":
    # Shapes implied by the module: x of any shape, flattened to n_inputs.
    # x = (2, 4, 16, 16) -> n_inputs = 2048; n_outputs = 128.
    key = jax.random.PRNGKey(0)
    kx, kw, kb, kxb = jax.random.split(key, 4)

    x = jax.random.normal(kx, (2, 4, 16, 16), dtype=jnp.float32)

    n_inputs = 2 * 4 * 16 * 16
    n_outputs = 128
    # Deterministic init mimicking nn.Linear: U(-1/sqrt(fan_in), 1/sqrt(fan_in))
    bound = 1.0 / jnp.sqrt(jnp.float32(n_inputs))
    weight = jax.random.uniform(
        kw, (n_outputs, n_inputs), dtype=jnp.float32, minval=-bound, maxval=bound
    )
    bias = jax.random.uniform(
        kb, (n_outputs,), dtype=jnp.float32, minval=-bound, maxval=bound
    )

    # Parameter prep happens ONCE (setup time), not per forward call.
    w_t, b_row = prepare_linreg_params(weight, bias)  # bf16 weight storage
    w_t, b_row = jax.block_until_ready((w_t, b_row))

    # --- single-sample forward (exact LinRegNet.forward semantics) ---
    y = jax.block_until_ready(linreg_forward(x, w_t, b_row))

    x_flat = jnp.reshape(x, (-1,))
    w_deq = w_t.astype(jnp.float32)  # (n_inputs, n_outputs), dequantized bf16
    y_ref_q = jnp.dot(x_flat, w_deq, precision=jax.lax.Precision.HIGHEST) + bias
    y_ref_f32 = jnp.dot(x_flat, weight.T, precision=jax.lax.Precision.HIGHEST) + bias

    assert y.shape == (n_outputs,)
    # Tight check vs the (dequantized) weights actually used by the kernel.
    assert jnp.allclose(y, y_ref_q, atol=2e-3, rtol=2e-3), "mismatch vs bf16-weight ref"
    # Loose check vs the original f32 weights (bf16 storage error is bounded).
    assert jnp.allclose(y, y_ref_f32, atol=5e-2, rtol=5e-2), "mismatch vs f32 ref"

    # --- batched amortized path (optional API; one weight DMA for M rows) ---
    m = 16
    xb = jax.random.normal(kxb, (m, n_inputs), dtype=jnp.float32)
    yb = jax.block_until_ready(linreg_forward_batched(xb, w_t, b_row, tile_m=8))
    yb_ref = jnp.dot(xb, w_deq, precision=jax.lax.Precision.HIGHEST) + bias
    assert yb.shape == (m, n_outputs)
    assert jnp.allclose(yb, yb_ref, atol=2e-3, rtol=2e-3), "batched mismatch"

    print("KERNEL_OK")
</pallas_src>

<mosaic_0001>
module attributes {stable_mosaic.version = 11 : i64} {
  func.func @_linreg_kernel(%arg0: memref<1x2048xf32, #tpu.memory_space<vmem>>, %arg1: memref<2048x128xbf16, #tpu.memory_space<vmem>>, %arg2: memref<1x128xf32, #tpu.memory_space<vmem>>, %arg3: memref<1x128xf32, #tpu.memory_space<vmem>>) attributes {dimension_semantics = [], scalar_prefetch = 0 : i64, scratch_operands = 0 : i64, tpu.core_type = #tpu.core_type<tc>} {
    %c0 = arith.constant 0 : index
    %c0_0 = arith.constant 0 : index
    %0 = vector.load %arg1[%c0, %c0_0] : memref<2048x128xbf16, #tpu.memory_space<vmem>>, vector<2048x128xbf16>
    %1 = arith.extf %0 : vector<2048x128xbf16> to vector<2048x128xf32>
    %c0_1 = arith.constant 0 : index
    %c0_2 = arith.constant 0 : index
    %2 = vector.load %arg0[%c0_1, %c0_2] : memref<1x2048xf32, #tpu.memory_space<vmem>>, vector<1x2048xf32>
    %cst = arith.constant dense<0.000000e+00> : vector<1x128xf32>
    %3 = tpu.matmul %2, %1, %cst {dimension_numbers = #tpu.dot_dimension_numbers<[1], [0], [0], [1], [0, 0, 1, 1], [], []>, precision = #tpu.contract_precision<fp32>} : vector<1x2048xf32>, vector<2048x128xf32>, vector<1x128xf32> -> vector<1x128xf32>
    %c0_3 = arith.constant 0 : index
    %c0_4 = arith.constant 0 : index
    %4 = vector.load %arg2[%c0_3, %c0_4] : memref<1x128xf32, #tpu.memory_space<vmem>>, vector<1x128xf32>
    %5 = arith.addf %3, %4 : vector<1x128xf32>
    %c0_5 = arith.constant 0 : index
    %c0_6 = arith.constant 0 : index
    %6 = vector.load %arg3[%c0_5, %c0_6] : memref<1x128xf32, #tpu.memory_space<vmem>>, vector<1x128xf32>
    tpu.vector_store %arg3[%c0_5, %c0_6], %5 {strides = array<i32>} : memref<1x128xf32, #tpu.memory_space<vmem>>, vector<1x128xf32>,
    return
  }
}

</mosaic_0001>

<bundles_post_ra>
// kernel: tpu_custom_call.1
= control target key start
LH: loop header
LB: loop body
LE: loop exit
PB: predicated region body
PF: predicated region fallthrough
CT: control target
= control target key end

     0   :  { %8 = vsyncpa [#allocation3], 0  ;;  %s13314_s0 = inlined_call_operand.hbm [shape: f32[1,2048], index: 0, kind: input, shape index: {}]   ;;  %s13315_s1 = inlined_call_operand.hbm [shape: bf16[2048,128], index: 1, kind: input, shape index: {}]   ;;  %s13316_s2 = inlined_call_operand.vmem [shape: f32[1,128], index: 2, kind: input, shape index: {}]   ;;  %s13317_s3 = inlined_call_operand.hbm [shape: f32[1,128], index: 3, kind: output, shape index: {}]  }
   0x1   :  { %9 = vsyncpa [#allocation6], 0 }
   0x2   :  { %10 = vsyncpa [#allocation4], 0  ;;  %s8407_s12 = smov [#allocation2]   ;;  %s8408_s14 = smov [#allocation5]  }
   0x3   :  { %s17_s13 = sshll.u32 %s8407_s12, 4  ;;  %s26_s15 = sshll.u32 %s8408_s14, 4  ;;  %s18_s13 = int_to_ptr.vmem [resolvable:$true] %s17_s13  ;;  %s27_s15 = int_to_ptr.vmem [resolvable:$true] %s26_s15 }
   0x4   :  { %s8349_s16 = scalar_lea.vmem %s18_s13, 256  ;;  %p8354_p1 = scmp.lt.s32.totalorder %s18_s13, %s18_s13 }
   0x5   :  { %p8350_p0 = scmp.ne.s32.totalorder %s18_s13, %s8349_s16  ;;  %p8355_p2 = scmp.lt.s32.totalorder %s8349_s16, %s8349_s16 }
   0x7   :  { %p8356_p3 = por %p8355_p2, %p8354_p1 }
   0x9   :  { %p8357_p4 = pnand %p8356_p3, %p8350_p0 }
   0xb   :  { %8360 = shalt.err (!%p8357_p4)
}
   0xc   :  { %20 = dma.hbm_to_vmem [thread:$0]  %s13314_s0, 256, %s18_s13, [#allocation3]  }
   0xd   :  { %s8369_s19 = scalar_lea.vmem %s27_s15, 16384  ;;  %p8374_p6 = scmp.lt.s32.totalorder %s27_s15, %s27_s15 }
   0xe   :  { %p8370_p5 = scmp.ne.s32.totalorder %s27_s15, %s8369_s19  ;;  %p8375_p7 = scmp.lt.s32.totalorder %s8369_s19, %s8369_s19 }
  0x10   :  { %p8376_p8 = por %p8375_p7, %p8374_p6 }
  0x12   :  { %p8377_p9 = pnand %p8376_p8, %p8370_p5 }
  0x14   :  { %8380 = shalt.err (!%p8377_p9)
}
  0x15   :  { %s8409_s20 = smov 64   ;;  %s8410_s21 = smov 4  }
  0x16   :  { %32 = dma.hbm_to_vmem [thread:$0]  %s13315_s1, 16384, %s27_s15, [#allocation6], %s8409_s20, %s8409_s20, %s8410_s21  }
  0x17   :  { %8401 = dma.done.wait [#allocation3], 256  }
  0x18   :  { %8402 = vsyncadd [#allocation3], 4294967040 }
  0x19   :  { %8403 = dma.done.wait [#allocation6], 16384  }
  0x1a   :  { %8404 = vsyncadd [#allocation6], 4294950912  ;;  %v558_v0 = vlaneseq  ;;  %v6541_v2 = vld [vmem:[#allocation5 + $0x78] sm:$0xff]   ;;  %v6540_v4 = vld [vmem:[#allocation5 + $0x70] sm:$0xff]  }
  0x1b   :  { %v6533_v3 = vld [vmem:[#allocation5 + $0x38] sm:$0xff]   ;;  %v8442_v7 = vunpack.c.h.bf16 %v6541_v2  ;;  %v8446_v9 = vunpack.c.l.bf16 %v6541_v2  ;;  %v6532_v11 = vld [vmem:[#allocation5 + $0x30] sm:$0xff]   ;;  %v6539_v12 = vld [vmem:[#allocation5 + $0x68] sm:$0xff]   ;;  %v8450_v14 = vunpack.c.h.bf16 %v6540_v4  ;;  %v8454_v16 = vunpack.c.l.bf16 %v6540_v4 }
  0x1c   :  { %v8438_v1 = vshrl.u32 %v558_v0, 7  ;;  %v8444_v8 = vunpack.c.h.bf16 %v6533_v3  ;;  %v8448_v10 = vunpack.c.l.bf16 %v6533_v3  ;;  %v6531_v13 = vld [vmem:[#allocation5 + $0x28] sm:$0xff]   ;;  %v8452_v15 = vunpack.c.h.bf16 %v6532_v11  ;;  %v6538_v18 = vld [vmem:[#allocation5 + $0x60] sm:$0xff]   ;;  %v6537_v44 = vld [vmem:[#allocation5 + $0x58] sm:$0xff]  }
  0x1d   :  { %v8456_v17 = vunpack.c.l.bf16 %v6532_v11  ;;  %6654 = vmatprep.subr.mxu0 %v8442_v7  ;;  %v8459_v19 = vunpack.c.h.bf16 %v6539_v12  ;;  %v8463_v20 = vsub.f32 %v8442_v7, %v8442_v7  ;;  %v8465_v21 = vunpack.c.h.bf16 %v6531_v13  ;;  %v6530_v23 = vld [vmem:[#allocation5 + $0x20] sm:$0xff]   ;;  %v6529_v49 = vld [vmem:[#allocation5 + $0x18] sm:$0xff]   ;;  %v6536_v62 = vld [vmem:[#allocation5 + $0x50] sm:$0xff]  }
  0x1e   :  { %13862 = vst [vmem:[#allocation11_spill] sm:$0xff] %v8438_v1  ;;  %v8469_v22 = vsub.f32 %v8444_v8, %v8444_v8  ;;  %6655 = vmatpush3.msra.mxu0 %v8444_v8  ;;  %v8472_v24 = vunpack.c.l.bf16 %v6539_v12  ;;  %v8476_v25 = vsub.f32 %v8446_v9, %v8446_v9  ;;  %v8478_v26 = vunpack.c.l.bf16 %v6531_v13  ;;  %v6528_v4 = vld [vmem:[#allocation5 + $0x10] sm:$0xff]  }
  0x1f   :  { %13863 = vst [vmem:[#allocation12_spill] sm:$0xff] %v8463_v20  ;;  %v8482_v27 = vsub.f32 %v8448_v10, %v8448_v10  ;;  %6656 = vmatprep.subr.mxu0 %v8446_v9  ;;  %v13333_v28 = vand.u32 4294901760, %v8463_v20  ;;  %v8487_v30 = vunpack.c.h.bf16 %v6538_v18  ;;  %v8491_v31 = vsub.f32 %v8450_v14, %v8450_v14 }
  0x20   :  { %v13331_v29 = vand.u32 4294901760, %v8469_v22  ;;  %6657 = vmatpush3.msra.mxu0 %v8448_v10  ;;  %v13330_v32 = vand.u32 4294901760, %v8476_v25  ;;  %v8496_v34 = vunpack.c.h.bf16 %v6530_v23  ;;  %v8500_v35 = vsub.f32 %v8452_v15, %v8452_v15 }
  0x21   :  { %v13329_v33 = vand.u32 4294901760, %v8482_v27  ;;  %6658 = vmatprep.subr.mxu0 %v8450_v14  ;;  %v817_v36 = vsub.f32 %v8463_v20, %v13333_v28  ;;  %v13327_v38 = vand.u32 4294901760, %v8491_v31  ;;  %v8510_v39 = vunpack.c.l.bf16 %v6538_v18 }
  0x22   :  { %v721_v37 = vsub.f32 %v8469_v22, %v13331_v29  ;;  %6659 = vmatpush3.msra.mxu0 %v8452_v15  ;;  %v823_v40 = vsub.f32 %v8476_v25, %v13330_v32  ;;  %v13326_v42 = vand.u32 4294901760, %v8500_v35  ;;  %v8522_v43 = vsub.f32 %v8454_v16, %v8454_v16 }
  0x23   :  { %v727_v41 = vsub.f32 %v8482_v27, %v13329_v33  ;;  %6660 = vmatprep.subr.mxu0 %v8454_v16  ;;  %v818_v45 = vand.u32 4294901760, %v817_v36  ;;  %v829_v47 = vsub.f32 %v8491_v31, %v13327_v38  ;;  %v8528_v48 = vunpack.c.l.bf16 %v6530_v23  ;;  %v6016_v33 = vld [vmem:[#allocation5] sm:$0xff]  }
  0x24   :  { %v722_v46 = vand.u32 4294901760, %v721_v37  ;;  %6661 = vmatpush3.msra.mxu0 %v8456_v17  ;;  %v824_v50 = vand.u32 4294901760, %v823_v40  ;;  %v733_v52 = vsub.f32 %v8500_v35, %v13326_v42  ;;  %v13324_v53 = vand.u32 4294901760, %v8522_v43 }
  0x25   :  { %v728_v51 = vand.u32 4294901760, %v727_v41  ;;  %6662 = vmatprep.subr.mxu0 %v8459_v19  ;;  %6689 = vmatprep.subr.mxu1 %v818_v45  ;;  %v830_v54 = vand.u32 4294901760, %v829_v47  ;;  %v8538_v55 = vsub.f32 %v8456_v17, %v8456_v17  ;;  %v8540_v56 = vunpack.c.h.bf16 %v6537_v44 }
  0x26   :  { %v8544_v57 = vsub.f32 %v8459_v19, %v8459_v19  ;;  %6663 = vmatpush3.msra.mxu0 %v8465_v21  ;;  %6690 = vmatpush3.msra.mxu1 %v722_v46  ;;  %v734_v58 = vand.u32 4294901760, %v733_v52  ;;  %v835_v59 = vsub.f32 %v8522_v43, %v13324_v53  ;;  %v8550_v60 = vunpack.c.h.bf16 %v6529_v49  ;;  %v6535_v52 = vld [vmem:[#allocation5 + $0x48] sm:$0xff]  }
  0x27   :  { %v8554_v61 = vsub.f32 %v8465_v21, %v8465_v21  ;;  %6664 = vmatprep.subr.mxu0 %v8472_v24  ;;  %6691 = vmatprep.subr.mxu1 %v824_v50  ;;  %v13323_v63 = vand.u32 4294901760, %v8538_v55  ;;  %v8559_v2 = vunpack.c.l.bf16 %v6537_v44  ;;  %v8563_v3 = vsub.f32 %v8472_v24, %v8472_v24 }
  0x28   :  { %13864 = vst [vmem:[#allocation13_spill] sm:$0xff] %v8550_v60  ;;  %v13322_v0 = vand.u32 4294901760, %v8544_v57  ;;  %6665 = vmatpush3.msra.mxu0 %v8478_v26  ;;  %6692 = vmatpush3.msra.mxu1 %v728_v51  ;;  %v836_v11 = vand.u32 4294901760, %v835_v59  ;;  %v8567_v13 = vunpack.c.l.bf16 %v6529_v49  ;;  %v8571_v18 = vsub.f32 %v8478_v26, %v8478_v26 }
  0x29   :  { %13865 = vst [vmem:[#allocation14_spill] sm:$0xff] %v8559_v2  ;;  %v13319_v12 = vand.u32 4294901760, %v8554_v61  ;;  %6666 = vmatprep.subr.mxu0 %v8487_v30  ;;  %6693 = vmatprep.subr.mxu1 %v830_v54  ;;  %v739_v23 = vsub.f32 %v8538_v55, %v13323_v63  ;;  %v13318_v37 = vand.u32 4294901760, %v8563_v3  ;;  %v8581_v40 = vunpack.c.h.bf16 %v6536_v62 }
  0x2a   :  { %13866 = vst [vmem:[#allocation15_spill] sm:$0xff] %v8567_v13  ;;  %v841_v36 = vsub.f32 %v8544_v57, %v13322_v0  ;;  %6667 = vmatpush3.msra.mxu0 %v8496_v34  ;;  %6694 = vmatpush3.msra.mxu1 %v734_v58  ;;  %v13320_v44 = vand.u32 4294901760, %v8571_v18  ;;  %v8590_v45 = vsub.f32 %v8487_v30, %v8487_v30  ;;  %v8592_v46 = vunpack.c.h.bf16 %v6528_v4 }
  0x2b   :  { %13867 = vst [vmem:[#allocation16_spill] sm:$0xff] %v8581_v40  ;;  %v745_v41 = vsub.f32 %v8554_v61, %v13319_v12  ;;  %6668 = vmatprep.subr.mxu0 %v8510_v39  ;;  %6695 = vmatprep.subr.mxu1 %v836_v11  ;;  %v740_v47 = vand.u32 4294901760, %v739_v23  ;;  %v847_v50 = vsub.f32 %v8563_v3, %v13318_v37  ;;  %v8607_v11 = vunpack.c.l.bf16 %v6536_v62  ;;  %v6527_v23 = vld [vmem:[#allocation5 + $0x8] sm:$0xff]  }
  0x2c   :  { %13868 = vst [vmem:[#allocation17_spill] sm:$0xff] %v8592_v46  ;;  %v842_v49 = vand.u32 4294901760, %v841_v36  ;;  %v8600_v51 = vsub.f32 %v8496_v34, %v8496_v34  ;;  %6669 = vmatpush3.msra.mxu0 %v8528_v48  ;;  %v751_v58 = vsub.f32 %v8571_v18, %v13320_v44  ;;  %v13321_v59 = vand.u32 4294901760, %v8590_v45 }
  0x2d   :  { %v746_v54 = vand.u32 4294901760, %v745_v41  ;;  %13869 = vst [vmem:[#allocation18_spill] sm:$0xff] %v8607_v11  ;;  %6696 = vmatpush3.msra.mxu1 %v740_v47  ;;  %6670 = vmatprep.subr.mxu0 %v8540_v56  ;;  %v848_v36 = vand.u32 4294901760, %v847_v50  ;;  %v8613_v12 = vsub.f32 %v8510_v39, %v8510_v39  ;;  %v8615_v41 = vunpack.c.l.bf16 %v6528_v4 }
  0x2e   :  { %v13325_v37 = vand.u32 4294901760, %v8600_v51  ;;  %6697 = vmatprep.subr.mxu1 %v842_v49  ;;  %6671 = vmatpush3.msra.mxu0 %v8550_v60  ;;  %v752_v44 = vand.u32 4294901760, %v751_v58  ;;  %v853_v62 = vsub.f32 %v8590_v45, %v13321_v59  ;;  %v8623_v47 = vsub.f32 %v8528_v48, %v8528_v48 }
  0x2f   :  { %13870 = vst [vmem:[#allocation19_spill] sm:$0xff] %v8615_v41  ;;  %v8625_v50 = vunpack.c.h.bf16 %v6535_v52  ;;  %6698 = vmatpush3.msra.mxu1 %v746_v54  ;;  %6672 = vmatprep.subr.mxu0 %v8559_v2  ;;  %v13328_v49 = vand.u32 4294901760, %v8613_v12  ;;  %v8634_v58 = vsub.f32 %v8540_v56, %v8540_v56  ;;  %v8636_v59 = vunpack.c.h.bf16 %v6527_v23 }
  0x30   :  { %v757_v4 = vsub.f32 %v8600_v51, %v13325_v37  ;;  %6699 = vmatprep.subr.mxu1 %v848_v36  ;;  %6673 = vmatpush3.msra.mxu0 %v8567_v13  ;;  %v854_v0 = vand.u32 4294901760, %v853_v62  ;;  %v13332_v54 = vand.u32 4294901760, %v8623_v47  ;;  %v8642_v63 = vsub.f32 %v8550_v60, %v8550_v60  ;;  %v6534_v37 = vld [vmem:[#allocation5 + $0x40] sm:$0xff]  }
  0x31   :  { %13871 = vst [vmem:[#allocation20_spill] sm:$0xff] %v8625_v50  ;;  %13872 = vst [vmem:[#allocation21_spill] sm:$0xff] %v8636_v59  ;;  %v8644_v53 = vunpack.c.l.bf16 %v6535_v52  ;;  %6700 = vmatpush3.msra.mxu1 %v752_v44  ;;  %6674 = vmatprep.subr.mxu0 %v8581_v40  ;;  %v859_v36 = vsub.f32 %v8613_v12, %v13328_v49  ;;  %v13334_v38 = vand.u32 4294901760, %v8634_v58  ;;  %v8686_v5 = vunpack.c.h.bf16 %v6016_v33 }
  0x32   :  { %v758_v42 = vand.u32 4294901760, %v757_v4  ;;  %v8653_v62 = vsub.f32 %v8559_v2, %v8559_v2  ;;  %6701 = vmatprep.subr.mxu1 %v854_v0  ;;  %6675 = vmatpush3.msra.mxu0 %v8592_v46  ;;  %v763_v44 = vsub.f32 %v8623_v47, %v13332_v54  ;;  %v13335_v52 = vand.u32 4294901760, %v8642_v63 }
  0x33   :  { %13873 = vst [vmem:[#allocation22_spill] sm:$0xff] %v8644_v53  ;;  %v8660_v4 = vunpack.c.l.bf16 %v6527_v23  ;;  %v8664_v49 = vsub.f32 %v8567_v13, %v8567_v13  ;;  %6676 = vmatprep.subr.mxu0 %v8607_v11  ;;  %v860_v32 = vand.u32 4294901760, %v859_v36  ;;  %v865_v0 = vsub.f32 %v8634_v58, %v13334_v38  ;;  %13876 = vst [vmem:[#allocation25_spill] sm:$0xff] %v8686_v5 }
  0x34   :  { %6702 = vmatpush3.msra.mxu1 %v758_v42  ;;  %v13340_v29 = vand.u32 4294901760, %v8653_v62  ;;  %v8671_v54 = vunpack.c.h.bf16 %v6534_v37  ;;  %6677 = vmatpush3.msra.mxu0 %v8615_v41  ;;  %v764_v23 = vand.u32 4294901760, %v763_v44  ;;  %v769_v28 = vsub.f32 %v8642_v63, %v13335_v52  ;;  %v8692_v52 = vld [vmem:[#allocation2] sm:$0xff] }
  0x35   :  { %13874 = vst [vmem:[#allocation23_spill] sm:$0xff] %v8660_v4  ;;  %v8680_v36 = vsub.f32 %v8581_v40, %v8581_v40  ;;  %6703 = vmatprep.subr.mxu1 %v860_v32  ;;  %6678 = vmatprep.subr.mxu0 %v8625_v50  ;;  %v866_v38 = vand.u32 4294901760, %v865_v0  ;;  %v8690_v44 = vsub.f32 %v8592_v46, %v8592_v46  ;;  %13877 = vst [vmem:[#allocation26_spill] sm:$0xff] %v8692_v52 }
  0x36   :  { %13875 = vst [vmem:[#allocation24_spill] sm:$0xff] %v8671_v54  ;;  %v871_v6 = vsub.f32 %v8653_v62, %v13340_v29  ;;  %6704 = vmatpush3.msra.mxu1 %v764_v23  ;;  %6679 = vmatpush3.msra.mxu0 %v8636_v59  ;;  %v770_v42 = vand.u32 4294901760, %v769_v28  ;;  %v13878_v32 = vand.u32 4294901760, %v8664_v49  ;;  %v8699_v13 = vunpack.c.l.bf16 %v6534_v37 }
  0x37   :  { %v13345_v40 = vand.u32 4294901760, %v8680_v36  ;;  %6705 = vmatprep.subr.mxu1 %v866_v38  ;;  %6680 = vmatprep.subr.mxu0 %v8644_v53  ;;  %v13350_v46 = vand.u32 4294901760, %v8690_v44  ;;  %v8705_v23 = vsub.f32 %v8607_v11, %v8607_v11  ;;  %v8707_v2 = vunpack.c.l.bf16 %v6016_v33 }
  0x38   :  { %v775_v0 = vsub.f32 %v8664_v49, %v13878_v32  ;;  %v872_v29 = vand.u32 4294901760, %v871_v6  ;;  %6706 = vmatpush3.msra.mxu1 %v770_v42  ;;  %6681 = vmatpush3.msra.mxu0 %v8660_v4  ;;  %v8715_v38 = vsub.f32 %v8615_v41, %v8615_v41  ;;  %v13879_v6 = vsub.s32 1, %v8438_v1 }
  0x39   :  { %v877_v37 = vsub.f32 %v8680_v36, %v13345_v40  ;;  %6682 = vmatprep.subr.mxu0 %v8671_v54  ;;  %v781_v33 = vsub.f32 %v8690_v44, %v13350_v46  ;;  %v13880_v40 = vsub.s32 0, %v8438_v1  ;;  %v8738_v46 = vsub.f32 %v8636_v59, %v8636_v59 }
  0x3a   :  { %v776_v28 = vand.u32 4294901760, %v775_v0  ;;  %v565_v32 = vrot.slane %v8692_v52, %v13879_v6  ;;  %6707 = vmatprep.subr.mxu1 %v872_v29  ;;  %v8727_v0 = vsub.f32 %v8625_v50, %v8625_v50  ;;  %6683 = vmatpush3.msra.mxu0 %v8686_v5  ;;  %v13361_v29 = vand.u32 4294901760, %v8715_v38 }
  0x3b   :  { %v561_v41 = vrot.slane %v8692_v52, %v13880_v40  ;;  %v878_v11 = vand.u32 4294901760, %v877_v37  ;;  %v782_v42 = vand.u32 4294901760, %v781_v33  ;;  %6684 = vmatprep.subr.mxu0 %v8699_v13  ;;  %v13882_v50 = vand.u32 4294901760, %v8705_v23 }
  0x3c   :  { %6708 = vmatpush3.msra.mxu1 %v776_v28  ;;  %v8734_v6 = vand.u32 4294901760, %v565_v32  ;;  %v13364_v40 = vand.u32 4294901760, %v8727_v0  ;;  %6685 = vmatpush3.msra.mxu0 %v8707_v2  ;;  %v787_v37 = vsub.f32 %v8715_v38, %v13361_v29  ;;  %v8757_v59 = vsub.f32 %v8644_v53, %v8644_v53 }
  0x3d   :  { %v883_v1 = vsub.f32 %v8705_v23, %v13882_v50  ;;  %v8745_v28 = vand.u32 4294901760, %v561_v41  ;;  %6709 = vmatprep.subr.mxu1 %v878_v11  ;;  %6724 = vmatprep.subr.mxu0 %v8463_v20  ;;  %v13886_v53 = vand.u32 4294901760, %v8738_v46 }
  0x3e   :  { %13881 = vst [vmem:[#allocation27_spill] sm:$0xff] %v8734_v6  ;;  %v8752_v52 = vsub.f32 %v565_v32, %v8734_v6  ;;  %6710 = vmatpush3.msra.mxu1 %v782_v42  ;;  %v889_v11 = vsub.f32 %v8727_v0, %v13364_v40  ;;  %v8768_v32 = vsub.f32 %v8660_v4, %v8660_v4  ;;  %v788_v29 = vand.u32 4294901760, %v787_v37 }
  0x3f   :  { %13883 = vst [vmem:[#allocation28_spill] sm:$0xff] %v8745_v28  ;;  %v884_v50 = vand.u32 4294901760, %v883_v1  ;;  %v8764_v60 = vsub.f32 %v561_v41, %v8745_v28  ;;  %v793_v1 = vsub.f32 %v8738_v46, %v13886_v53  ;;  %v13371_v42 = vand.u32 4294901760, %v8757_v59  ;;  %911 = vmatprep.mubr.f32.mxu1 %v8734_v6 }
  0x40   :  { %13885 = vst [vmem:[#allocation30_spill] sm:$0xff] %v8768_v32  ;;  %v13370_v33 = vand.u32 4294901760, %v8752_v52  ;;  %v890_v40 = vand.u32 4294901760, %v889_v11  ;;  %v13379_v20 = vand.u32 4294901760, %v8768_v32  ;;  %v8780_v4 = vsub.f32 %v8671_v54, %v8671_v54 }
  0x41   :  { %13884 = vst [vmem:[#allocation29_spill] sm:$0xff] %v8764_v60  ;;  %6711 = vmatprep.subr.mxu1 %v884_v50  ;;  %v13376_v41 = vand.u32 4294901760, %v8764_v60  ;;  %v794_v53 = vand.u32 4294901760, %v793_v1  ;;  %v895_v6 = vsub.f32 %v8757_v59, %v13371_v42  ;;  %v8790_v50 = vsub.f32 %v8686_v5, %v8686_v5 }
  0x42   :  { %6712 = vmatpush3.msra.mxu1 %v788_v29  ;;  %v705_v37 = vsub.f32 %v8752_v52, %v13370_v33  ;;  %v799_v29 = vsub.f32 %v8768_v32, %v13379_v20  ;;  %v13385_v33 = vand.u32 4294901760, %v8780_v4  ;;  %v8801_v1 = vsub.f32 %v8699_v13, %v8699_v13 }
  0x43   :  { %6713 = vmatprep.subr.mxu1 %v890_v40  ;;  %v711_v11 = vsub.f32 %v8764_v60, %v13376_v41  ;;  %v896_v54 = vand.u32 4294901760, %v895_v6  ;;  %v13384_v5 = vand.u32 4294901760, %v8790_v50  ;;  %v8806_v40 = vsub.f32 %v8707_v2, %v8707_v2 }
  0x44   :  { %v706_v42 = vand.u32 4294901760, %v705_v37  ;;  %6714 = vmatpush3.msra.mxu1 %v794_v53  ;;  %v800_v60 = vand.u32 4294901760, %v799_v29  ;;  %v901_v20 = vsub.f32 %v8780_v4, %v13385_v33  ;;  %v13383_v32 = vand.u32 4294901760, %v8801_v1  ;;  %v13900_v33 = vld [vmem:[#allocation21_spill] sm:$0xff] }
  0x45   :  { %13887 = vst [vmem:[#allocation31_spill] sm:$0xff] %v8806_v40  ;;  %v712_v41 = vand.u32 4294901760, %v711_v11  ;;  %6715 = vmatprep.subr.mxu1 %v896_v54  ;;  %v805_v6 = vsub.f32 %v8790_v50, %v13384_v5  ;;  %v13382_v37 = vand.u32 4294901760, %v8806_v40 }
  0x46   :  { %707 = vmatprep.mubr.f32.mxu0 %v706_v42  ;;  %6716 = vmatpush3.msra.mxu1 %v800_v60  ;;  %v902_v53 = vand.u32 4294901760, %v901_v20  ;;  %v907_v11 = vsub.f32 %v8801_v1, %v13383_v32  ;;  %v13888_v60 = vld [vmem:[#allocation13_spill] sm:$0xff]  ;;  %v13898_v32 = vld [vmem:[#allocation12_spill] sm:$0xff] }
  0x47   :  { %713 = vmatmul.mubr.f32.vlgmr.msra.gmra.mxu0 %v712_v41  ;;  %v806_v29 = vand.u32 4294901760, %v805_v6  ;;  %v811_v54 = vsub.f32 %v8806_v40, %v13382_v37  ;;  %v13889_v41 = vld [vmem:[#allocation14_spill] sm:$0xff]  ;;  %v13890_v6 = vld [vmem:[#allocation15_spill] sm:$0xff]  ;;  %v13899_v5 = vand.u32 4294901760, %v13898_v32  ;;  %v13907_v32 = vand.u32 4294901760, %v8491_v31 }
  0x48   :  { %6725 = vmatpush3.msra.mxu0 %v8469_v22  ;;  %1016 = vmatprep.mubr.f32.mxu0 %v8752_v52  ;;  %v908_v42 = vand.u32 4294901760, %v907_v11  ;;  %v13892_v11 = vld [vmem:[#allocation16_spill] sm:$0xff]  ;;  %v13897_v37 = vld [vmem:[#allocation29_spill] sm:$0xff] }
  0x49   :  { %6726 = vmatprep.subr.mxu0 %v8476_v25  ;;  %6717 = vmatprep.subr.mxu1 %v902_v53  ;;  %v812_v20 = vand.u32 4294901760, %v811_v54  ;;  %v13891_v53 = vld [vmem:[#allocation30_spill] sm:$0xff] }
  0x4a   :  { %6727 = vmatpush3.msra.mxu0 %v8482_v27  ;;  %6718 = vmatpush3.msra.mxu1 %v806_v29  ;;  %v13893_v29 = vld [vmem:[#allocation17_spill] sm:$0xff]  ;;  %v13894_v54 = vld [vmem:[#allocation18_spill] sm:$0xff] }
  0x4b   :  { %6728 = vmatprep.subr.mxu0 %v8491_v31  ;;  %6719 = vmatprep.subr.mxu1 %v908_v42  ;;  %v13895_v42 = vld [vmem:[#allocation19_spill] sm:$0xff]  ;;  %v13913_v31 = vand.u32 4294901760, %v13897_v37 }
  0x4c   :  { %6729 = vmatpush3.msra.mxu0 %v8500_v35  ;;  %6720 = vmatpush3.msra.mxu1 %v812_v20  ;;  %v13896_v20 = vld [vmem:[#allocation20_spill] sm:$0xff] }
  0x4d   :  { %6730 = vmatprep.subr.mxu0 %v8522_v43  ;;  %913 = vmatmul.mubr.f32.vlgmr.msra.gmra.mxu1 %v8745_v28  ;;  %v13901_v28 = vand.u32 4294901760, %v8469_v22  ;;  %v13909_v22 = vand.u32 4294901760, %v8500_v35  ;;  %v13915_v35 = vand.u32 4294901760, %v8554_v61 }
  0x4e   :  { %6731 = vmatpush3.msra.mxu0 %v8538_v55  ;;  %6759 = vmatprep.subr.mxu1 %v8442_v7 }
  0x4f   :  { %6732 = vmatprep.subr.mxu0 %v8544_v57  ;;  %6760 = vmatpush3.msra.mxu1 %v8444_v8 }
  0x50   :  { %6733 = vmatpush3.msra.mxu0 %v8554_v61  ;;  %6761 = vmatprep.subr.mxu1 %v8446_v9  ;;  %v13919_v61 = vand.u32 4294901760, %v8600_v51 }
  0x51   :  { %6734 = vmatprep.subr.mxu0 %v8563_v3  ;;  %6762 = vmatpush3.msra.mxu1 %v8448_v10 }
  0x52   :  { %6735 = vmatpush3.msra.mxu0 %v8571_v18  ;;  %6763 = vmatprep.subr.mxu1 %v8450_v14 }
  0x53   :  { %6736 = vmatprep.subr.mxu0 %v8590_v45  ;;  %6764 = vmatpush3.msra.mxu1 %v8452_v15 }
  0x54   :  { %6737 = vmatpush3.msra.mxu0 %v8600_v51  ;;  %6765 = vmatprep.subr.mxu1 %v8454_v16 }
  0x55   :  { %6738 = vmatprep.subr.mxu0 %v8613_v12  ;;  %6766 = vmatpush3.msra.mxu1 %v8456_v17 }
  0x56   :  { %6739 = vmatpush3.msra.mxu0 %v8623_v47  ;;  %6767 = vmatprep.subr.mxu1 %v8459_v19 }
  0x57   :  { %6740 = vmatprep.subr.mxu0 %v8634_v58  ;;  %6768 = vmatpush3.msra.mxu1 %v8465_v21 }
  0x58   :  { %6741 = vmatpush3.msra.mxu0 %v8642_v63  ;;  %6769 = vmatprep.subr.mxu1 %v8472_v24 }
  0x59   :  { %6742 = vmatprep.subr.mxu0 %v8653_v62  ;;  %6770 = vmatpush3.msra.mxu1 %v8478_v26 }
  0x5a   :  { %6743 = vmatpush3.msra.mxu0 %v8664_v49  ;;  %6771 = vmatprep.subr.mxu1 %v8487_v30 }
  0x5b   :  { %6744 = vmatprep.subr.mxu0 %v8680_v36  ;;  %6772 = vmatpush3.msra.mxu1 %v8496_v34 }
  0x5c   :  { %6745 = vmatpush3.msra.mxu0 %v8690_v44  ;;  %6773 = vmatprep.subr.mxu1 %v8510_v39 }
  0x5d   :  { %6746 = vmatprep.subr.mxu0 %v8705_v23  ;;  %6774 = vmatpush3.msra.mxu1 %v8528_v48 }
  0x5e   :  { %6747 = vmatpush3.msra.mxu0 %v8715_v38  ;;  %6775 = vmatprep.subr.mxu1 %v8540_v56 }
  0x5f   :  { %6748 = vmatprep.subr.mxu0 %v8727_v0  ;;  %6776 = vmatpush3.msra.mxu1 %v13888_v60 }
  0x60   :  { %6749 = vmatpush3.msra.mxu0 %v8738_v46  ;;  %6777 = vmatprep.subr.mxu1 %v13889_v41 }
  0x61   :  { %6750 = vmatprep.subr.mxu0 %v8757_v59  ;;  %6778 = vmatpush3.msra.mxu1 %v13890_v6 }
  0x62   :  { %6751 = vmatpush3.msra.mxu0 %v13891_v53  ;;  %6779 = vmatprep.subr.mxu1 %v13892_v11 }
  0x63   :  { %6752 = vmatprep.subr.mxu0 %v8780_v4  ;;  %6780 = vmatpush3.msra.mxu1 %v13893_v29  ;;  %v13902_v29 = vld [vmem:[#allocation22_spill] sm:$0xff] }
  0x64   :  { %6753 = vmatpush3.msra.mxu0 %v8790_v50  ;;  %6781 = vmatprep.subr.mxu1 %v13894_v54  ;;  %v13903_v54 = vand.u32 4294901760, %v8476_v25  ;;  %v13910_v25 = vand.u32 4294901760, %v8522_v43  ;;  %v13916_v43 = vand.u32 4294901760, %v8563_v3  ;;  %v13920_v3 = vand.u32 4294901760, %v8613_v12 }
  0x65   :  { %6754 = vmatprep.subr.mxu0 %v8801_v1  ;;  %6782 = vmatpush3.msra.mxu1 %v13895_v42  ;;  %v13904_v42 = vld [vmem:[#allocation23_spill] sm:$0xff]  ;;  %v13923_v12 = vand.u32 4294901760, %v8642_v63 }
  0x66   :  { %6755 = vmatpush3.msra.mxu0 %v8806_v40  ;;  %6783 = vmatprep.subr.mxu1 %v13896_v20  ;;  %v13905_v40 = vand.u32 4294901760, %v8482_v27  ;;  %v13906_v20 = vld [vmem:[#allocation24_spill] sm:$0xff]  ;;  %v13911_v27 = vand.u32 4294901760, %v8752_v52 }
  0x67   :  { %1019 = vmatmul.mubr.f32.vlgmr.msra.gmra.mxu0 %v13897_v37  ;;  %6794 = vmatprep.subr.mxu0 %v13899_v5  ;;  %v13908_v5 = vld [vmem:[#allocation25_spill] sm:$0xff] }
  0x68   :  { %6784 = vmatpush3.msra.mxu1 %v13900_v33  ;;  %6795 = vmatpush3.msra.mxu0 %v13901_v28  ;;  %v13912_v28 = vand.u32 4294901760, %v8538_v55  ;;  %v13917_v55 = vand.u32 4294901760, %v8571_v18  ;;  %v13922_v18 = vand.u32 4294901760, %v8634_v58  ;;  %v13927_v58 = vand.u32 4294901760, %v8680_v36 }
  0x69   :  { %6785 = vmatprep.subr.mxu1 %v13902_v29  ;;  %6796 = vmatprep.subr.mxu0 %v13903_v54  ;;  %v13930_v36 = vand.u32 4294901760, %v8705_v23 }
  0x6a   :  { %6786 = vmatpush3.msra.mxu1 %v13904_v42  ;;  %6797 = vmatpush3.msra.mxu0 %v13905_v40  ;;  %v13914_v40 = vand.u32 4294901760, %v8544_v57  ;;  %v13918_v57 = vand.u32 4294901760, %v8590_v45  ;;  %v6548_v45 = vld [vmem:[#allocation5 + $0xb0] sm:$0xff]  }
  0x6b   :  { %6787 = vmatprep.subr.mxu1 %v13906_v20  ;;  %6798 = vmatprep.subr.mxu0 %v13907_v32  ;;  %v8954_v63 = vunpack.c.h.bf16 %v6548_v45  ;;  %v8998_v32 = vunpack.c.l.bf16 %v6548_v45 }
  0x6c   :  { %6788 = vmatpush3.msra.mxu1 %v13908_v5  ;;  %6799 = vmatpush3.msra.mxu0 %v13909_v22 }
  0x6d   :  { %6789 = vmatprep.subr.mxu1 %v8699_v13  ;;  %6800 = vmatprep.subr.mxu0 %v13910_v25  ;;  %13926 = vst [vmem:[#allocation13_spill] sm:$0xff] %v8954_v63  ;;  %v8993_v23 = vsub.f32 %v8954_v63, %v8954_v63  ;;  %13933 = vst [vmem:[#allocation15_spill] sm:$0xff] %v8998_v32  ;;  %v13935_v25 = vand.u32 4294901760, %v8738_v46 }
  0x6e   :  { %6790 = vmatpush3.msra.mxu1 %v8707_v2  ;;  %1091 = vmatprep.mubr.f32.mxu1 %v13911_v27 }
  0x6f   :  { %6801 = vmatpush3.msra.mxu0 %v13912_v28  ;;  %1095 = vmatmul.mubr.f32.vlgmr.msra.gmra.mxu1 %v13913_v31  ;;  %v13938_v31 = vand.u32 4294901760, %v13891_v53 }
  0x70   :  { %6802 = vmatprep.subr.mxu0 %v13914_v40  ;;  %6829 = vmatprep.subr.mxu1 %v8442_v7  ;;  %v6557_v7 = vld [vmem:[#allocation5 + $0xf8] sm:$0xff]  }
  0x71   :  { %6803 = vmatpush3.msra.mxu0 %v13915_v35  ;;  %6830 = vmatpush3.msra.mxu1 %v8444_v8  ;;  %v6549_v8 = vld [vmem:[#allocation5 + $0xb8] sm:$0xff]   ;;  %v6546_v35 = vld [vmem:[#allocation5 + $0xa0] sm:$0xff]  }
  0x72   :  { %6804 = vmatprep.subr.mxu0 %v13916_v43  ;;  %6831 = vmatprep.subr.mxu1 %v8446_v9  ;;  %v13921_v9 = vand.u32 4294901760, %v8623_v47  ;;  %v8947_v51 = vunpack.c.l.bf16 %v6549_v8  ;;  %v13940_v43 = vand.u32 4294901760, %v8780_v4  ;;  %v13942_v4 = vand.u32 4294901760, %v8790_v50  ;;  %v13946_v50 = vld [vmem:[#allocation18_spill] sm:$0xff] }
  0x73   :  { %6805 = vmatpush3.msra.mxu0 %v13917_v55  ;;  %6832 = vmatpush3.msra.mxu1 %v8448_v10  ;;  %v8932_v10 = vunpack.c.h.bf16 %v6557_v7  ;;  %v9041_v55 = vsub.f32 %v8998_v32, %v8998_v32 }
  0x74   :  { %6806 = vmatprep.subr.mxu0 %v13918_v57  ;;  %6833 = vmatprep.subr.mxu1 %v8450_v14  ;;  %v6556_v14 = vld [vmem:[#allocation5 + $0xf0] sm:$0xff]   ;;  %v8981_v37 = vsub.f32 %v8947_v51, %v8947_v51 }
  0x75   :  { %6807 = vmatpush3.msra.mxu0 %v13919_v61  ;;  %6834 = vmatpush3.msra.mxu1 %v8452_v15  ;;  %v8937_v15 = vunpack.c.h.bf16 %v6549_v8  ;;  %v8949_v47 = vunpack.c.h.bf16 %v6556_v14 }
  0x76   :  { %6808 = vmatprep.subr.mxu0 %v13920_v3  ;;  %6835 = vmatprep.subr.mxu1 %v8454_v16  ;;  %v8942_v16 = vunpack.c.l.bf16 %v6557_v7  ;;  %v13392_v28 = vand.u32 4294901760, %v8981_v37  ;;  %v13943_v7 = vld [vmem:[#allocation17_spill] sm:$0xff]  ;;  %v13944_v3 = vld [vmem:[#allocation11_spill] sm:$0xff] }
  0x77   :  { %6809 = vmatpush3.msra.mxu0 %v13921_v9  ;;  %6836 = vmatpush3.msra.mxu1 %v8456_v17  ;;  %v13924_v17 = vand.u32 4294901760, %v8653_v62  ;;  %v6555_v62 = vld [vmem:[#allocation5 + $0xe8] sm:$0xff]   ;;  %v13407_v9 = vsub.s32 3, %v13944_v3 }
  0x78   :  { %6810 = vmatprep.subr.mxu0 %v13922_v18  ;;  %6837 = vmatprep.subr.mxu1 %v8459_v19  ;;  %v13925_v19 = vand.u32 4294901760, %v8664_v49  ;;  %v13928_v49 = vand.u32 4294901760, %v8690_v44  ;;  %v8974_v52 = vsub.f32 %v8942_v16, %v8942_v16  ;;  %v13931_v44 = vand.u32 4294901760, %v8715_v38 }
  0x79   :  { %6811 = vmatpush3.msra.mxu0 %v13923_v12  ;;  %6838 = vmatpush3.msra.mxu1 %v8465_v21  ;;  %v8958_v21 = vsub.f32 %v8932_v10, %v8932_v10  ;;  %v9000_v22 = vunpack.c.h.bf16 %v6555_v62  ;;  %v9026_v40 = vunpack.c.l.bf16 %v6555_v62  ;;  %v9067_v18 = vsub.f32 %v8981_v37, %v13392_v28 }
  0x7a   :  { %6812 = vmatprep.subr.mxu0 %v13924_v17  ;;  %6839 = vmatprep.subr.mxu1 %v8472_v24  ;;  %v8965_v24 = vsub.f32 %v8937_v15, %v8937_v15  ;;  %v13393_v27 = vand.u32 4294901760, %v8974_v52  ;;  %v9076_v17 = vunpack.c.h.bf16 %v6546_v35 }
  0x7b   :  { %6813 = vmatpush3.msra.mxu0 %v13925_v19  ;;  %6840 = vmatpush3.msra.mxu1 %v8478_v26  ;;  %v8970_v26 = vunpack.c.l.bf16 %v6556_v14  ;;  %v13395_v54 = vand.u32 4294901760, %v8958_v21  ;;  %13934 = vst [vmem:[#allocation30_spill] sm:$0xff] %v9000_v22  ;;  %13939 = vst [vmem:[#allocation29_spill] sm:$0xff] %v9026_v40  ;;  %v9045_v57 = vsub.f32 %v9000_v22, %v9000_v22  ;;  %v13945_v14 = vand.u32 4294901760, %v8801_v1  ;;  %v13949_v19 = vld [vmem:[#allocation31_spill] sm:$0xff] }
  0x7c   :  { %6814 = vmatprep.subr.mxu0 %v13927_v58  ;;  %6841 = vmatprep.subr.mxu1 %v8487_v30  ;;  %v6547_v30 = vld [vmem:[#allocation5 + $0xa8] sm:$0xff]   ;;  %v13394_v38 = vand.u32 4294901760, %v8965_v24  ;;  %13948 = vst [vmem:[#allocation22_spill] sm:$0xff] %v9076_v17  ;;  %v13950_v58 = vand.u32 4294901760, %v13949_v19  ;;  %v9110_v19 = vunpack.c.l.bf16 %v6546_v35  ;;  %v9131_v28 = vsub.f32 %v9076_v17, %v9076_v17  ;;  %v6552_v35 = vld [vmem:[#allocation5 + $0xd0] sm:$0xff]  }
  0x7d   :  { %6815 = vmatpush3.msra.mxu0 %v13928_v49  ;;  %6842 = vmatpush3.msra.mxu1 %v8496_v34  ;;  %13929 = vst [vmem:[#allocation14_spill] sm:$0xff] %v8970_v26  ;;  %v8985_v34 = vsub.f32 %v8949_v47, %v8949_v47  ;;  %v9037_v53 = vunpack.c.l.bf16 %v6547_v30  ;;  %v13951_v1 = vld [vmem:[#allocation27_spill] sm:$0xff] }
  0x7e   :  { %6816 = vmatprep.subr.mxu0 %v13930_v36  ;;  %6843 = vmatprep.subr.mxu1 %v8510_v39  ;;  %v13932_v39 = vand.u32 4294901760, %v8727_v0  ;;  %v9011_v0 = vsub.f32 %v8970_v26, %v8970_v26  ;;  %13956 = vst [vmem:[#allocation24_spill] sm:$0xff] %v9110_v19 }
  0x7f   :  { %6817 = vmatpush3.msra.mxu0 %v13931_v44  ;;  %6844 = vmatpush3.msra.mxu1 %v8528_v48  ;;  %v9006_v48 = vunpack.c.h.bf16 %v6547_v30  ;;  %v13390_v46 = vand.u32 4294901760, %v8985_v34  ;;  %13941 = vst [vmem:[#allocation12_spill] sm:$0xff] %v9037_v53  ;;  %v6553_v30 = vld [vmem:[#allocation5 + $0xd8] sm:$0xff]   ;;  %v9091_v44 = vsub.f32 %v9026_v40, %v9026_v40 }
  0x80   :  { %6818 = vmatprep.subr.mxu0 %v13932_v39  ;;  %6845 = vmatprep.subr.mxu1 %v8540_v56  ;;  %v13937_v56 = vand.u32 4294901760, %v8757_v59  ;;  %v6554_v59 = vld [vmem:[#allocation5 + $0xe0] sm:$0xff]   ;;  %v13391_v61 = vand.u32 4294901760, %v9011_v0 }
  0x81   :  { %6819 = vmatpush3.msra.mxu0 %v13935_v25  ;;  %6846 = vmatpush3.msra.mxu1 %v13888_v60  ;;  %13936 = vst [vmem:[#allocation16_spill] sm:$0xff] %v9006_v48  ;;  %v9024_v60 = vsub.f32 %v8958_v21, %v13395_v54  ;;  %v9058_v8 = vsub.f32 %v9006_v48, %v9006_v48  ;;  %v9069_v45 = vunpack.c.h.bf16 %v6554_v59  ;;  %v9087_v36 = vunpack.c.l.bf16 %v6554_v59  ;;  %v13953_v39 = vld [vmem:[#allocation19_spill] sm:$0xff]  ;;  %v13954_v25 = vld [vmem:[#allocation28_spill] sm:$0xff] }
  0x82   :  { %6820 = vmatprep.subr.mxu0 %v13937_v56  ;;  %6847 = vmatprep.subr.mxu1 %v13889_v41  ;;  %v13389_v41 = vand.u32 4294901760, %v8993_v23  ;;  %v9074_v12 = vsub.f32 %v8985_v34, %v13390_v46  ;;  %v9100_v59 = vsub.f32 %v9037_v53, %v9037_v53  ;;  %v13964_v56 = vld [vmem:[#allocation26_spill] sm:$0xff] }
  0x83   :  { %6821 = vmatpush3.msra.mxu0 %v13938_v31  ;;  %6848 = vmatpush3.msra.mxu1 %v13890_v6  ;;  %v9035_v6 = vsub.f32 %v8965_v24, %v13394_v38  ;;  %13947 = vst [vmem:[#allocation21_spill] sm:$0xff] %v9069_v45  ;;  %v1488_v49 = vand.u32 4294901760, %v9024_v60  ;;  %13952 = vst [vmem:[#allocation23_spill] sm:$0xff] %v9087_v36  ;;  %v13396_v31 = vand.u32 4294901760, %v9041_v55  ;;  %v9145_v38 = vunpack.c.l.bf16 %v6553_v30 }
  0x84   :  { %6822 = vmatprep.subr.mxu0 %v13940_v43  ;;  %6849 = vmatprep.subr.mxu1 %v13892_v11  ;;  %v9053_v11 = vsub.f32 %v8974_v52, %v13393_v27  ;;  %v9085_v62 = vsub.f32 %v8993_v23, %v13389_v41  ;;  %v13397_v43 = vand.u32 4294901760, %v9045_v57  ;;  %v9117_v41 = vunpack.c.h.bf16 %v6553_v30 }
  0x85   :  { %6823 = vmatpush3.msra.mxu0 %v13942_v4  ;;  %6850 = vmatpush3.msra.mxu1 %v13943_v7  ;;  %v6545_v4 = vld [vmem:[#allocation5 + $0x98] sm:$0xff]   ;;  %v13955_v7 = vld [vmem:[#allocation20_spill] sm:$0xff]  ;;  %v9121_v46 = vsub.f32 %v9069_v45, %v9069_v45  ;;  %13959 = vst [vmem:[#allocation18_spill] sm:$0xff] %v9145_v38  ;;  %v13400_v54 = vand.u32 4294901760, %v9100_v59  ;;  %v9160_v30 = vsub.f32 %v9087_v36, %v9087_v36 }
  0x86   :  { %6824 = vmatprep.subr.mxu0 %v13945_v14  ;;  %6851 = vmatprep.subr.mxu1 %v13946_v50  ;;  %v9108_v50 = vsub.f32 %v9011_v0, %v13391_v61  ;;  %13957 = vst [vmem:[#allocation25_spill] sm:$0xff] %v9117_v41  ;;  %v9126_v61 = vunpack.c.h.bf16 %v6545_v4  ;;  %v9143_v27 = vsub.f32 %v9045_v57, %v13397_v43 }
  0x87   :  { %6825 = vmatpush3.msra.mxu0 %v13950_v58  ;;  %1229 = vmatprep.mubr.f32.mxu0 %v13951_v1  ;;  %v13398_v58 = vand.u32 4294901760, %v9058_v8  ;;  %v9167_v43 = vsub.f32 %v9110_v19, %v9110_v19 }
  0x88   :  { %6852 = vmatpush3.msra.mxu1 %v13953_v39  ;;  %1231 = vmatmul.mubr.f32.vlgmr.msra.gmra.mxu0 %v13954_v25  ;;  %13958 = vst [vmem:[#allocation17_spill] sm:$0xff] %v9126_v61  ;;  %v9156_v39 = vunpack.c.l.bf16 %v6545_v4 }
  0x89   :  { %6853 = vmatprep.subr.mxu1 %v13955_v7  ;;  %6864 = vmatprep.subr.mxu0 %v8932_v10  ;;  %v6544_v7 = vld [vmem:[#allocation5 + $0x90] sm:$0xff]  }
  0x8a   :  { %6854 = vmatpush3.msra.mxu1 %v13900_v33  ;;  %6865 = vmatpush3.msra.mxu0 %v8937_v15  ;;  %v13399_v33 = vand.u32 4294901760, %v9091_v44  ;;  %13960 = vst [vmem:[#allocation31_spill] sm:$0xff] %v9156_v39  ;;  %v9183_v14 = vunpack.c.h.bf16 %v6544_v7 }
  0x8b   :  { %6855 = vmatprep.subr.mxu1 %v13902_v29  ;;  %6866 = vmatprep.subr.mxu0 %v8942_v16  ;;  %v9138_v29 = vsub.f32 %v9041_v55, %v13396_v31  ;;  %v9154_v31 = vsub.f32 %v9058_v8, %v13398_v58  ;;  %v9171_v58 = vsub.f32 %v9117_v41, %v9117_v41 }
  0x8c   :  { %6856 = vmatpush3.msra.mxu1 %v13904_v42  ;;  %6867 = vmatpush3.msra.mxu0 %v8947_v51  ;;  %v9181_v42 = vunpack.c.h.bf16 %v6552_v35  ;;  %13962 = vst [vmem:[#allocation19_spill] sm:$0xff] %v9183_v14 }
  0x8d   :  { %6857 = vmatprep.subr.mxu1 %v13906_v20  ;;  %6868 = vmatprep.subr.mxu0 %v8949_v47  ;;  %v1410_v4 = vand.u32 4294901760, %v9138_v29  ;;  %v9193_v20 = vsub.f32 %v9100_v59, %v13400_v54  ;;  %v573_v54 = vrot.slane %v13964_v56, %v13407_v9  ;;  %v6543_v29 = vld [vmem:[#allocation5 + $0x88] sm:$0xff]   ;;  %v13967_v9 = vand.u32 4294901760, %v9035_v6 }
  0x8e   :  { %6858 = vmatpush3.msra.mxu1 %v13908_v5  ;;  %6869 = vmatpush3.msra.mxu0 %v8954_v63  ;;  %v9179_v5 = vsub.f32 %v9091_v44, %v13399_v33  ;;  %13961 = vst [vmem:[#allocation27_spill] sm:$0xff] %v9181_v42  ;;  %v9197_v33 = vsub.f32 %v9126_v61, %v9126_v61 }
  0x8f   :  { %6859 = vmatprep.subr.mxu1 %v8699_v13  ;;  %6870 = vmatprep.subr.mxu0 %v8970_v26  ;;  %v1512_v13 = vand.u32 4294901760, %v9143_v27  ;;  %v6551_v27 = vld [vmem:[#allocation5 + $0xc8] sm:$0xff]   ;;  %v13966_v26 = vsub.s32 2, %v13944_v3  ;;  %v1422_v6 = vand.u32 4294901760, %v9193_v20  ;;  %v9259_v20 = vsub.f32 %v9181_v42, %v9181_v42 }
  0x90   :  { %6860 = vmatpush3.msra.mxu1 %v8707_v2  ;;  %1301 = vmatprep.mubr.f32.mxu1 %v13951_v1  ;;  %v1416_v2 = vand.u32 4294901760, %v9154_v31  ;;  %v9202_v1 = vunpack.c.l.bf16 %v6552_v35  ;;  %v1518_v60 = vand.u32 4294901760, %v9179_v5  ;;  %v9230_v31 = vunpack.c.l.bf16 %v6544_v7 }
  0x91   :  { %6871 = vmatpush3.msra.mxu0 %v8998_v32  ;;  %1303 = vmatmul.mubr.f32.vlgmr.msra.gmra.mxu1 %v13954_v25  ;;  %v13965_v32 = vand.u32 4294901760, %v9121_v46  ;;  %v569_v63 = vrot.slane %v13964_v56, %v13966_v26  ;;  %v9234_v35 = vsub.f32 %v9145_v38, %v9145_v38  ;;  %v13970_v26 = vand.u32 4294901760, %v9053_v11 }
  0x92   :  { %13963 = vst [vmem:[#allocation28_spill] sm:$0xff] %v9202_v1  ;;  %6872 = vmatprep.subr.mxu0 %v9000_v22  ;;  %6899 = vmatprep.subr.mxu1 %v1488_v49  ;;  %v13968_v49 = vand.u32 4294901760, %v9131_v28  ;;  %13969 = vst [vmem:[#allocation20_spill] sm:$0xff] %v9230_v31  ;;  %v9245_v5 = vsub.f32 %v9156_v39, %v9156_v39  ;;  %v13972_v7 = vand.u32 4294901760, %v9067_v18  ;;  %v9261_v56 = vand.u32 4294901760, %v573_v54 }
  0x93   :  { %v9214_v25 = vsub.f32 %v9121_v46, %v13965_v32  ;;  %6873 = vmatpush3.msra.mxu0 %v9006_v48  ;;  %6900 = vmatpush3.msra.mxu1 %v13967_v9  ;;  %v9240_v9 = vunpack.c.h.bf16 %v6551_v27  ;;  %v13975_v3 = vand.u32 4294901760, %v9074_v12  ;;  %v6550_v48 = vld [vmem:[#allocation5 + $0xc0] sm:$0xff]   ;;  %v9277_v22 = vand.u32 4294901760, %v569_v63 }
  0x94   :  { %v9228_v32 = vsub.f32 %v9131_v28, %v13968_v49  ;;  %6874 = vmatprep.subr.mxu0 %v9026_v40  ;;  %6901 = vmatprep.subr.mxu1 %v13970_v26  ;;  %v13973_v49 = vand.u32 4294901760, %v9160_v30  ;;  %v9255_v26 = vunpack.c.h.bf16 %v6543_v29  ;;  %13974 = vst [vmem:[#allocation32_spill] sm:$0xff] %v9261_v56  ;;  %v13979_v12 = vand.u32 4294901760, %v9085_v62 }
  0x95   :  { %13971 = vst [vmem:[#allocation26_spill] sm:$0xff] %v9240_v9  ;;  %6875 = vmatpush3.msra.mxu0 %v9037_v53  ;;  %6902 = vmatpush3.msra.mxu1 %v13972_v7  ;;  %v1524_v18 = vand.u32 4294901760, %v9214_v25  ;;  %v13976_v7 = vand.u32 4294901760, %v9167_v43  ;;  %v13977_v53 = vand.u32 4294901760, %v9171_v58  ;;  %13978 = vst [vmem:[#allocation33_spill] sm:$0xff] %v9277_v22  ;;  %v9283_v25 = vunpack.c.l.bf16 %v6551_v27 }
  0x96   :  { %v9253_v11 = vsub.f32 %v9160_v30, %v13973_v49  ;;  %6876 = vmatprep.subr.mxu0 %v9069_v45  ;;  %6903 = vmatprep.subr.mxu1 %v13975_v3  ;;  %v1428_v3 = vand.u32 4294901760, %v9228_v32  ;;  %v9288_v45 = vsub.f32 %v9183_v14, %v9183_v14  ;;  %v6542_v32 = vld [vmem:[#allocation5 + $0x80] sm:$0xff]  }
  0x97   :  { %v9270_v49 = vsub.f32 %v9167_v43, %v13976_v7  ;;  %v9275_v40 = vsub.f32 %v9171_v58, %v13977_v53  ;;  %6877 = vmatpush3.msra.mxu0 %v9076_v17  ;;  %6904 = vmatpush3.msra.mxu1 %v13979_v12  ;;  %13980 = vst [vmem:[#allocation34_spill] sm:$0xff] %v9283_v25  ;;  %v13981_v53 = vand.u32 4294901760, %v9108_v50  ;;  %v13982_v17 = vand.u32 4294901760, %v9197_v33 }
  0x98   :  { %6878 = vmatprep.subr.mxu0 %v9087_v36  ;;  %v9298_v12 = vunpack.c.l.bf16 %v6543_v29  ;;  %v9303_v7 = vsub.f32 %v9202_v1, %v9202_v1  ;;  %v1530_v50 = vand.u32 4294901760, %v9253_v11  ;;  %v9327_v36 = vunpack.c.h.bf16 %v6542_v32  ;;  %1581 = vmatprep.mubr.f32.mxu1 %v9261_v56 }
  0x99   :  { %6905 = vmatprep.subr.mxu1 %v13981_v53  ;;  %v9296_v62 = vsub.f32 %v9197_v33, %v13982_v17  ;;  %6879 = vmatpush3.msra.mxu0 %v9110_v19  ;;  %v9307_v53 = vunpack.c.h.bf16 %v6550_v48  ;;  %v9311_v17 = vsub.f32 %v573_v54, %v9261_v56  ;;  %v1434_v29 = vand.u32 4294901760, %v9270_v49 }
  0x9a   :  { %6906 = vmatpush3.msra.mxu1 %v1410_v4  ;;  %6880 = vmatprep.subr.mxu0 %v9117_v41  ;;  %v1536_v27 = vand.u32 4294901760, %v9275_v40  ;;  %v9318_v19 = vsub.f32 %v9230_v31, %v9230_v31  ;;  %v9321_v4 = vsub.f32 %v569_v63, %v9277_v22  ;;  %v13985_v54 = vand.u32 4294901760, %v9234_v35 }
  0x9b   :  { %13983 = vst [vmem:[#allocation35_spill] sm:$0xff] %v9311_v17  ;;  %6907 = vmatprep.subr.mxu1 %v1512_v13  ;;  %6881 = vmatpush3.msra.mxu0 %v9126_v61  ;;  %v9332_v40 = vsub.f32 %v9240_v9, %v9240_v9  ;;  %v1440_v63 = vand.u32 4294901760, %v9296_v62  ;;  %v13986_v49 = vand.u32 4294901760, %v9245_v5  ;;  %v13987_v13 = vand.u32 4294901760, %v9259_v20 }
  0x9c   :  { %13984 = vst [vmem:[#allocation36_spill] sm:$0xff] %v9321_v4  ;;  %6908 = vmatpush3.msra.mxu1 %v1416_v2  ;;  %v1541_v11 = vsub.f32 %v9234_v35, %v13985_v54  ;;  %6882 = vmatprep.subr.mxu0 %v9145_v38  ;;  %v9342_v54 = vsub.f32 %v9255_v26, %v9255_v26  ;;  %v9356_v61 = vunpack.c.l.bf16 %v6542_v32  ;;  %v13988_v62 = vand.u32 4294901760, %v9288_v45 }
  0x9d   :  { %6909 = vmatprep.subr.mxu1 %v1518_v60  ;;  %v1445_v2 = vsub.f32 %v9245_v5, %v13986_v49  ;;  %6883 = vmatpush3.msra.mxu0 %v9156_v39  ;;  %v1547_v38 = vsub.f32 %v9259_v20, %v13987_v13  ;;  %v9348_v60 = vunpack.c.l.bf16 %v6550_v48  ;;  %v9353_v49 = vsub.f32 %v9283_v25, %v9283_v25 }
  0x9e   :  { %6910 = vmatpush3.msra.mxu1 %v1422_v6  ;;  %6884 = vmatprep.subr.mxu0 %v9181_v42  ;;  %v9362_v13 = vsub.f32 %v9298_v12, %v9298_v12  ;;  %v1542_v48 = vand.u32 4294901760, %v1541_v11  ;;  %v1451_v41 = vsub.f32 %v9288_v45, %v13988_v62  ;;  %v9371_v32 = vsub.f32 %v9307_v53, %v9307_v53 }
  0x9f   :  { %6911 = vmatprep.subr.mxu1 %v1524_v18  ;;  %6885 = vmatpush3.msra.mxu0 %v9183_v14  ;;  %v1446_v6 = vand.u32 4294901760, %v1445_v2  ;;  %v13989_v39 = vand.u32 4294901760, %v9303_v7  ;;  %v9380_v11 = vsub.f32 %v9327_v36, %v9327_v36  ;;  %v1548_v62 = vand.u32 4294901760, %v1547_v38 }
  0xa0   :  { %6912 = vmatpush3.msra.mxu1 %v1428_v3  ;;  %6886 = vmatprep.subr.mxu0 %v9202_v1  ;;  %v13990_v18 = vand.u32 4294901760, %v9311_v17  ;;  %v9389_v2 = vsub.f32 %v9348_v60, %v9348_v60 }
  0xa1   :  { %6913 = vmatprep.subr.mxu1 %v1530_v50  ;;  %v1553_v14 = vsub.f32 %v9303_v7, %v13989_v39  ;;  %6887 = vmatpush3.msra.mxu0 %v9230_v31  ;;  %v13992_v39 = vand.u32 4294901760, %v9318_v19  ;;  %v1452_v50 = vand.u32 4294901760, %v1451_v41  ;;  %v13996_v31 = vand.u32 4294901760, %v9342_v54 }
  0xa2   :  { %6914 = vmatpush3.msra.mxu1 %v1434_v29  ;;  %v1375_v1 = vsub.f32 %v9311_v17, %v13990_v18  ;;  %13991 = vst [vmem:[#allocation37_spill] sm:$0xff] %v9389_v2  ;;  %6888 = vmatprep.subr.mxu0 %v9240_v9  ;;  %v13993_v29 = vand.u32 4294901760, %v9321_v4  ;;  %v9401_v18 = vsub.f32 %v9356_v61, %v9356_v61 }
  0xa3   :  { %6915 = vmatprep.subr.mxu1 %v1536_v27  ;;  %v1457_v3 = vsub.f32 %v9318_v19, %v13992_v39  ;;  %6889 = vmatpush3.msra.mxu0 %v9255_v26  ;;  %v13995_v27 = vand.u32 4294901760, %v9332_v40  ;;  %v13448_v39 = vand.u32 4294901760, %v9389_v2  ;;  %v14020_v56 = vld [vmem:[#allocation36_spill] sm:$0xff] }
  0xa4   :  { %v1381_v38 = vsub.f32 %v9321_v4, %v13993_v29  ;;  %13994 = vst [vmem:[#allocation38_spill] sm:$0xff] %v9401_v18  ;;  %6916 = vmatpush3.msra.mxu1 %v1440_v63  ;;  %6890 = vmatprep.subr.mxu0 %v9283_v25  ;;  %v1554_v29 = vand.u32 4294901760, %v1553_v14  ;;  %v1463_v4 = vsub.f32 %v9342_v54, %v13996_v31  ;;  %v1376_v41 = vand.u32 4294901760, %v1375_v1 }
  0xa5   :  { %v1559_v9 = vsub.f32 %v9332_v40, %v13995_v27  ;;  %6917 = vmatprep.subr.mxu1 %v1542_v48  ;;  %6891 = vmatpush3.msra.mxu0 %v9298_v12  ;;  %v13997_v63 = vand.u32 4294901760, %v9353_v49  ;;  %v1458_v14 = vand.u32 4294901760, %v1457_v3  ;;  %v13998_v25 = vand.u32 4294901760, %v9362_v13 }
  0xa6   :  { %6918 = vmatpush3.msra.mxu1 %v1446_v6  ;;  %6892 = vmatprep.subr.mxu0 %v9307_v53  ;;  %v1382_v48 = vand.u32 4294901760, %v1381_v38  ;;  %v13447_v17 = vand.u32 4294901760, %v9401_v18  ;;  %v13999_v6 = vand.u32 4294901760, %v9371_v32  ;;  %v14000_v3 = vand.u32 4294901760, %v9380_v11 }
  0xa7   :  { %v1565_v27 = vsub.f32 %v9353_v49, %v13997_v63  ;;  %6919 = vmatprep.subr.mxu1 %v1548_v62  ;;  %v1469_v31 = vsub.f32 %v9362_v13, %v13998_v25  ;;  %6893 = vmatpush3.msra.mxu0 %v9327_v36  ;;  %v1560_v1 = vand.u32 4294901760, %v1559_v9  ;;  %v1464_v62 = vand.u32 4294901760, %v1463_v4 }
  0xa8   :  { %6920 = vmatpush3.msra.mxu1 %v1452_v50  ;;  %v1571_v63 = vsub.f32 %v9371_v32, %v13999_v6  ;;  %6894 = vmatprep.subr.mxu0 %v9348_v60  ;;  %v1475_v38 = vsub.f32 %v9380_v11, %v14000_v3  ;;  %v1577_v9 = vsub.f32 %v9389_v2, %v13448_v39  ;;  %v14004_v6 = vld [vmem:[#allocation30_spill] sm:$0xff]  ;;  %v14007_v3 = vld [vmem:[#allocation12_spill] sm:$0xff]  ;;  %v14018_v39 = vld [vmem:[#allocation35_spill] sm:$0xff] }
  0xa9   :  { %6921 = vmatprep.subr.mxu1 %v1554_v29  ;;  %6895 = vmatpush3.msra.mxu0 %v9356_v61  ;;  %v1566_v25 = vand.u32 4294901760, %v1565_v27  ;;  %v1470_v50 = vand.u32 4294901760, %v1469_v31  ;;  %v1481_v29 = vsub.f32 %v9401_v18, %v13447_v17  ;;  %v14002_v31 = vld [vmem:[#allocation14_spill] sm:$0xff]  ;;  %v14017_v17 = vld [vmem:[#allocation28_spill] sm:$0xff] }
  0xaa   :  { %1377 = vmatprep.mubr.f32.mxu0 %v1376_v41  ;;  %6922 = vmatpush3.msra.mxu1 %v1458_v14  ;;  %v1572_v4 = vand.u32 4294901760, %v1571_v63  ;;  %v1476_v41 = vand.u32 4294901760, %v1475_v38  ;;  %v1578_v27 = vand.u32 4294901760, %v1577_v9  ;;  %v14005_v63 = vld [vmem:[#allocation16_spill] sm:$0xff]  ;;  %v14008_v38 = vld [vmem:[#allocation21_spill] sm:$0xff]  ;;  %v14010_v9 = vld [vmem:[#allocation23_spill] sm:$0xff] }
  0xab   :  { %1383 = vmatmul.mubr.f32.vlgmr.msra.gmra.mxu0 %v1382_v48  ;;  %6923 = vmatprep.subr.mxu1 %v1560_v1  ;;  %v1482_v14 = vand.u32 4294901760, %v1481_v29  ;;  %v14001_v48 = vld [vmem:[#allocation13_spill] sm:$0xff]  ;;  %v14003_v1 = vld [vmem:[#allocation15_spill] sm:$0xff] }
  0xac   :  { %6934 = vmatprep.subr.mxu0 %v8958_v21  ;;  %6924 = vmatpush3.msra.mxu1 %v1464_v62  ;;  %v14006_v62 = vld [vmem:[#allocation29_spill] sm:$0xff] }
  0xad   :  { %6935 = vmatpush3.msra.mxu0 %v8965_v24  ;;  %6925 = vmatprep.subr.mxu1 %v1566_v25  ;;  %v14009_v25 = vld [vmem:[#allocation22_spill] sm:$0xff]  ;;  %v14012_v29 = vld [vmem:[#allocation25_spill] sm:$0xff] }
  0xae   :  { %6936 = vmatprep.subr.mxu0 %v8974_v52  ;;  %6926 = vmatpush3.msra.mxu1 %v1470_v50  ;;  %v14011_v50 = vld [vmem:[#allocation24_spill] sm:$0xff] }
  0xaf   :  { %6937 = vmatpush3.msra.mxu0 %v8981_v37  ;;  %6927 = vmatprep.subr.mxu1 %v1572_v4  ;;  %v14013_v4 = vld [vmem:[#allocation17_spill] sm:$0xff] }
  0xb0   :  { %6938 = vmatprep.subr.mxu0 %v8985_v34  ;;  %6928 = vmatpush3.msra.mxu1 %v1476_v41  ;;  %v14014_v41 = vld [vmem:[#allocation18_spill] sm:$0xff] }
  0xb1   :  { %6939 = vmatpush3.msra.mxu0 %v8993_v23  ;;  %6929 = vmatprep.subr.mxu1 %v1578_v27  ;;  %v14015_v27 = vld [vmem:[#allocation31_spill] sm:$0xff] }
  0xb2   :  { %6940 = vmatprep.subr.mxu0 %v9011_v0  ;;  %6930 = vmatpush3.msra.mxu1 %v1482_v14  ;;  %v14016_v14 = vld [vmem:[#allocation19_spill] sm:$0xff] }
  0xb3   :  { %6941 = vmatpush3.msra.mxu0 %v9041_v55  ;;  %1583 = vmatmul.mubr.f32.vlgmr.msra.gmra.mxu1 %v9277_v22  ;;  %v14019_v22 = vld [vmem:[#allocation20_spill] sm:$0xff] }
  0xb4   :  { %6942 = vmatprep.subr.mxu0 %v9045_v57  ;;  %6969 = vmatprep.subr.mxu1 %v8932_v10 }
  0xb5   :  { %6943 = vmatpush3.msra.mxu0 %v9058_v8  ;;  %6970 = vmatpush3.msra.mxu1 %v8937_v15 }
  0xb6   :  { %6944 = vmatprep.subr.mxu0 %v9091_v44  ;;  %6971 = vmatprep.subr.mxu1 %v8942_v16 }
  0xb7   :  { %6945 = vmatpush3.msra.mxu0 %v9100_v59  ;;  %6972 = vmatpush3.msra.mxu1 %v8947_v51 }
  0xb8   :  { %6946 = vmatprep.subr.mxu0 %v9121_v46  ;;  %6973 = vmatprep.subr.mxu1 %v8949_v47 }
  0xb9   :  { %6947 = vmatpush3.msra.mxu0 %v9131_v28  ;;  %6974 = vmatpush3.msra.mxu1 %v14001_v48 }
  0xba   :  { %6948 = vmatprep.subr.mxu0 %v9160_v30  ;;  %6975 = vmatprep.subr.mxu1 %v14002_v31 }
  0xbb   :  { %6949 = vmatpush3.msra.mxu0 %v9167_v43  ;;  %6976 = vmatpush3.msra.mxu1 %v14003_v1 }
  0xbc   :  { %6950 = vmatprep.subr.mxu0 %v9171_v58  ;;  %6977 = vmatprep.subr.mxu1 %v14004_v6 }
  0xbd   :  { %6951 = vmatpush3.msra.mxu0 %v9197_v33  ;;  %6978 = vmatpush3.msra.mxu1 %v14005_v63 }
  0xbe   :  { %6952 = vmatprep.subr.mxu0 %v9234_v35  ;;  %6979 = vmatprep.subr.mxu1 %v14006_v62 }
  0xbf   :  { %6953 = vmatpush3.msra.mxu0 %v9245_v5  ;;  %6980 = vmatpush3.msra.mxu1 %v14007_v3 }
  0xc0   :  { %6954 = vmatprep.subr.mxu0 %v9259_v20  ;;  %6981 = vmatprep.subr.mxu1 %v14008_v38 }
  0xc1   :  { %6955 = vmatpush3.msra.mxu0 %v9288_v45  ;;  %6982 = vmatpush3.msra.mxu1 %v14009_v25 }
  0xc2   :  { %6956 = vmatprep.subr.mxu0 %v9303_v7  ;;  %6983 = vmatprep.subr.mxu1 %v14010_v9 }
  0xc3   :  { %6957 = vmatpush3.msra.mxu0 %v9318_v19  ;;  %6984 = vmatpush3.msra.mxu1 %v14011_v50 }
  0xc4   :  { %6958 = vmatprep.subr.mxu0 %v9332_v40  ;;  %6985 = vmatprep.subr.mxu1 %v14012_v29 }
  0xc5   :  { %6959 = vmatpush3.msra.mxu0 %v9342_v54  ;;  %6986 = vmatpush3.msra.mxu1 %v14013_v4 }
  0xc6   :  { %6960 = vmatprep.subr.mxu0 %v9353_v49  ;;  %6987 = vmatprep.subr.mxu1 %v14014_v41 }
  0xc7   :  { %6961 = vmatpush3.msra.mxu0 %v9362_v13  ;;  %6988 = vmatpush3.msra.mxu1 %v14015_v27  ;;  %v14021_v27 = vld [vmem:[#allocation26_spill] sm:$0xff] }
  0xc8   :  { %6962 = vmatprep.subr.mxu0 %v9371_v32  ;;  %6989 = vmatprep.subr.mxu1 %v9181_v42  ;;  %v14022_v42 = vand.u32 4294901760, %v8958_v21  ;;  %v14027_v21 = vand.u32 4294901760, %v8985_v34  ;;  %v14032_v34 = vand.u32 4294901760, %v14020_v56 }
  0xc9   :  { %6963 = vmatpush3.msra.mxu0 %v9380_v11  ;;  %6990 = vmatpush3.msra.mxu1 %v14016_v14  ;;  %v14023_v14 = vand.u32 4294901760, %v8965_v24  ;;  %v14028_v24 = vand.u32 4294901760, %v8993_v23  ;;  %v14034_v23 = vand.u32 4294901760, %v9058_v8  ;;  %v14038_v8 = vand.u32 4294901760, %v9131_v28 }
  0xca   :  { %6964 = vmatprep.subr.mxu0 %v9389_v2  ;;  %6991 = vmatprep.subr.mxu1 %v14017_v17  ;;  %v14024_v2 = vld [vmem:[#allocation34_spill] sm:$0xff]  ;;  %v14041_v28 = vand.u32 4294901760, %v9171_v58 }
  0xcb   :  { %6965 = vmatpush3.msra.mxu0 %v9401_v18  ;;  %1686 = vmatprep.mubr.f32.mxu0 %v14018_v39  ;;  %v14025_v18 = vand.u32 4294901760, %v8974_v52  ;;  %v14029_v52 = vand.u32 4294901760, %v9011_v0  ;;  %v14035_v0 = vand.u32 4294901760, %v9091_v44  ;;  %v6564_v44 = vld [vmem:[#allocation5 + $0x130] sm:$0xff]  }
  0xcc   :  { %6992 = vmatpush3.msra.mxu1 %v14019_v22  ;;  %1689 = vmatmul.mubr.f32.vlgmr.msra.gmra.mxu0 %v14020_v56  ;;  %v14026_v22 = vand.u32 4294901760, %v8981_v37  ;;  %v14030_v37 = vand.u32 4294901760, %v14018_v39  ;;  %v6573_v56 = vld [vmem:[#allocation5 + $0x178] sm:$0xff]   ;;  %v9569_v58 = vunpack.c.h.bf16 %v6564_v44 }
  0xcd   :  { %6993 = vmatprep.subr.mxu1 %v14021_v27  ;;  %7004 = vmatprep.subr.mxu0 %v14022_v42  ;;  %v14033_v42 = vand.u32 4294901760, %v9045_v57  ;;  %v14037_v57 = vand.u32 4294901760, %v9121_v46 }
  0xce   :  { %6994 = vmatpush3.msra.mxu1 %v9255_v26  ;;  %7005 = vmatpush3.msra.mxu0 %v14023_v14 }
  0xcf   :  { %6995 = vmatprep.subr.mxu1 %v14024_v2  ;;  %7006 = vmatprep.subr.mxu0 %v14025_v18  ;;  %v14043_v18 = vand.u32 4294901760, %v9234_v35  ;;  %v14045_v35 = vand.u32 4294901760, %v9259_v20  ;;  %v14047_v20 = vand.u32 4294901760, %v9303_v7  ;;  %v9613_v7 = vunpack.c.l.bf16 %v6564_v44 }
  0xd0   :  { %6996 = vmatpush3.msra.mxu1 %v9298_v12  ;;  %7007 = vmatpush3.msra.mxu0 %v14026_v22  ;;  %v14031_v22 = vand.u32 4294901760, %v9041_v55  ;;  %v14036_v55 = vand.u32 4294901760, %v9100_v59  ;;  %v9557_v59 = vunpack.c.l.bf16 %v6573_v56 }
  0xd1   :  { %6997 = vmatprep.subr.mxu1 %v9307_v53  ;;  %7008 = vmatprep.subr.mxu0 %v14027_v21  ;;  %14050 = vst [vmem:[#allocation14_spill] sm:$0xff] %v9613_v7  ;;  %v14051_v21 = vand.u32 4294901760, %v9332_v40  ;;  %v14056_v40 = vand.u32 4294901760, %v9353_v49 }
  0xd2   :  { %6998 = vmatpush3.msra.mxu1 %v9327_v36  ;;  %7009 = vmatpush3.msra.mxu0 %v14028_v24 }
  0xd3   :  { %6999 = vmatprep.subr.mxu1 %v9348_v60  ;;  %7010 = vmatprep.subr.mxu0 %v14029_v52 }
  0xd4   :  { %7000 = vmatpush3.msra.mxu1 %v9356_v61  ;;  %1761 = vmatprep.mubr.f32.mxu1 %v14030_v37  ;;  %v14054_v37 = vand.u32 4294901760, %v9342_v54 }
  0xd5   :  { %7011 = vmatpush3.msra.mxu0 %v14031_v22  ;;  %1765 = vmatmul.mubr.f32.vlgmr.msra.gmra.mxu1 %v14032_v34 }
  0xd6   :  { %7012 = vmatprep.subr.mxu0 %v14033_v42  ;;  %7039 = vmatprep.subr.mxu1 %v8932_v10  ;;  %v6565_v10 = vld [vmem:[#allocation5 + $0x138] sm:$0xff]   ;;  %v14058_v42 = vand.u32 4294901760, %v9362_v13  ;;  %v14061_v13 = vld [vmem:[#allocation27_spill] sm:$0xff] }
  0xd7   :  { %7013 = vmatpush3.msra.mxu0 %v14034_v23  ;;  %7040 = vmatpush3.msra.mxu1 %v8937_v15  ;;  %v14039_v15 = vand.u32 4294901760, %v9160_v30  ;;  %v9552_v46 = vunpack.c.h.bf16 %v6565_v10  ;;  %v14042_v30 = vand.u32 4294901760, %v9197_v33  ;;  %v14044_v33 = vand.u32 4294901760, %v9245_v5  ;;  %v6571_v5 = vld [vmem:[#allocation5 + $0x168] sm:$0xff]  }
  0xd8   :  { %7014 = vmatprep.subr.mxu0 %v14035_v0  ;;  %7041 = vmatprep.subr.mxu1 %v8942_v16  ;;  %v9547_v16 = vunpack.c.h.bf16 %v6573_v56  ;;  %v9619_v24 = vunpack.c.h.bf16 %v6571_v5  ;;  %v14059_v23 = vld [vmem:[#allocation31_spill] sm:$0xff]  ;;  %v14060_v56 = vand.u32 4294901760, %v9371_v32 }
  0xd9   :  { %7015 = vmatpush3.msra.mxu0 %v14036_v55  ;;  %7042 = vmatpush3.msra.mxu1 %v8947_v51  ;;  %v14040_v51 = vand.u32 4294901760, %v9167_v43  ;;  %v9562_v43 = vunpack.c.l.bf16 %v6565_v10  ;;  %v9656_v55 = vsub.f32 %v9613_v7, %v9613_v7  ;;  %v14063_v32 = vld [vmem:[#allocation19_spill] sm:$0xff] }
  0xda   :  { %7016 = vmatprep.subr.mxu0 %v14037_v57  ;;  %7043 = vmatprep.subr.mxu1 %v8949_v47  ;;  %v6572_v47 = vld [vmem:[#allocation5 + $0x170] sm:$0xff]   ;;  %14052 = vst [vmem:[#allocation15_spill] sm:$0xff] %v9619_v24  ;;  %v9668_v10 = vsub.f32 %v9619_v24, %v9619_v24 }
  0xdb   :  { %7017 = vmatpush3.msra.mxu0 %v14038_v8  ;;  %7044 = vmatpush3.msra.mxu1 %v14001_v48  ;;  %v9567_v39 = vunpack.c.h.bf16 %v6572_v47  ;;  %v9573_v48 = vsub.f32 %v9547_v16, %v9547_v16  ;;  %v9611_v14 = vunpack.c.l.bf16 %v6572_v47  ;;  %v6562_v47 = vld [vmem:[#allocation5 + $0x120] sm:$0xff]  }
  0xdc   :  { %7018 = vmatprep.subr.mxu0 %v14039_v15  ;;  %7045 = vmatprep.subr.mxu1 %v14002_v31  ;;  %v9580_v31 = vsub.f32 %v9552_v46, %v9552_v46  ;;  %v14062_v15 = vand.u32 4294901760, %v9380_v11 }
  0xdd   :  { %7019 = vmatpush3.msra.mxu0 %v14040_v51  ;;  %7046 = vmatpush3.msra.mxu1 %v14003_v1  ;;  %v9587_v1 = vsub.f32 %v9557_v59, %v9557_v59  ;;  %14049 = vst [vmem:[#allocation13_spill] sm:$0xff] %v9611_v14  ;;  %v9652_v0 = vsub.f32 %v9611_v14, %v9611_v14 }
  0xde   :  { %7020 = vmatprep.subr.mxu0 %v14041_v28  ;;  %7047 = vmatprep.subr.mxu1 %v14004_v6  ;;  %v14046_v6 = vand.u32 4294901760, %v9288_v45  ;;  %v9606_v45 = vsub.f32 %v9569_v58, %v9569_v58  ;;  %v14064_v28 = vld [vmem:[#allocation37_spill] sm:$0xff] }
  0xdf   :  { %7021 = vmatpush3.msra.mxu0 %v14042_v30  ;;  %7048 = vmatpush3.msra.mxu1 %v14005_v63  ;;  %v6563_v63 = vld [vmem:[#allocation5 + $0x128] sm:$0xff]   ;;  %v14065_v30 = vand.u32 4294901760, %v14064_v28 }
  0xe0   :  { %7022 = vmatprep.subr.mxu0 %v14043_v18  ;;  %7049 = vmatprep.subr.mxu1 %v14006_v62  ;;  %v9594_v62 = vsub.f32 %v9562_v43, %v9562_v43  ;;  %v9621_v52 = vunpack.c.h.bf16 %v6563_v63  ;;  %v9638_v34 = vunpack.c.l.bf16 %v6563_v63 }
  0xe1   :  { %7023 = vmatpush3.msra.mxu0 %v14044_v33  ;;  %7050 = vmatpush3.msra.mxu1 %v14007_v3  ;;  %v13465_v3 = vand.u32 4294901760, %v9573_v48 }
  0xe2   :  { %7024 = vmatprep.subr.mxu0 %v14045_v35  ;;  %7051 = vmatprep.subr.mxu1 %v14008_v38  ;;  %v9602_v38 = vsub.f32 %v9567_v39, %v9567_v39  ;;  %14053 = vst [vmem:[#allocation30_spill] sm:$0xff] %v9621_v52  ;;  %v13458_v22 = vand.u32 4294901760, %v9594_v62  ;;  %14057 = vst [vmem:[#allocation29_spill] sm:$0xff] %v9638_v34  ;;  %v9672_v8 = vsub.f32 %v9621_v52, %v9621_v52 }
  0xe3   :  { %7025 = vmatpush3.msra.mxu0 %v14046_v6  ;;  %7052 = vmatpush3.msra.mxu1 %v14009_v25  ;;  %v14048_v25 = vand.u32 4294901760, %v9318_v19  ;;  %v13461_v19 = vand.u32 4294901760, %v9587_v1  ;;  %v9703_v35 = vsub.f32 %v9638_v34, %v9638_v34  ;;  %v14067_v6 = vld [vmem:[#allocation38_spill] sm:$0xff] }
  0xe4   :  { %7026 = vmatprep.subr.mxu0 %v14047_v20  ;;  %7053 = vmatprep.subr.mxu1 %v14010_v9  ;;  %v13462_v9 = vand.u32 4294901760, %v9580_v31  ;;  %v13457_v54 = vand.u32 4294901760, %v9602_v38  ;;  %v9680_v51 = vsub.f32 %v9594_v62, %v13458_v22  ;;  %v9821_v20 = vld [vmem:[#allocation2] sm:$0xff] }
  0xe5   :  { %7027 = vmatpush3.msra.mxu0 %v14048_v25  ;;  %7054 = vmatpush3.msra.mxu1 %v14011_v50  ;;  %v9627_v50 = vunpack.c.l.bf16 %v6571_v5  ;;  %v9664_v57 = vsub.f32 %v9587_v1, %v13461_v19  ;;  %v14068_v5 = vand.u32 4294901760, %v14067_v6  ;;  %v13460_v25 = vand.u32 4294901760, %v9652_v0  ;;  %v6568_v19 = vld [vmem:[#allocation5 + $0x150] sm:$0xff]   ;;  %14082 = vst [vmem:[#allocation36_spill] sm:$0xff] %v9821_v20 }
  0xe6   :  { %7028 = vmatprep.subr.mxu0 %v14051_v21  ;;  %7055 = vmatprep.subr.mxu1 %v14012_v29  ;;  %v9636_v29 = vsub.f32 %v9573_v48, %v13465_v3  ;;  %v9648_v49 = vsub.f32 %v9580_v31, %v13462_v9  ;;  %v9694_v11 = vsub.f32 %v9602_v38, %v13457_v54  ;;  %v13459_v21 = vand.u32 4294901760, %v9656_v55 }
  0xe7   :  { %7029 = vmatpush3.msra.mxu0 %v14054_v37  ;;  %7056 = vmatpush3.msra.mxu1 %v14013_v4  ;;  %14055 = vst [vmem:[#allocation16_spill] sm:$0xff] %v9627_v50  ;;  %v13456_v4 = vand.u32 4294901760, %v9606_v45  ;;  %v9684_v44 = vsub.f32 %v9627_v50, %v9627_v50  ;;  %v6569_v37 = vld [vmem:[#allocation5 + $0x158] sm:$0xff]   ;;  %v9724_v6 = vunpack.c.l.bf16 %v6562_v47  ;;  %v9804_v28 = vunpack.c.h.bf16 %v6568_v19 }
  0xe8   :  { %7030 = vmatprep.subr.mxu0 %v14056_v40  ;;  %7057 = vmatprep.subr.mxu1 %v14014_v41  ;;  %v6570_v41 = vld [vmem:[#allocation5 + $0x160] sm:$0xff]   ;;  %v2158_v63 = vand.u32 4294901760, %v9636_v29  ;;  %v14070_v40 = vld [vmem:[#allocation20_spill] sm:$0xff]  ;;  %v9731_v54 = vunpack.c.h.bf16 %v6569_v37 }
  0xe9   :  { %7031 = vmatpush3.msra.mxu0 %v14058_v42  ;;  %7058 = vmatpush3.msra.mxu1 %v14059_v23  ;;  %v9689_v18 = vunpack.c.h.bf16 %v6570_v41  ;;  %v9699_v33 = vsub.f32 %v9606_v45, %v13456_v4  ;;  %v14071_v42 = vld [vmem:[#allocation33_spill] sm:$0xff]  ;;  %14074 = vst [vmem:[#allocation23_spill] sm:$0xff] %v9724_v6  ;;  %14080 = vst [vmem:[#allocation28_spill] sm:$0xff] %v9804_v28  ;;  %v6567_v23 = vld [vmem:[#allocation5 + $0x148] sm:$0xff]  }
  0xea   :  { %7032 = vmatprep.subr.mxu0 %v14060_v56  ;;  %7059 = vmatprep.subr.mxu1 %v14061_v13  ;;  %v9715_v56 = vunpack.c.h.bf16 %v6562_v47  ;;  %v13464_v13 = vand.u32 4294901760, %v9668_v10  ;;  %v9797_v4 = vsub.f32 %v9731_v54, %v9731_v54 }
  0xeb   :  { %7033 = vmatpush3.msra.mxu0 %v14062_v15  ;;  %7060 = vmatpush3.msra.mxu1 %v14063_v32  ;;  %14066 = vst [vmem:[#allocation12_spill] sm:$0xff] %v9689_v18  ;;  %v6561_v15 = vld [vmem:[#allocation5 + $0x118] sm:$0xff]   ;;  %v13463_v32 = vand.u32 4294901760, %v9672_v8  ;;  %v9750_v22 = vsub.f32 %v9689_v18, %v9689_v18 }
  0xec   :  { %7034 = vmatprep.subr.mxu0 %v14065_v30  ;;  %7061 = vmatprep.subr.mxu1 %v14017_v17  ;;  %v14069_v17 = vld [vmem:[#allocation32_spill] sm:$0xff]  ;;  %14072 = vst [vmem:[#allocation21_spill] sm:$0xff] %v9715_v56  ;;  %v9722_v30 = vunpack.c.l.bf16 %v6570_v41  ;;  %v9739_v41 = vsub.f32 %v9652_v0, %v13460_v25  ;;  %v9746_v47 = vunpack.c.h.bf16 %v6561_v15  ;;  %v9764_v25 = vunpack.c.l.bf16 %v6569_v37 }
  0xed   :  { %7035 = vmatpush3.msra.mxu0 %v14068_v5  ;;  %1899 = vmatprep.mubr.f32.mxu0 %v14069_v17  ;;  %v13466_v5 = vand.u32 4294901760, %v9684_v44  ;;  %v9768_v9 = vsub.f32 %v9715_v56, %v9715_v56  ;;  %v9783_v37 = vsub.f32 %v9724_v6, %v9724_v6 }
  0xee   :  { %7062 = vmatpush3.msra.mxu1 %v14070_v40  ;;  %1901 = vmatmul.mubr.f32.vlgmr.msra.gmra.mxu0 %v14071_v42  ;;  %14073 = vst [vmem:[#allocation22_spill] sm:$0xff] %v9722_v30  ;;  %14075 = vst [vmem:[#allocation24_spill] sm:$0xff] %v9746_v47 }
  0xef   :  { %7063 = vmatprep.subr.mxu1 %v14021_v27  ;;  %7074 = vmatprep.subr.mxu0 %v9547_v16  ;;  %v13467_v27 = vand.u32 4294901760, %v9703_v35  ;;  %14076 = vst [vmem:[#allocation25_spill] sm:$0xff] %v9764_v25  ;;  %14077 = vst [vmem:[#allocation17_spill] sm:$0xff] %v9783_v37 }
  0xf0   :  { %7064 = vmatpush3.msra.mxu1 %v9255_v26  ;;  %7075 = vmatpush3.msra.mxu0 %v9552_v46  ;;  %v9744_v26 = vsub.f32 %v9656_v55, %v13459_v21  ;;  %v9762_v21 = vsub.f32 %v9672_v8, %v13463_v32  ;;  %v9779_v32 = vsub.f32 %v9722_v30, %v9722_v30 }
  0xf1   :  { %7065 = vmatprep.subr.mxu1 %v14024_v2  ;;  %7076 = vmatprep.subr.mxu0 %v9557_v59  ;;  %v9757_v2 = vsub.f32 %v9668_v10, %v13464_v13  ;;  %v14078_v13 = vld [vmem:[#allocation11_spill] sm:$0xff] }
  0xf2   :  { %7066 = vmatpush3.msra.mxu1 %v9298_v12  ;;  %7077 = vmatpush3.msra.mxu0 %v9562_v43  ;;  %v9775_v12 = vsub.f32 %v9684_v44, %v13466_v5  ;;  %v13470_v3 = vsub.s32 5, %v14078_v13  ;;  %v9793_v5 = vsub.f32 %v9703_v35, %v13467_v27  ;;  %v6560_v27 = vld [vmem:[#allocation5 + $0x110] sm:$0xff]  }
  0xf3   :  { %7067 = vmatprep.subr.mxu1 %v9307_v53  ;;  %7078 = vmatprep.subr.mxu0 %v9567_v39  ;;  %v9788_v53 = vunpack.c.l.bf16 %v6561_v15  ;;  %v9850_v15 = vsub.f32 %v9764_v25, %v9764_v25 }
  0xf4   :  { %7068 = vmatpush3.msra.mxu1 %v9327_v36  ;;  %7079 = vmatpush3.msra.mxu0 %v9569_v58  ;;  %v2176_v36 = vand.u32 4294901760, %v9739_v41  ;;  %v9814_v41 = vsub.f32 %v9746_v47, %v9746_v47  ;;  %v581_v40 = vrot.slane %v9821_v20, %v13470_v3  ;;  %v14086_v3 = vand.u32 4294901760, %v9750_v22 }
  0xf5   :  { %14079 = vst [vmem:[#allocation18_spill] sm:$0xff] %v9788_v53  ;;  %7069 = vmatprep.subr.mxu1 %v9348_v60  ;;  %7080 = vmatprep.subr.mxu0 %v9611_v14  ;;  %v9830_v60 = vunpack.c.h.bf16 %v6560_v27  ;;  %v6566_v14 = vld [vmem:[#allocation5 + $0x140] sm:$0xff]  }
  0xf6   :  { %7070 = vmatpush3.msra.mxu1 %v9356_v61  ;;  %1971 = vmatprep.mubr.f32.mxu1 %v14069_v17  ;;  %14081 = vst [vmem:[#allocation35_spill] sm:$0xff] %v9814_v41  ;;  %v14084_v17 = vsub.s32 4, %v14078_v13  ;;  %v9842_v29 = vsub.f32 %v9750_v22, %v14086_v3  ;;  %v9860_v3 = vunpack.c.h.bf16 %v6567_v23 }
  0xf7   :  { %7081 = vmatpush3.msra.mxu0 %v9613_v7  ;;  %1973 = vmatmul.mubr.f32.vlgmr.msra.gmra.mxu1 %v14071_v42  ;;  %14083 = vst [vmem:[#allocation26_spill] sm:$0xff] %v9830_v60  ;;  %v14085_v7 = vand.u32 4294901760, %v9648_v49  ;;  %v9846_v42 = vunpack.c.l.bf16 %v6560_v27  ;;  %v9865_v27 = vsub.f32 %v9788_v53, %v9788_v53 }
  0xf8   :  { %7082 = vmatprep.subr.mxu0 %v9619_v24  ;;  %7109 = vmatprep.subr.mxu1 %v2158_v63  ;;  %v577_v61 = vrot.slane %v9821_v20, %v14084_v17  ;;  %v9844_v63 = vunpack.c.l.bf16 %v6568_v19  ;;  %v6559_v24 = vld [vmem:[#allocation5 + $0x108] sm:$0xff]   ;;  %v14089_v17 = vand.u32 4294901760, %v9664_v57  ;;  %14091 = vst [vmem:[#allocation27_spill] sm:$0xff] %v9860_v3  ;;  %v14092_v20 = vand.u32 4294901760, %v9680_v51 }
  0xf9   :  { %7083 = vmatpush3.msra.mxu0 %v9621_v52  ;;  %7110 = vmatpush3.msra.mxu1 %v14085_v7  ;;  %14088 = vst [vmem:[#allocation31_spill] sm:$0xff] %v9846_v42  ;;  %v14090_v7 = vand.u32 4294901760, %v9768_v9  ;;  %v14093_v57 = vand.u32 4294901760, %v9779_v32  ;;  %v9882_v19 = vsub.f32 %v9804_v28, %v9804_v28  ;;  %v14096_v51 = vand.u32 4294901760, %v9694_v11 }
  0xfa   :  { %14087 = vst [vmem:[#allocation34_spill] sm:$0xff] %v9844_v63  ;;  %7084 = vmatprep.subr.mxu0 %v9627_v50  ;;  %7111 = vmatprep.subr.mxu1 %v14089_v17  ;;  %v9884_v50 = vand.u32 4294901760, %v581_v40  ;;  %v9898_v52 = vand.u32 4294901760, %v577_v61  ;;  %v14102_v11 = vand.u32 4294901760, %v9744_v26  ;;  %v9940_v26 = vsub.f32 %v9846_v42, %v9846_v42 }
  0xfb   :  { %v9858_v49 = vsub.f32 %v9768_v9, %v14090_v7  ;;  %7085 = vmatpush3.msra.mxu0 %v9638_v34  ;;  %7112 = vmatpush3.msra.mxu1 %v14092_v20  ;;  %v9873_v17 = vsub.f32 %v9779_v32, %v14093_v57  ;;  %v14094_v7 = vand.u32 4294901760, %v9783_v37  ;;  %v14097_v20 = vand.u32 4294901760, %v9797_v4 }
  0xfc   :  { %14095 = vst [vmem:[#allocation19_spill] sm:$0xff] %v9884_v50  ;;  %7086 = vmatprep.subr.mxu0 %v9689_v18  ;;  %7113 = vmatprep.subr.mxu1 %v14096_v51  ;;  %v9894_v34 = vunpack.c.h.bf16 %v6559_v24  ;;  %14099 = vst [vmem:[#allocation38_spill] sm:$0xff] %v9898_v52  ;;  %v2194_v18 = vand.u32 4294901760, %v9842_v29  ;;  %v9905_v51 = vunpack.c.l.bf16 %v6559_v24  ;;  %v6558_v29 = vld [vmem:[#allocation5 + $0x100] sm:$0xff]   ;;  %v9921_v24 = vsub.f32 %v9844_v63, %v9844_v63 }
  0xfd   :  { %v9878_v13 = vsub.f32 %v9783_v37, %v14094_v7  ;;  %v9892_v57 = vsub.f32 %v9797_v4, %v14097_v20  ;;  %v9896_v7 = vunpack.c.l.bf16 %v6567_v23  ;;  %7087 = vmatpush3.msra.mxu0 %v9715_v56  ;;  %v14100_v37 = vand.u32 4294901760, %v9699_v33  ;;  %2251 = vmatprep.mubr.f32.mxu1 %v9884_v50 }
  0xfe   :  { %v9909_v20 = vsub.f32 %v9830_v60, %v9830_v60  ;;  %7088 = vmatprep.subr.mxu0 %v9722_v30  ;;  %v2098_v23 = vand.u32 4294901760, %v9858_v49  ;;  %v14101_v56 = vand.u32 4294901760, %v9814_v41 }
  0xff   :  { %14098 = vst [vmem:[#allocation37_spill] sm:$0xff] %v9896_v7  ;;  %7114 = vmatpush3.msra.mxu1 %v14100_v37  ;;  %7089 = vmatpush3.msra.mxu0 %v9724_v6  ;;  %v2104_v49 = vand.u32 4294901760, %v9878_v13  ;;  %v14104_v37 = vand.u32 4294901760, %v9757_v2  ;;  %v9936_v6 = vunpack.c.h.bf16 %v6566_v14  ;;  %v9943_v13 = vsub.f32 %v577_v61, %v9898_v52 }
 0x100   :  { %7115 = vmatprep.subr.mxu1 %v2176_v36  ;;  %v9916_v33 = vsub.f32 %v9814_v41, %v14101_v56  ;;  %v2200_v36 = vand.u32 4294901760, %v9873_v17  ;;  %v9930_v56 = vsub.f32 %v581_v40, %v9884_v50  ;;  %7090 = vmatprep.subr.mxu0 %v9731_v54  ;;  %v2206_v41 = vand.u32 4294901760, %v9892_v57 }
 0x101   :  { %7116 = vmatpush3.msra.mxu1 %v14102_v11  ;;  %14105 = vst [vmem:[#allocation20_spill] sm:$0xff] %v9943_v13  ;;  %7091 = vmatpush3.msra.mxu0 %v9746_v47  ;;  %v14106_v40 = vand.u32 4294901760, %v9762_v21  ;;  %v14107_v17 = vand.u32 4294901760, %v9850_v15  ;;  %v9951_v11 = vunpack.c.h.bf16 %v6558_v29  ;;  %v14108_v61 = vand.u32 4294901760, %v9775_v12 }
 0x102   :  { %14103 = vst [vmem:[#allocation32_spill] sm:$0xff] %v9930_v56  ;;  %7117 = vmatprep.subr.mxu1 %v14104_v37  ;;  %v9956_v37 = vsub.f32 %v9860_v3, %v9860_v3  ;;  %7092 = vmatprep.subr.mxu0 %v9764_v25  ;;  %v2110_v21 = vand.u32 4294901760, %v9916_v33  ;;  %v9968_v57 = vsub.f32 %v9894_v34, %v9894_v34  ;;  %v14110_v47 = vand.u32 4294901760, %v9793_v5 }
 0x103   :  { %7118 = vmatpush3.msra.mxu1 %v14106_v40  ;;  %v2211_v2 = vsub.f32 %v9850_v15, %v14107_v17  ;;  %v14109_v40 = vand.u32 4294901760, %v9865_v27  ;;  %7093 = vmatpush3.msra.mxu0 %v9788_v53  ;;  %v14111_v12 = vand.u32 4294901760, %v9882_v19  ;;  %v9976_v33 = vunpack.c.l.bf16 %v6566_v14 }
 0x104   :  { %7119 = vmatprep.subr.mxu1 %v14108_v61  ;;  %7094 = vmatprep.subr.mxu0 %v9804_v28  ;;  %v9984_v17 = vunpack.c.l.bf16 %v6558_v29  ;;  %v14112_v25 = vand.u32 4294901760, %v9909_v20  ;;  %v9999_v29 = vsub.f32 %v9936_v6, %v9936_v6  ;;  %v14113_v5 = vand.u32 4294901760, %v9921_v24 }
 0x105   :  { %v2115_v30 = vsub.f32 %v9865_v27, %v14109_v40  ;;  %7120 = vmatpush3.msra.mxu1 %v14110_v47  ;;  %v2217_v61 = vsub.f32 %v9882_v19, %v14111_v12  ;;  %v9981_v40 = vsub.f32 %v9896_v7, %v9896_v7  ;;  %v9990_v12 = vsub.f32 %v9905_v51, %v9905_v51 }
 0x106   :  { %7121 = vmatprep.subr.mxu1 %v2194_v18  ;;  %7095 = vmatpush3.msra.mxu0 %v9830_v60  ;;  %v2212_v14 = vand.u32 4294901760, %v2211_v2  ;;  %v2121_v53 = vsub.f32 %v9909_v20, %v14112_v25  ;;  %v2223_v60 = vsub.f32 %v9921_v24, %v14113_v5  ;;  %v10008_v2 = vsub.f32 %v9951_v11, %v9951_v11 }
 0x107   :  { %7122 = vmatpush3.msra.mxu1 %v2098_v23  ;;  %7096 = vmatprep.subr.mxu0 %v9844_v63  ;;  %v2116_v47 = vand.u32 4294901760, %v2115_v30  ;;  %v2218_v25 = vand.u32 4294901760, %v2217_v61  ;;  %v14114_v18 = vand.u32 4294901760, %v9930_v56  ;;  %v14116_v5 = vand.u32 4294901760, %v9940_v26 }
 0x108   :  { %7123 = vmatprep.subr.mxu1 %v2200_v36  ;;  %7097 = vmatpush3.msra.mxu0 %v9846_v42  ;;  %v10017_v36 = vsub.f32 %v9976_v33, %v9976_v33  ;;  %v2122_v30 = vand.u32 4294901760, %v2121_v53  ;;  %v14120_v42 = vand.u32 4294901760, %v9968_v57  ;;  %v14144_v50 = vld [vmem:[#allocation20_spill] sm:$0xff] }
 0x109   :  { %7124 = vmatpush3.msra.mxu1 %v2104_v49  ;;  %v2045_v63 = vsub.f32 %v9930_v56, %v14114_v18  ;;  %7098 = vmatprep.subr.mxu0 %v9860_v3  ;;  %v2127_v23 = vsub.f32 %v9940_v26, %v14116_v5  ;;  %v14117_v49 = vand.u32 4294901760, %v9943_v13  ;;  %v10029_v18 = vsub.f32 %v9984_v17, %v9984_v17 }
 0x10a   :  { %14115 = vst [vmem:[#allocation33_spill] sm:$0xff] %v10017_v36  ;;  %7125 = vmatprep.subr.mxu1 %v2206_v41  ;;  %7099 = vmatpush3.msra.mxu0 %v9894_v34  ;;  %v14119_v41 = vand.u32 4294901760, %v9956_v37  ;;  %v13517_v5 = vand.u32 4294901760, %v10017_v36 }
 0x10b   :  { %v2051_v61 = vsub.f32 %v9943_v13, %v14117_v49  ;;  %14118 = vst [vmem:[#allocation39_spill] sm:$0xff] %v10029_v18  ;;  %7126 = vmatpush3.msra.mxu1 %v2110_v21  ;;  %7100 = vmatprep.subr.mxu0 %v9896_v7  ;;  %v2224_v49 = vand.u32 4294901760, %v2223_v60  ;;  %v2133_v13 = vsub.f32 %v9968_v57, %v14120_v42  ;;  %v2046_v53 = vand.u32 4294901760, %v2045_v63 }
 0x10c   :  { %v2229_v3 = vsub.f32 %v9956_v37, %v14119_v41  ;;  %7127 = vmatprep.subr.mxu1 %v2212_v14  ;;  %7101 = vmatpush3.msra.mxu0 %v9905_v51  ;;  %v14121_v21 = vand.u32 4294901760, %v9981_v40  ;;  %v2128_v60 = vand.u32 4294901760, %v2127_v23  ;;  %v14122_v7 = vand.u32 4294901760, %v9990_v12 }
 0x10d   :  { %7128 = vmatpush3.msra.mxu1 %v2116_v47  ;;  %7102 = vmatprep.subr.mxu0 %v9936_v6  ;;  %v2052_v14 = vand.u32 4294901760, %v2051_v61  ;;  %v13516_v56 = vand.u32 4294901760, %v10029_v18  ;;  %v14123_v47 = vand.u32 4294901760, %v9999_v29  ;;  %v14124_v23 = vand.u32 4294901760, %v10008_v2 }
 0x10e   :  { %v2235_v41 = vsub.f32 %v9981_v40, %v14121_v21  ;;  %7129 = vmatprep.subr.mxu1 %v2218_v25  ;;  %v2139_v42 = vsub.f32 %v9990_v12, %v14122_v7  ;;  %7103 = vmatpush3.msra.mxu0 %v9951_v11  ;;  %v2230_v63 = vand.u32 4294901760, %v2229_v3  ;;  %v2134_v25 = vand.u32 4294901760, %v2133_v13 }
 0x10f   :  { %7130 = vmatpush3.msra.mxu1 %v2122_v30  ;;  %v2241_v21 = vsub.f32 %v9999_v29, %v14123_v47  ;;  %7104 = vmatprep.subr.mxu0 %v9976_v33  ;;  %v2145_v61 = vsub.f32 %v10008_v2, %v14124_v23  ;;  %v2247_v3 = vsub.f32 %v10017_v36, %v13517_v5  ;;  %v14128_v47 = vld [vmem:[#allocation15_spill] sm:$0xff]  ;;  %v14131_v23 = vld [vmem:[#allocation16_spill] sm:$0xff] }
 0x110   :  { %7131 = vmatprep.subr.mxu1 %v2224_v49  ;;  %7105 = vmatpush3.msra.mxu0 %v9984_v17  ;;  %v2236_v7 = vand.u32 4294901760, %v2235_v41  ;;  %v2140_v30 = vand.u32 4294901760, %v2139_v42  ;;  %v2151_v49 = vsub.f32 %v10029_v18, %v13516_v56  ;;  %v14126_v42 = vld [vmem:[#allocation17_spill] sm:$0xff]  ;;  %v14141_v56 = vld [vmem:[#allocation34_spill] sm:$0xff]  ;;  %v14142_v5 = vld [vmem:[#allocation32_spill] sm:$0xff] }
 0x111   :  { %2047 = vmatprep.mubr.f32.mxu0 %v2046_v53  ;;  %7132 = vmatpush3.msra.mxu1 %v2128_v60  ;;  %v2242_v13 = vand.u32 4294901760, %v2241_v21  ;;  %v2146_v53 = vand.u32 4294901760, %v2145_v61  ;;  %v2248_v41 = vand.u32 4294901760, %v2247_v3  ;;  %v14129_v21 = vld [vmem:[#allocation35_spill] sm:$0xff]  ;;  %v14132_v61 = vld [vmem:[#allocation29_spill] sm:$0xff] }
 0x112   :  { %2053 = vmatmul.mubr.f32.vlgmr.msra.gmra.mxu0 %v2052_v14  ;;  %7133 = vmatprep.subr.mxu1 %v2230_v63  ;;  %v2152_v60 = vand.u32 4294901760, %v2151_v49  ;;  %v14125_v14 = vld [vmem:[#allocation13_spill] sm:$0xff]  ;;  %v14127_v63 = vld [vmem:[#allocation14_spill] sm:$0xff]  ;;  %v14136_v49 = vld [vmem:[#allocation23_spill] sm:$0xff] }
 0x113   :  { %7144 = vmatprep.subr.mxu0 %v9573_v48  ;;  %7134 = vmatpush3.msra.mxu1 %v2134_v25  ;;  %v14130_v25 = vld [vmem:[#allocation30_spill] sm:$0xff]  ;;  %v14134_v3 = vld [vmem:[#allocation21_spill] sm:$0xff] }
 0x114   :  { %7145 = vmatpush3.msra.mxu0 %v9580_v31  ;;  %7135 = vmatprep.subr.mxu1 %v2236_v7  ;;  %v14133_v7 = vld [vmem:[#allocation12_spill] sm:$0xff] }
 0x115   :  { %7146 = vmatprep.subr.mxu0 %v9587_v1  ;;  %7136 = vmatpush3.msra.mxu1 %v2140_v30  ;;  %v14135_v30 = vld [vmem:[#allocation22_spill] sm:$0xff] }
 0x116   :  { %7147 = vmatpush3.msra.mxu0 %v9594_v62  ;;  %7137 = vmatprep.subr.mxu1 %v2242_v13  ;;  %v14137_v13 = vld [vmem:[#allocation24_spill] sm:$0xff] }
 0x117   :  { %7148 = vmatprep.subr.mxu0 %v9602_v38  ;;  %7138 = vmatpush3.msra.mxu1 %v2146_v53  ;;  %v14138_v53 = vld [vmem:[#allocation25_spill] sm:$0xff] }
 0x118   :  { %7149 = vmatpush3.msra.mxu0 %v9606_v45  ;;  %7139 = vmatprep.subr.mxu1 %v2248_v41  ;;  %v14139_v41 = vld [vmem:[#allocation18_spill] sm:$0xff] }
 0x119   :  { %7150 = vmatprep.subr.mxu0 %v9652_v0  ;;  %7140 = vmatpush3.msra.mxu1 %v2152_v60  ;;  %v14140_v60 = vld [vmem:[#allocation26_spill] sm:$0xff] }
 0x11a   :  { %7151 = vmatpush3.msra.mxu0 %v9656_v55  ;;  %2253 = vmatmul.mubr.f32.vlgmr.msra.gmra.mxu1 %v9898_v52  ;;  %v14143_v52 = vld [vmem:[#allocation31_spill] sm:$0xff] }
 0x11b   :  { %7152 = vmatprep.subr.mxu0 %v9668_v10  ;;  %7179 = vmatprep.subr.mxu1 %v9547_v16 }
 0x11c   :  { %7153 = vmatpush3.msra.mxu0 %v9672_v8  ;;  %7180 = vmatpush3.msra.mxu1 %v9552_v46 }
 0x11d   :  { %7154 = vmatprep.subr.mxu0 %v9684_v44  ;;  %7181 = vmatprep.subr.mxu1 %v9557_v59 }
 0x11e   :  { %7155 = vmatpush3.msra.mxu0 %v9703_v35  ;;  %7182 = vmatpush3.msra.mxu1 %v9562_v43 }
 0x11f   :  { %7156 = vmatprep.subr.mxu0 %v9750_v22  ;;  %7183 = vmatprep.subr.mxu1 %v9567_v39 }
 0x120   :  { %7157 = vmatpush3.msra.mxu0 %v9768_v9  ;;  %7184 = vmatpush3.msra.mxu1 %v9569_v58 }
 0x121   :  { %7158 = vmatprep.subr.mxu0 %v9779_v32  ;;  %7185 = vmatprep.subr.mxu1 %v14125_v14 }
 0x122   :  { %7159 = vmatpush3.msra.mxu0 %v14126_v42  ;;  %7186 = vmatpush3.msra.mxu1 %v14127_v63 }
 0x123   :  { %7160 = vmatprep.subr.mxu0 %v9797_v4  ;;  %7187 = vmatprep.subr.mxu1 %v14128_v47 }
 0x124   :  { %7161 = vmatpush3.msra.mxu0 %v14129_v21  ;;  %7188 = vmatpush3.msra.mxu1 %v14130_v25 }
 0x125   :  { %7162 = vmatprep.subr.mxu0 %v9850_v15  ;;  %7189 = vmatprep.subr.mxu1 %v14131_v23 }
 0x126   :  { %7163 = vmatpush3.msra.mxu0 %v9865_v27  ;;  %7190 = vmatpush3.msra.mxu1 %v14132_v61 }
 0x127   :  { %7164 = vmatprep.subr.mxu0 %v9882_v19  ;;  %7191 = vmatprep.subr.mxu1 %v14133_v7 }
 0x128   :  { %7165 = vmatpush3.msra.mxu0 %v9909_v20  ;;  %7192 = vmatpush3.msra.mxu1 %v14134_v3 }
 0x129   :  { %7166 = vmatprep.subr.mxu0 %v9921_v24  ;;  %7193 = vmatprep.subr.mxu1 %v14135_v30 }
 0x12a   :  { %7167 = vmatpush3.msra.mxu0 %v9940_v26  ;;  %7194 = vmatpush3.msra.mxu1 %v14136_v49 }
 0x12b   :  { %7168 = vmatprep.subr.mxu0 %v9956_v37  ;;  %7195 = vmatprep.subr.mxu1 %v9731_v54 }
 0x12c   :  { %7169 = vmatpush3.msra.mxu0 %v9968_v57  ;;  %7196 = vmatpush3.msra.mxu1 %v14137_v13 }
 0x12d   :  { %7170 = vmatprep.subr.mxu0 %v9981_v40  ;;  %7197 = vmatprep.subr.mxu1 %v14138_v53 }
 0x12e   :  { %7171 = vmatpush3.msra.mxu0 %v9990_v12  ;;  %7198 = vmatpush3.msra.mxu1 %v14139_v41  ;;  %v14145_v41 = vld [vmem:[#allocation27_spill] sm:$0xff] }
 0x12f   :  { %7172 = vmatprep.subr.mxu0 %v9999_v29  ;;  %7199 = vmatprep.subr.mxu1 %v9804_v28  ;;  %v14146_v28 = vand.u32 4294901760, %v9573_v48  ;;  %v14151_v48 = vand.u32 4294901760, %v9602_v38  ;;  %v14156_v38 = vand.u32 4294901760, %v14144_v50 }
 0x130   :  { %7173 = vmatpush3.msra.mxu0 %v10008_v2  ;;  %7200 = vmatpush3.msra.mxu1 %v14140_v60  ;;  %v14147_v60 = vand.u32 4294901760, %v9580_v31  ;;  %v14152_v31 = vand.u32 4294901760, %v9606_v45  ;;  %v14158_v45 = vand.u32 4294901760, %v9672_v8  ;;  %v14162_v8 = vand.u32 4294901760, %v9768_v9 }
 0x131   :  { %7174 = vmatprep.subr.mxu0 %v10017_v36  ;;  %7201 = vmatprep.subr.mxu1 %v14141_v56  ;;  %v14148_v36 = vld [vmem:[#allocation37_spill] sm:$0xff]  ;;  %v14166_v9 = vand.u32 4294901760, %v14129_v21  ;;  %v6587_v21 = vld [vmem:[#allocation5 + $0x1e8] sm:$0xff]  }
 0x132   :  { %7175 = vmatpush3.msra.mxu0 %v10029_v18  ;;  %2356 = vmatprep.mubr.f32.mxu0 %v14142_v5  ;;  %v14149_v18 = vand.u32 4294901760, %v9587_v1  ;;  %v14153_v1 = vand.u32 4294901760, %v9652_v0  ;;  %v14159_v0 = vand.u32 4294901760, %v9684_v44 }
 0x133   :  { %7202 = vmatpush3.msra.mxu1 %v14143_v52  ;;  %2359 = vmatmul.mubr.f32.vlgmr.msra.gmra.mxu0 %v14144_v50  ;;  %v14150_v52 = vand.u32 4294901760, %v9594_v62  ;;  %v14154_v62 = vand.u32 4294901760, %v14142_v5  ;;  %v6589_v50 = vld [vmem:[#allocation5 + $0x1f8] sm:$0xff]   ;;  %v14168_v5 = vand.u32 4294901760, %v9865_v27 }
 0x134   :  { %7203 = vmatprep.subr.mxu1 %v14145_v41  ;;  %7214 = vmatprep.subr.mxu0 %v14146_v28  ;;  %v14157_v28 = vand.u32 4294901760, %v9668_v10  ;;  %v14161_v10 = vand.u32 4294901760, %v9750_v22  ;;  %v10188_v44 = vunpack.c.l.bf16 %v6589_v50 }
 0x135   :  { %7204 = vmatpush3.msra.mxu1 %v9894_v34  ;;  %7215 = vmatpush3.msra.mxu0 %v14147_v60 }
 0x136   :  { %7205 = vmatprep.subr.mxu1 %v14148_v36  ;;  %7216 = vmatprep.subr.mxu0 %v14149_v18 }
 0x137   :  { %7206 = vmatpush3.msra.mxu1 %v9905_v51  ;;  %7217 = vmatpush3.msra.mxu0 %v14150_v52  ;;  %v14155_v52 = vand.u32 4294901760, %v9656_v55  ;;  %v14160_v55 = vand.u32 4294901760, %v9703_v35  ;;  %v6580_v35 = vld [vmem:[#allocation5 + $0x1b0] sm:$0xff]  }
 0x138   :  { %7207 = vmatprep.subr.mxu1 %v9936_v6  ;;  %7218 = vmatprep.subr.mxu0 %v14151_v48  ;;  %v10243_v48 = vunpack.c.h.bf16 %v6587_v21 }
 0x139   :  { %7208 = vmatpush3.msra.mxu1 %v9951_v11  ;;  %7219 = vmatpush3.msra.mxu0 %v14152_v31 }
 0x13a   :  { %7209 = vmatprep.subr.mxu1 %v9976_v33  ;;  %7220 = vmatprep.subr.mxu0 %v14153_v1  ;;  %14175 = vst [vmem:[#allocation17_spill] sm:$0xff] %v10243_v48 }
 0x13b   :  { %7210 = vmatpush3.msra.mxu1 %v9984_v17  ;;  %2431 = vmatprep.mubr.f32.mxu1 %v14154_v62 }
 0x13c   :  { %7221 = vmatpush3.msra.mxu0 %v14155_v52  ;;  %2435 = vmatmul.mubr.f32.vlgmr.msra.gmra.mxu1 %v14156_v38  ;;  %v6586_v52 = vld [vmem:[#allocation5 + $0x1e0] sm:$0xff]   ;;  %v14180_v38 = vand.u32 4294901760, %v9990_v12  ;;  %v14184_v12 = vld [vmem:[#allocation28_spill] sm:$0xff] }
 0x13d   :  { %7222 = vmatprep.subr.mxu0 %v14157_v28  ;;  %7249 = vmatprep.subr.mxu1 %v9547_v16  ;;  %v6581_v16 = vld [vmem:[#allocation5 + $0x1b8] sm:$0xff]  }
 0x13e   :  { %7223 = vmatpush3.msra.mxu0 %v14158_v45  ;;  %7250 = vmatpush3.msra.mxu1 %v9552_v46  ;;  %v14163_v46 = vand.u32 4294901760, %v9779_v32  ;;  %v10180_v22 = vunpack.c.h.bf16 %v6581_v16  ;;  %v14167_v32 = vand.u32 4294901760, %v9850_v15  ;;  %v10193_v18 = vunpack.c.l.bf16 %v6581_v16  ;;  %v14181_v28 = vld [vmem:[#allocation18_spill] sm:$0xff] }
 0x13f   :  { %7224 = vmatprep.subr.mxu0 %v14159_v0  ;;  %7251 = vmatprep.subr.mxu1 %v9557_v59  ;;  %v10175_v59 = vunpack.c.h.bf16 %v6589_v50  ;;  %v14169_v15 = vand.u32 4294901760, %v9882_v19  ;;  %v14171_v19 = vand.u32 4294901760, %v9921_v24  ;;  %v6578_v0 = vld [vmem:[#allocation5 + $0x1a0] sm:$0xff]   ;;  %v14183_v50 = vand.u32 4294901760, %v9999_v29 }
 0x140   :  { %7225 = vmatpush3.msra.mxu0 %v14160_v55  ;;  %7252 = vmatpush3.msra.mxu1 %v9562_v43  ;;  %v14164_v43 = vand.u32 4294901760, %v14126_v42  ;;  %v10206_v42 = vsub.f32 %v10180_v22, %v10180_v22  ;;  %v10291_v16 = vsub.f32 %v10243_v48, %v10243_v48 }
 0x141   :  { %7226 = vmatprep.subr.mxu0 %v14161_v10  ;;  %7253 = vmatprep.subr.mxu1 %v9567_v39  ;;  %v14165_v39 = vand.u32 4294901760, %v9797_v4  ;;  %v10197_v4 = vsub.f32 %v10175_v59, %v10175_v59 }
 0x142   :  { %7227 = vmatpush3.msra.mxu0 %v14162_v8  ;;  %7254 = vmatpush3.msra.mxu1 %v9569_v58  ;;  %v6588_v58 = vld [vmem:[#allocation5 + $0x1f0] sm:$0xff]   ;;  %v13531_v60 = vand.u32 4294901760, %v10206_v42 }
 0x143   :  { %7228 = vmatprep.subr.mxu0 %v14163_v46  ;;  %7255 = vmatprep.subr.mxu1 %v14125_v14  ;;  %v10202_v14 = vunpack.c.h.bf16 %v6588_v58  ;;  %v10216_v27 = vunpack.c.l.bf16 %v6588_v58  ;;  %v14185_v46 = vand.u32 4294901760, %v10008_v2 }
 0x144   :  { %7229 = vmatpush3.msra.mxu0 %v14164_v43  ;;  %7256 = vmatpush3.msra.mxu1 %v14127_v63  ;;  %v10211_v63 = vunpack.c.h.bf16 %v6580_v35  ;;  %v14186_v43 = vld [vmem:[#allocation26_spill] sm:$0xff] }
 0x145   :  { %7230 = vmatprep.subr.mxu0 %v14165_v39  ;;  %7257 = vmatprep.subr.mxu1 %v14128_v47  ;;  %v14170_v47 = vand.u32 4294901760, %v9909_v20  ;;  %v10228_v20 = vsub.f32 %v10193_v18, %v10193_v18  ;;  %v10238_v24 = vsub.f32 %v10202_v14, %v10202_v14  ;;  %v10305_v39 = vunpack.c.h.bf16 %v6586_v52 }
 0x146   :  { %7231 = vmatpush3.msra.mxu0 %v14166_v9  ;;  %7258 = vmatpush3.msra.mxu1 %v14130_v25  ;;  %v6579_v25 = vld [vmem:[#allocation5 + $0x1a8] sm:$0xff]   ;;  %v14188_v9 = vld [vmem:[#allocation33_spill] sm:$0xff] }
 0x147   :  { %7232 = vmatprep.subr.mxu0 %v14167_v32  ;;  %7259 = vmatprep.subr.mxu1 %v14131_v23  ;;  %v10220_v23 = vsub.f32 %v10188_v44, %v10188_v44  ;;  %v10245_v31 = vunpack.c.h.bf16 %v6579_v25  ;;  %v13527_v45 = vand.u32 4294901760, %v10238_v24  ;;  %14187 = vst [vmem:[#allocation30_spill] sm:$0xff] %v10305_v39 }
 0x148   :  { %7233 = vmatpush3.msra.mxu0 %v14168_v5  ;;  %7260 = vmatpush3.msra.mxu1 %v14132_v61  ;;  %v13533_v61 = vand.u32 4294901760, %v10197_v4  ;;  %v10317_v5 = vunpack.c.h.bf16 %v6578_v0 }
 0x149   :  { %7234 = vmatprep.subr.mxu0 %v14169_v15  ;;  %7261 = vmatprep.subr.mxu1 %v14133_v7  ;;  %v14172_v7 = vand.u32 4294901760, %v9940_v26  ;;  %14176 = vst [vmem:[#allocation14_spill] sm:$0xff] %v10245_v31  ;;  %v10249_v26 = vsub.f32 %v10211_v63, %v10211_v63  ;;  %v13530_v1 = vand.u32 4294901760, %v10220_v23  ;;  %v10295_v8 = vsub.f32 %v10245_v31, %v10245_v31 }
 0x14a   :  { %7235 = vmatpush3.msra.mxu0 %v14170_v47  ;;  %7262 = vmatpush3.msra.mxu1 %v14134_v3  ;;  %v10233_v3 = vunpack.c.l.bf16 %v6580_v35  ;;  %v10265_v62 = vsub.f32 %v10197_v4, %v13533_v61  ;;  %v14189_v35 = vand.u32 4294901760, %v14188_v9  ;;  %14190 = vst [vmem:[#allocation16_spill] sm:$0xff] %v10317_v5  ;;  %v14191_v47 = vld [vmem:[#allocation39_spill] sm:$0xff] }
 0x14b   :  { %7236 = vmatprep.subr.mxu0 %v14171_v19  ;;  %7263 = vmatprep.subr.mxu1 %v14135_v30  ;;  %v14174_v30 = vand.u32 4294901760, %v9956_v37  ;;  %v10257_v37 = vsub.f32 %v10216_v27, %v10216_v27  ;;  %v13526_v10 = vand.u32 4294901760, %v10249_v26  ;;  %v10303_v29 = vsub.f32 %v10220_v23, %v13530_v1  ;;  %v14200_v61 = vld [vmem:[#allocation11_spill] sm:$0xff] }
 0x14c   :  { %7237 = vmatpush3.msra.mxu0 %v14172_v7  ;;  %7264 = vmatpush3.msra.mxu1 %v14136_v49  ;;  %14173 = vst [vmem:[#allocation13_spill] sm:$0xff] %v10233_v3  ;;  %v14177_v49 = vand.u32 4294901760, %v9968_v57  ;;  %v10267_v57 = vunpack.c.l.bf16 %v6587_v21  ;;  %v10283_v55 = vsub.f32 %v10233_v3, %v10233_v3  ;;  %v2828_v32 = vand.u32 4294901760, %v10265_v62 }
 0x14d   :  { %7238 = vmatprep.subr.mxu0 %v14174_v30  ;;  %7265 = vmatprep.subr.mxu1 %v9731_v54  ;;  %v14178_v54 = vand.u32 4294901760, %v9981_v40  ;;  %v10276_v40 = vsub.f32 %v10206_v42, %v13531_v60  ;;  %v13525_v58 = vand.u32 4294901760, %v10257_v37  ;;  %v14192_v21 = vand.u32 4294901760, %v14191_v47  ;;  %v6585_v30 = vld [vmem:[#allocation5 + $0x1d8] sm:$0xff]  }
 0x14e   :  { %7239 = vmatpush3.msra.mxu0 %v14177_v49  ;;  %7266 = vmatpush3.msra.mxu1 %v14137_v13  ;;  %14179 = vst [vmem:[#allocation15_spill] sm:$0xff] %v10267_v57  ;;  %v13528_v13 = vand.u32 4294901760, %v10228_v20  ;;  %v10321_v15 = vsub.f32 %v10267_v57, %v10267_v57  ;;  %v10330_v19 = vsub.f32 %v10238_v24, %v13527_v45  ;;  %v13529_v7 = vand.u32 4294901760, %v10283_v55 }
 0x14f   :  { %7240 = vmatprep.subr.mxu0 %v14178_v54  ;;  %7267 = vmatprep.subr.mxu1 %v14138_v53  ;;  %v10278_v53 = vunpack.c.l.bf16 %v6579_v25  ;;  %v14193_v25 = vld [vmem:[#allocation19_spill] sm:$0xff]  ;;  %v10356_v47 = vunpack.c.l.bf16 %v6578_v0  ;;  %v10425_v9 = vunpack.c.l.bf16 %v6585_v30 }
 0x150   :  { %7241 = vmatpush3.msra.mxu0 %v14180_v38  ;;  %7268 = vmatpush3.msra.mxu1 %v14181_v28  ;;  %v10315_v2 = vsub.f32 %v10228_v20, %v13528_v13  ;;  %v14194_v54 = vld [vmem:[#allocation31_spill] sm:$0xff]  ;;  %v14195_v38 = vld [vmem:[#allocation38_spill] sm:$0xff]  ;;  %v10342_v28 = vsub.f32 %v10249_v26, %v13526_v10  ;;  %v13540_v13 = vsub.s32 7, %v14200_v61 }
 0x151   :  { %14182 = vst [vmem:[#allocation35_spill] sm:$0xff] %v10278_v53  ;;  %7242 = vmatprep.subr.mxu0 %v14183_v50  ;;  %7269 = vmatprep.subr.mxu1 %v14184_v12  ;;  %v10335_v49 = vsub.f32 %v10278_v53, %v10278_v53  ;;  %v10344_v50 = vunpack.c.l.bf16 %v6586_v52  ;;  %v13532_v12 = vand.u32 4294901760, %v10291_v16  ;;  %v10360_v52 = vsub.f32 %v10305_v39, %v10305_v39 }
 0x152   :  { %7243 = vmatpush3.msra.mxu0 %v14185_v46  ;;  %7270 = vmatpush3.msra.mxu1 %v14186_v43  ;;  %v6577_v46 = vld [vmem:[#allocation5 + $0x198] sm:$0xff]   ;;  %v13534_v43 = vand.u32 4294901760, %v10295_v8  ;;  %14202 = vst [vmem:[#allocation24_spill] sm:$0xff] %v10425_v9 }
 0x153   :  { %7244 = vmatprep.subr.mxu0 %v14189_v35  ;;  %7271 = vmatprep.subr.mxu1 %v14141_v56  ;;  %14196 = vst [vmem:[#allocation29_spill] sm:$0xff] %v10344_v50  ;;  %v10354_v35 = vsub.f32 %v10257_v37, %v13525_v58  ;;  %v10370_v58 = vsub.f32 %v10317_v5, %v10317_v5  ;;  %v10380_v10 = vunpack.c.h.bf16 %v6577_v46  ;;  %v13536_v45 = vand.u32 4294901760, %v10335_v49 }
 0x154   :  { %7245 = vmatpush3.msra.mxu0 %v14192_v21  ;;  %2569 = vmatprep.mubr.f32.mxu0 %v14193_v25  ;;  %v10365_v21 = vunpack.c.h.bf16 %v6585_v30  ;;  %v10398_v1 = vsub.f32 %v10344_v50, %v10344_v50  ;;  %v13537_v60 = vand.u32 4294901760, %v10360_v52  ;;  %v6576_v30 = vld [vmem:[#allocation5 + $0x190] sm:$0xff]  }
 0x155   :  { %7272 = vmatpush3.msra.mxu1 %v14194_v54  ;;  %2571 = vmatmul.mubr.f32.vlgmr.msra.gmra.mxu0 %v14195_v38  ;;  %v13535_v54 = vand.u32 4294901760, %v10321_v15  ;;  %14198 = vst [vmem:[#allocation21_spill] sm:$0xff] %v10380_v10  ;;  %v10434_v56 = vsub.f32 %v10380_v10, %v10380_v10 }
 0x156   :  { %7273 = vmatprep.subr.mxu1 %v14145_v41  ;;  %7284 = vmatprep.subr.mxu0 %v10175_v59  ;;  %14197 = vst [vmem:[#allocation12_spill] sm:$0xff] %v10365_v21  ;;  %v10419_v0 = vsub.f32 %v10365_v21, %v10365_v21 }
 0x157   :  { %7274 = vmatpush3.msra.mxu1 %v9894_v34  ;;  %7285 = vmatpush3.msra.mxu0 %v10180_v22  ;;  %v10378_v34 = vsub.f32 %v10283_v55, %v13529_v7  ;;  %v10394_v7 = vsub.f32 %v10295_v8, %v13534_v43  ;;  %v6584_v43 = vld [vmem:[#allocation5 + $0x1d0] sm:$0xff]   ;;  %14203 = vst [vmem:[#allocation25_spill] sm:$0xff] %v10434_v56 }
 0x158   :  { %7275 = vmatprep.subr.mxu1 %v14148_v36  ;;  %7286 = vmatprep.subr.mxu0 %v10188_v44  ;;  %v10389_v36 = vsub.f32 %v10291_v16, %v13532_v12  ;;  %v10406_v12 = vsub.f32 %v10356_v47, %v10356_v47  ;;  %14201 = vst [vmem:[#allocation23_spill] sm:$0xff] %v10419_v0 }
 0x159   :  { %7276 = vmatpush3.msra.mxu1 %v9905_v51  ;;  %7287 = vmatpush3.msra.mxu0 %v10193_v18 }
 0x15a   :  { %7277 = vmatprep.subr.mxu1 %v9936_v6  ;;  %7288 = vmatprep.subr.mxu0 %v10202_v14  ;;  %14199 = vst [vmem:[#allocation22_spill] sm:$0xff] %v10406_v12  ;;  %v10414_v6 = vsub.f32 %v10321_v15, %v13535_v54  ;;  %v10430_v54 = vsub.f32 %v10335_v49, %v13536_v45  ;;  %v10445_v45 = vunpack.c.h.bf16 %v6584_v43 }
 0x15b   :  { %7278 = vmatpush3.msra.mxu1 %v9951_v11  ;;  %7289 = vmatpush3.msra.mxu0 %v10211_v63  ;;  %v2750_v11 = vand.u32 4294901760, %v10378_v34  ;;  %v10440_v34 = vunpack.c.l.bf16 %v6577_v46  ;;  %v14206_v46 = vld [vmem:[#allocation36_spill] sm:$0xff] }
 0x15c   :  { %7279 = vmatprep.subr.mxu1 %v9976_v33  ;;  %7290 = vmatprep.subr.mxu0 %v10216_v27  ;;  %14205 = vst [vmem:[#allocation32_spill] sm:$0xff] %v10445_v45  ;;  %v589_v41 = vrot.slane %v14206_v46, %v13540_v13  ;;  %v14207_v33 = vand.u32 4294901760, %v10370_v58  ;;  %v14209_v13 = vand.u32 4294901760, %v10276_v40  ;;  %v2762_v62 = vand.u32 4294901760, %v10430_v54 }
 0x15d   :  { %7280 = vmatpush3.msra.mxu1 %v9984_v17  ;;  %2641 = vmatprep.mubr.f32.mxu1 %v14193_v25  ;;  %14204 = vst [vmem:[#allocation34_spill] sm:$0xff] %v10440_v34  ;;  %v10450_v17 = vsub.f32 %v10360_v52, %v13537_v60  ;;  %v14208_v25 = vsub.s32 6, %v14200_v61  ;;  %v10490_v54 = vunpack.c.l.bf16 %v6576_v30  ;;  %v6575_v60 = vld [vmem:[#allocation5 + $0x188] sm:$0xff]   ;;  %v14215_v61 = vand.u32 4294901760, %v10315_v2 }
 0x15e   :  { %7291 = vmatpush3.msra.mxu0 %v10233_v3  ;;  %2643 = vmatmul.mubr.f32.vlgmr.msra.gmra.mxu1 %v14195_v38  ;;  %v2858_v38 = vand.u32 4294901760, %v10414_v6  ;;  %v10463_v51 = vsub.f32 %v10370_v58, %v14207_v33  ;;  %v6583_v6 = vld [vmem:[#allocation5 + $0x1c8] sm:$0xff]   ;;  %v10478_v33 = vsub.f32 %v10425_v9, %v10425_v9 }
 0x15f   :  { %7292 = vmatprep.subr.mxu0 %v10243_v48  ;;  %7319 = vmatprep.subr.mxu1 %v2828_v32  ;;  %v585_v3 = vrot.slane %v14206_v46, %v14208_v25  ;;  %v10473_v32 = vunpack.c.h.bf16 %v6576_v30  ;;  %v14211_v25 = vand.u32 4294901760, %v10303_v29  ;;  %v10483_v46 = vunpack.c.l.bf16 %v6584_v43  ;;  %14214 = vst [vmem:[#allocation37_spill] sm:$0xff] %v10490_v54 }
 0x160   :  { %7293 = vmatpush3.msra.mxu0 %v10245_v31  ;;  %7320 = vmatpush3.msra.mxu1 %v14209_v13  ;;  %v14213_v13 = vand.u32 4294901760, %v10398_v1  ;;  %v10494_v48 = vsub.f32 %v10440_v34, %v10440_v34  ;;  %v2864_v29 = vand.u32 4294901760, %v10450_v17  ;;  %v14216_v43 = vand.u32 4294901760, %v10406_v12 }
 0x161   :  { %14210 = vst [vmem:[#allocation20_spill] sm:$0xff] %v10473_v32  ;;  %7294 = vmatprep.subr.mxu0 %v10267_v57  ;;  %7321 = vmatprep.subr.mxu1 %v14211_v25  ;;  %14212 = vst [vmem:[#allocation27_spill] sm:$0xff] %v10483_v46  ;;  %v10507_v30 = vsub.f32 %v10445_v45, %v10445_v45  ;;  %v10515_v2 = vunpack.c.h.bf16 %v6583_v6  ;;  %v14220_v17 = vand.u32 4294901760, %v10419_v0  ;;  %v10522_v57 = vand.u32 4294901760, %v585_v3 }
 0x162   :  { %v10488_v40 = vsub.f32 %v10398_v1, %v14213_v13  ;;  %7295 = vmatpush3.msra.mxu0 %v10278_v53  ;;  %7322 = vmatpush3.msra.mxu1 %v14215_v61  ;;  %v10503_v25 = vsub.f32 %v10406_v12, %v14216_v43  ;;  %v10509_v13 = vand.u32 4294901760, %v589_v41  ;;  %v14218_v53 = vand.u32 4294901760, %v10330_v19  ;;  %v6582_v12 = vld [vmem:[#allocation5 + $0x1c0] sm:$0xff]  }
 0x163   :  { %7296 = vmatprep.subr.mxu0 %v10305_v39  ;;  %v2768_v61 = vand.u32 4294901760, %v10463_v51  ;;  %14219 = vst [vmem:[#allocation28_spill] sm:$0xff] %v10515_v2  ;;  %v10520_v43 = vsub.f32 %v10419_v0, %v14220_v17  ;;  %14221 = vst [vmem:[#allocation26_spill] sm:$0xff] %v10522_v57  ;;  %v14222_v31 = vand.u32 4294901760, %v10342_v28  ;;  %v10527_v39 = vunpack.c.h.bf16 %v6575_v60 }
 0x164   :  { %14217 = vst [vmem:[#allocation18_spill] sm:$0xff] %v10509_v13  ;;  %7323 = vmatprep.subr.mxu1 %v14218_v53  ;;  %7297 = vmatpush3.msra.mxu0 %v10317_v5  ;;  %v14223_v53 = vand.u32 4294901760, %v10434_v56  ;;  %v10537_v17 = vsub.f32 %v10473_v32, %v10473_v32  ;;  %v14224_v5 = vand.u32 4294901760, %v10354_v35  ;;  %v10543_v28 = vunpack.c.l.bf16 %v6583_v6 }
 0x165   :  { %7324 = vmatpush3.msra.mxu1 %v14222_v31  ;;  %7298 = vmatprep.subr.mxu0 %v10344_v50  ;;  %v2870_v31 = vand.u32 4294901760, %v10488_v40  ;;  %v2774_v51 = vand.u32 4294901760, %v10503_v25  ;;  %v10556_v40 = vsub.f32 %v589_v41, %v10509_v13  ;;  %v14227_v6 = vand.u32 4294901760, %v10389_v36 }
 0x166   :  { %v10532_v19 = vsub.f32 %v10434_v56, %v14223_v53  ;;  %7325 = vmatprep.subr.mxu1 %v14224_v5  ;;  %14225 = vst [vmem:[#allocation33_spill] sm:$0xff] %v10543_v28  ;;  %v10548_v53 = vsub.f32 %v10483_v46, %v10483_v46  ;;  %7299 = vmatpush3.msra.mxu0 %v10356_v47  ;;  %v10552_v56 = vunpack.c.l.bf16 %v6575_v60  ;;  %v6574_v5 = vld [vmem:[#allocation5 + $0x180] sm:$0xff]   ;;  %v2876_v0 = vand.u32 4294901760, %v10520_v43 }
 0x167   :  { %7326 = vmatpush3.msra.mxu1 %v2750_v11  ;;  %14226 = vst [vmem:[#allocation39_spill] sm:$0xff] %v10556_v40  ;;  %7300 = vmatprep.subr.mxu0 %v10365_v21  ;;  %v10562_v50 = vunpack.c.h.bf16 %v6582_v12  ;;  %v10566_v11 = vsub.f32 %v10490_v54, %v10490_v54  ;;  %v10569_v60 = vsub.f32 %v585_v3, %v10522_v57  ;;  %v14229_v41 = vand.u32 4294901760, %v10394_v7 }
 0x168   :  { %7327 = vmatprep.subr.mxu1 %v14227_v6  ;;  %7301 = vmatpush3.msra.mxu0 %v10380_v10  ;;  %v2780_v25 = vand.u32 4294901760, %v10532_v19  ;;  %v14230_v36 = vand.u32 4294901760, %v10478_v33  ;;  %v10581_v35 = vsub.f32 %v10515_v2, %v10515_v2  ;;  %v14231_v3 = vand.u32 4294901760, %v10494_v48 }
 0x169   :  { %14228 = vst [vmem:[#allocation19_spill] sm:$0xff] %v10569_v60  ;;  %7328 = vmatpush3.msra.mxu1 %v14229_v41  ;;  %7302 = vmatprep.subr.mxu0 %v10425_v9  ;;  %v10587_v41 = vunpack.c.h.bf16 %v6574_v5  ;;  %v14232_v6 = vand.u32 4294901760, %v10507_v30  ;;  %v10606_v19 = vunpack.c.l.bf16 %v6574_v5  ;;  %v14233_v10 = vand.u32 4294901760, %v10537_v17 }
 0x16a   :  { %v2881_v43 = vsub.f32 %v10478_v33, %v14230_v36  ;;  %7329 = vmatprep.subr.mxu1 %v2858_v38  ;;  %v2785_v7 = vsub.f32 %v10494_v48, %v14231_v3  ;;  %v10592_v36 = vsub.f32 %v10527_v39, %v10527_v39  ;;  %7303 = vmatpush3.msra.mxu0 %v10440_v34  ;;  %v10598_v38 = vunpack.c.l.bf16 %v6582_v12 }
 0x16b   :  { %7330 = vmatpush3.msra.mxu1 %v2762_v62  ;;  %v2887_v9 = vsub.f32 %v10507_v30, %v14232_v6  ;;  %v10603_v3 = vsub.f32 %v10543_v28, %v10543_v28  ;;  %7304 = vmatprep.subr.mxu0 %v10445_v45  ;;  %v10612_v6 = vsub.f32 %v10552_v56, %v10552_v56  ;;  %v14234_v34 = vand.u32 4294901760, %v10548_v53 }
 0x16c   :  { %7331 = vmatprep.subr.mxu1 %v2864_v29  ;;  %7305 = vmatpush3.msra.mxu0 %v10473_v32  ;;  %v2882_v12 = vand.u32 4294901760, %v2881_v43  ;;  %v2791_v21 = vsub.f32 %v10537_v17, %v14233_v10  ;;  %v10621_v5 = vsub.f32 %v10562_v50, %v10562_v50  ;;  %v2786_v62 = vand.u32 4294901760, %v2785_v7 }
 0x16d   :  { %7332 = vmatpush3.msra.mxu1 %v2768_v61  ;;  %7306 = vmatprep.subr.mxu0 %v10483_v46  ;;  %v2893_v32 = vsub.f32 %v10548_v53, %v14234_v34  ;;  %v10630_v43 = vsub.f32 %v10587_v41, %v10587_v41  ;;  %v2888_v10 = vand.u32 4294901760, %v2887_v9  ;;  %v14235_v29 = vand.u32 4294901760, %v10556_v40 }
 0x16e   :  { %7333 = vmatprep.subr.mxu1 %v2870_v31  ;;  %7307 = vmatpush3.msra.mxu0 %v10490_v54  ;;  %v10639_v7 = vsub.f32 %v10598_v38, %v10598_v38  ;;  %v14237_v34 = vand.u32 4294901760, %v10566_v11  ;;  %v2792_v31 = vand.u32 4294901760, %v2791_v21  ;;  %v14241_v54 = vand.u32 4294901760, %v10592_v36 }
 0x16f   :  { %7334 = vmatpush3.msra.mxu1 %v2774_v51  ;;  %v2715_v46 = vsub.f32 %v10556_v40, %v14235_v29  ;;  %7308 = vmatprep.subr.mxu0 %v10515_v2  ;;  %v14238_v51 = vand.u32 4294901760, %v10569_v60  ;;  %v10651_v29 = vsub.f32 %v10606_v19, %v10606_v19 }
 0x170   :  { %14236 = vst [vmem:[#allocation31_spill] sm:$0xff] %v10639_v7  ;;  %7335 = vmatprep.subr.mxu1 %v2876_v0  ;;  %v2797_v61 = vsub.f32 %v10566_v11, %v14237_v34  ;;  %7309 = vmatpush3.msra.mxu0 %v10527_v39  ;;  %v14240_v0 = vand.u32 4294901760, %v10581_v35  ;;  %v13585_v34 = vand.u32 4294901760, %v10639_v7 }
 0x171   :  { %v2721_v9 = vsub.f32 %v10569_v60, %v14238_v51  ;;  %14239 = vst [vmem:[#allocation38_spill] sm:$0xff] %v10651_v29  ;;  %7336 = vmatpush3.msra.mxu1 %v2780_v25  ;;  %7310 = vmatprep.subr.mxu0 %v10543_v28  ;;  %v2894_v51 = vand.u32 4294901760, %v2893_v32  ;;  %v2803_v60 = vsub.f32 %v10592_v36, %v14241_v54  ;;  %v2716_v21 = vand.u32 4294901760, %v2715_v46 }
 0x172   :  { %v2899_v2 = vsub.f32 %v10581_v35, %v14240_v0  ;;  %7337 = vmatprep.subr.mxu1 %v2882_v12  ;;  %7311 = vmatpush3.msra.mxu0 %v10552_v56  ;;  %v14242_v25 = vand.u32 4294901760, %v10603_v3  ;;  %v2798_v32 = vand.u32 4294901760, %v2797_v61  ;;  %v14243_v28 = vand.u32 4294901760, %v10612_v6 }
 0x173   :  { %7338 = vmatpush3.msra.mxu1 %v2786_v62  ;;  %7312 = vmatprep.subr.mxu0 %v10562_v50  ;;  %v2722_v12 = vand.u32 4294901760, %v2721_v9  ;;  %v13584_v40 = vand.u32 4294901760, %v10651_v29  ;;  %v14244_v62 = vand.u32 4294901760, %v10621_v5  ;;  %v14245_v61 = vand.u32 4294901760, %v10630_v43 }
 0x174   :  { %v2905_v0 = vsub.f32 %v10603_v3, %v14242_v25  ;;  %7339 = vmatprep.subr.mxu1 %v2888_v10  ;;  %v2809_v54 = vsub.f32 %v10612_v6, %v14243_v28  ;;  %7313 = vmatpush3.msra.mxu0 %v10587_v41  ;;  %v2900_v46 = vand.u32 4294901760, %v2899_v2  ;;  %v2804_v10 = vand.u32 4294901760, %v2803_v60 }
 0x175   :  { %7340 = vmatpush3.msra.mxu1 %v2792_v31  ;;  %v2911_v25 = vsub.f32 %v10621_v5, %v14244_v62  ;;  %7314 = vmatprep.subr.mxu0 %v10598_v38  ;;  %v2815_v9 = vsub.f32 %v10630_v43, %v14245_v61  ;;  %v2917_v2 = vsub.f32 %v10639_v7, %v13585_v34  ;;  %v14249_v62 = vld [vmem:[#allocation17_spill] sm:$0xff]  ;;  %v14252_v61 = vld [vmem:[#allocation15_spill] sm:$0xff] }
 0x176   :  { %7341 = vmatprep.subr.mxu1 %v2894_v51  ;;  %7315 = vmatpush3.msra.mxu0 %v10606_v19  ;;  %v2906_v28 = vand.u32 4294901760, %v2905_v0  ;;  %v2810_v31 = vand.u32 4294901760, %v2809_v54  ;;  %v2821_v51 = vsub.f32 %v10651_v29, %v13584_v40  ;;  %v14247_v54 = vld [vmem:[#allocation13_spill] sm:$0xff]  ;;  %v14262_v40 = vld [vmem:[#allocation27_spill] sm:$0xff] }
 0x177   :  { %2717 = vmatprep.mubr.f32.mxu0 %v2716_v21  ;;  %7342 = vmatpush3.msra.mxu1 %v2798_v32  ;;  %v2912_v60 = vand.u32 4294901760, %v2911_v25  ;;  %v2816_v21 = vand.u32 4294901760, %v2815_v9  ;;  %v2918_v0 = vand.u32 4294901760, %v2917_v2  ;;  %v14250_v25 = vld [vmem:[#allocation25_spill] sm:$0xff]  ;;  %v14253_v9 = vld [vmem:[#allocation35_spill] sm:$0xff]  ;;  %v14255_v2 = vld [vmem:[#allocation16_spill] sm:$0xff] }
 0x178   :  { %2723 = vmatmul.mubr.f32.vlgmr.msra.gmra.mxu0 %v2722_v12  ;;  %7343 = vmatprep.subr.mxu1 %v2900_v46  ;;  %v2822_v32 = vand.u32 4294901760, %v2821_v51  ;;  %v14246_v12 = vld [vmem:[#allocation22_spill] sm:$0xff]  ;;  %v14248_v46 = vld [vmem:[#allocation23_spill] sm:$0xff]  ;;  %v14257_v51 = vld [vmem:[#allocation12_spill] sm:$0xff] }
 0x179   :  { %7354 = vmatprep.subr.mxu0 %v10197_v4  ;;  %7344 = vmatpush3.msra.mxu1 %v2804_v10  ;;  %v14251_v10 = vld [vmem:[#allocation14_spill] sm:$0xff]  ;;  %v14263_v34 = vld [vmem:[#allocation39_spill] sm:$0xff] }
 0x17a   :  { %7355 = vmatpush3.msra.mxu0 %v10206_v42  ;;  %7345 = vmatprep.subr.mxu1 %v2906_v28  ;;  %v14254_v28 = vld [vmem:[#allocation30_spill] sm:$0xff] }
 0x17b   :  { %7356 = vmatprep.subr.mxu0 %v10220_v23  ;;  %7346 = vmatpush3.msra.mxu1 %v2810_v31  ;;  %v14256_v31 = vld [vmem:[#allocation29_spill] sm:$0xff] }
 0x17c   :  { %7357 = vmatpush3.msra.mxu0 %v10228_v20  ;;  %7347 = vmatprep.subr.mxu1 %v2912_v60  ;;  %v14258_v60 = vld [vmem:[#allocation21_spill] sm:$0xff] }
 0x17d   :  { %7358 = vmatprep.subr.mxu0 %v10238_v24  ;;  %7348 = vmatpush3.msra.mxu1 %v2816_v21  ;;  %v14259_v21 = vld [vmem:[#allocation24_spill] sm:$0xff] }
 0x17e   :  { %7359 = vmatpush3.msra.mxu0 %v10249_v26  ;;  %7349 = vmatprep.subr.mxu1 %v2918_v0  ;;  %v14260_v0 = vld [vmem:[#allocation34_spill] sm:$0xff] }
 0x17f   :  { %7360 = vmatprep.subr.mxu0 %v10257_v37  ;;  %7350 = vmatpush3.msra.mxu1 %v2822_v32  ;;  %v14261_v32 = vld [vmem:[#allocation20_spill] sm:$0xff] }
 0x180   :  { %2921 = vmatprep.mubr.f32.mxu1 %v10509_v13  ;;  %7361 = vmatpush3.msra.mxu0 %v10283_v55  ;;  %v14265_v13 = vld [vmem:[#allocation19_spill] sm:$0xff] }
 0x181   :  { %2923 = vmatmul.mubr.f32.vlgmr.msra.gmra.mxu1 %v10522_v57  ;;  %7362 = vmatprep.subr.mxu0 %v10291_v16  ;;  %v14264_v57 = vld [vmem:[#allocation37_spill] sm:$0xff] }
 0x182   :  { %7389 = vmatprep.subr.mxu1 %v10175_v59  ;;  %7363 = vmatpush3.msra.mxu0 %v10295_v8 }
 0x183   :  { %7390 = vmatpush3.msra.mxu1 %v10180_v22  ;;  %7364 = vmatprep.subr.mxu0 %v10321_v15 }
 0x184   :  { %7391 = vmatprep.subr.mxu1 %v10188_v44  ;;  %7365 = vmatpush3.msra.mxu0 %v10335_v49 }
 0x185   :  { %7392 = vmatpush3.msra.mxu1 %v10193_v18  ;;  %7366 = vmatprep.subr.mxu0 %v10360_v52 }
 0x186   :  { %7393 = vmatprep.subr.mxu1 %v10202_v14  ;;  %7367 = vmatpush3.msra.mxu0 %v10370_v58 }
 0x187   :  { %7394 = vmatpush3.msra.mxu1 %v10211_v63  ;;  %7368 = vmatprep.subr.mxu0 %v10398_v1 }
 0x188   :  { %7395 = vmatprep.subr.mxu1 %v10216_v27  ;;  %7369 = vmatpush3.msra.mxu0 %v14246_v12 }
 0x189   :  { %7396 = vmatpush3.msra.mxu1 %v14247_v54  ;;  %7370 = vmatprep.subr.mxu0 %v14248_v46 }
 0x18a   :  { %7397 = vmatprep.subr.mxu1 %v14249_v62  ;;  %7371 = vmatpush3.msra.mxu0 %v14250_v25 }
 0x18b   :  { %7398 = vmatpush3.msra.mxu1 %v14251_v10  ;;  %7372 = vmatprep.subr.mxu0 %v10478_v33 }
 0x18c   :  { %7399 = vmatprep.subr.mxu1 %v14252_v61  ;;  %7373 = vmatpush3.msra.mxu0 %v10494_v48 }
 0x18d   :  { %7400 = vmatpush3.msra.mxu1 %v14253_v9  ;;  %7374 = vmatprep.subr.mxu0 %v10507_v30 }
 0x18e   :  { %7401 = vmatprep.subr.mxu1 %v14254_v28  ;;  %7375 = vmatpush3.msra.mxu0 %v10537_v17 }
 0x18f   :  { %7402 = vmatpush3.msra.mxu1 %v14255_v2  ;;  %7376 = vmatprep.subr.mxu0 %v10548_v53 }
 0x190   :  { %7403 = vmatprep.subr.mxu1 %v14256_v31  ;;  %7377 = vmatpush3.msra.mxu0 %v10566_v11 }
 0x191   :  { %7404 = vmatpush3.msra.mxu1 %v10356_v47  ;;  %7378 = vmatprep.subr.mxu0 %v10581_v35 }
 0x192   :  { %7405 = vmatprep.subr.mxu1 %v14257_v51  ;;  %7379 = vmatpush3.msra.mxu0 %v10592_v36 }
 0x193   :  { %7406 = vmatpush3.msra.mxu1 %v14258_v60  ;;  %7380 = vmatprep.subr.mxu0 %v10603_v3 }
 0x194   :  { %7407 = vmatprep.subr.mxu1 %v14259_v21  ;;  %7381 = vmatpush3.msra.mxu0 %v10612_v6 }
 0x195   :  { %7408 = vmatpush3.msra.mxu1 %v14260_v0  ;;  %7382 = vmatprep.subr.mxu0 %v10621_v5  ;;  %v14266_v0 = vld [vmem:[#allocation28_spill] sm:$0xff] }
 0x196   :  { %7409 = vmatprep.subr.mxu1 %v10445_v45  ;;  %7383 = vmatpush3.msra.mxu0 %v10630_v43  ;;  %v14267_v45 = vand.u32 4294901760, %v10197_v4  ;;  %v14272_v4 = vand.u32 4294901760, %v10238_v24  ;;  %v14277_v24 = vand.u32 4294901760, %v14265_v13 }
 0x197   :  { %7410 = vmatpush3.msra.mxu1 %v14261_v32  ;;  %7384 = vmatprep.subr.mxu0 %v10639_v7  ;;  %v14268_v32 = vand.u32 4294901760, %v10206_v42  ;;  %v14269_v7 = vld [vmem:[#allocation33_spill] sm:$0xff]  ;;  %v14273_v42 = vand.u32 4294901760, %v10249_v26  ;;  %v14279_v26 = vand.u32 4294901760, %v10295_v8  ;;  %v14283_v8 = vand.u32 4294901760, %v10370_v58 }
 0x198   :  { %7411 = vmatprep.subr.mxu1 %v14262_v40  ;;  %7385 = vmatpush3.msra.mxu0 %v10651_v29  ;;  %v14270_v29 = vand.u32 4294901760, %v10220_v23  ;;  %v14274_v23 = vand.u32 4294901760, %v10257_v37  ;;  %v14280_v37 = vand.u32 4294901760, %v10321_v15  ;;  %v6604_v58 = vld [vmem:[#allocation5 + $0x270] sm:$0xff]  }
 0x199   :  { %3026 = vmatprep.mubr.f32.mxu0 %v14263_v34  ;;  %7412 = vmatpush3.msra.mxu1 %v14264_v57  ;;  %v14271_v57 = vand.u32 4294901760, %v10228_v20  ;;  %v14275_v20 = vand.u32 4294901760, %v14263_v34 }
 0x19a   :  { %3029 = vmatmul.mubr.f32.vlgmr.msra.gmra.mxu0 %v14265_v13  ;;  %7413 = vmatprep.subr.mxu1 %v14266_v0 }
 0x19b   :  { %7424 = vmatprep.subr.mxu0 %v14267_v45  ;;  %7414 = vmatpush3.msra.mxu1 %v10527_v39  ;;  %v14278_v45 = vand.u32 4294901760, %v10291_v16  ;;  %v14282_v16 = vand.u32 4294901760, %v10360_v52  ;;  %v14289_v52 = vand.u32 4294901760, %v10494_v48  ;;  %v10834_v48 = vunpack.c.h.bf16 %v6604_v58 }
 0x19c   :  { %7425 = vmatpush3.msra.mxu0 %v14268_v32  ;;  %7415 = vmatprep.subr.mxu1 %v14269_v7 }
 0x19d   :  { %7426 = vmatprep.subr.mxu0 %v14270_v29  ;;  %7416 = vmatpush3.msra.mxu1 %v10552_v56  ;;  %v14281_v29 = vand.u32 4294901760, %v10335_v49  ;;  %v6596_v49 = vld [vmem:[#allocation5 + $0x230] sm:$0xff]  }
 0x19e   :  { %7427 = vmatpush3.msra.mxu0 %v14271_v57  ;;  %7417 = vmatprep.subr.mxu1 %v10562_v50  ;;  %v14276_v57 = vand.u32 4294901760, %v10283_v55  ;;  %v6605_v55 = vld [vmem:[#allocation5 + $0x278] sm:$0xff]  }
 0x19f   :  { %7428 = vmatprep.subr.mxu0 %v14272_v4  ;;  %7418 = vmatpush3.msra.mxu1 %v10587_v41  ;;  %v10820_v13 = vunpack.c.l.bf16 %v6605_v55 }
 0x1a0   :  { %7429 = vmatpush3.msra.mxu0 %v14273_v42  ;;  %7419 = vmatprep.subr.mxu1 %v10598_v38 }
 0x1a1   :  { %7430 = vmatprep.subr.mxu0 %v14274_v23  ;;  %7420 = vmatpush3.msra.mxu1 %v10606_v19 }
 0x1a2   :  { %3101 = vmatprep.mubr.f32.mxu1 %v14275_v20  ;;  %7431 = vmatpush3.msra.mxu0 %v14276_v57  ;;  %v14301_v20 = vand.u32 4294901760, %v10612_v6  ;;  %v14302_v57 = vld [vmem:[#allocation34_spill] sm:$0xff] }
 0x1a3   :  { %3105 = vmatmul.mubr.f32.vlgmr.msra.gmra.mxu1 %v14277_v24  ;;  %7432 = vmatprep.subr.mxu0 %v14278_v45  ;;  %v6602_v45 = vld [vmem:[#allocation5 + $0x260] sm:$0xff]  }
 0x1a4   :  { %7459 = vmatprep.subr.mxu1 %v10175_v59  ;;  %7433 = vmatpush3.msra.mxu0 %v14279_v26  ;;  %v6597_v59 = vld [vmem:[#allocation5 + $0x238] sm:$0xff]   ;;  %v14304_v26 = vand.u32 4294901760, %v10621_v5 }
 0x1a5   :  { %7460 = vmatpush3.msra.mxu1 %v10180_v22  ;;  %7434 = vmatprep.subr.mxu0 %v14280_v37  ;;  %v10794_v22 = vunpack.c.h.bf16 %v6605_v55  ;;  %v10802_v15 = vunpack.c.h.bf16 %v6597_v59  ;;  %v14305_v37 = vld [vmem:[#allocation32_spill] sm:$0xff]  ;;  %v6594_v55 = vld [vmem:[#allocation5 + $0x220] sm:$0xff]  }
 0x1a6   :  { %7461 = vmatprep.subr.mxu1 %v10188_v44  ;;  %7435 = vmatpush3.msra.mxu0 %v14281_v29  ;;  %v14284_v44 = vand.u32 4294901760, %v10398_v1  ;;  %v14288_v1 = vand.u32 4294901760, %v10478_v33  ;;  %v10829_v33 = vunpack.c.l.bf16 %v6597_v59  ;;  %v14307_v59 = vld [vmem:[#allocation20_spill] sm:$0xff] }
 0x1a7   :  { %7462 = vmatpush3.msra.mxu1 %v10193_v18  ;;  %7436 = vmatprep.subr.mxu0 %v14282_v16  ;;  %v14285_v18 = vand.u32 4294901760, %v14246_v12  ;;  %v10824_v34 = vsub.f32 %v10802_v15, %v10802_v15  ;;  %v14290_v12 = vand.u32 4294901760, %v10507_v30  ;;  %v10842_v30 = vunpack.c.l.bf16 %v6604_v58 }
 0x1a8   :  { %7463 = vmatprep.subr.mxu1 %v10202_v14  ;;  %7437 = vmatpush3.msra.mxu0 %v14283_v8  ;;  %v14286_v14 = vand.u32 4294901760, %v14248_v46  ;;  %v10836_v46 = vunpack.c.h.bf16 %v6596_v49  ;;  %v10861_v32 = vsub.f32 %v10829_v33, %v10829_v33  ;;  %v14306_v16 = vand.u32 4294901760, %v10630_v43 }
 0x1a9   :  { %7464 = vmatpush3.msra.mxu1 %v10211_v63  ;;  %7438 = vmatprep.subr.mxu0 %v14284_v44  ;;  %v14287_v63 = vand.u32 4294901760, %v14250_v25  ;;  %v10888_v42 = vsub.f32 %v10842_v30, %v10842_v30 }
 0x1aa   :  { %7465 = vmatprep.subr.mxu1 %v10216_v27  ;;  %7439 = vmatpush3.msra.mxu0 %v14285_v18  ;;  %v10812_v27 = vsub.f32 %v10794_v22, %v10794_v22  ;;  %v10879_v4 = vsub.f32 %v10836_v46, %v10836_v46  ;;  %v13598_v6 = vand.u32 4294901760, %v10861_v32 }
 0x1ab   :  { %7466 = vmatpush3.msra.mxu1 %v14247_v54  ;;  %7440 = vmatprep.subr.mxu0 %v14286_v14  ;;  %v14291_v54 = vand.u32 4294901760, %v10537_v17  ;;  %v6595_v17 = vld [vmem:[#allocation5 + $0x228] sm:$0xff]   ;;  %v13594_v43 = vand.u32 4294901760, %v10888_v42 }
 0x1ac   :  { %7467 = vmatprep.subr.mxu1 %v14249_v62  ;;  %7441 = vmatpush3.msra.mxu0 %v14287_v63  ;;  %v6603_v62 = vld [vmem:[#allocation5 + $0x268] sm:$0xff]   ;;  %v13602_v25 = vand.u32 4294901760, %v10812_v27  ;;  %v10903_v24 = vunpack.c.l.bf16 %v6595_v17  ;;  %v13595_v5 = vand.u32 4294901760, %v10879_v4 }
 0x1ad   :  { %7468 = vmatpush3.msra.mxu1 %v14251_v10  ;;  %7442 = vmatprep.subr.mxu0 %v14288_v1  ;;  %v14292_v10 = vand.u32 4294901760, %v10548_v53  ;;  %v14295_v53 = vand.u32 4294901760, %v10581_v35  ;;  %v10871_v35 = vunpack.c.h.bf16 %v6595_v17  ;;  %v14308_v14 = vld [vmem:[#allocation31_spill] sm:$0xff]  ;;  %v10926_v1 = vunpack.c.h.bf16 %v6602_v45 }
 0x1ae   :  { %7469 = vmatprep.subr.mxu1 %v14252_v61  ;;  %7443 = vmatpush3.msra.mxu0 %v14289_v52  ;;  %v10844_v61 = vunpack.c.l.bf16 %v6596_v49  ;;  %14303 = vst [vmem:[#allocation17_spill] sm:$0xff] %v10903_v24  ;;  %v14309_v63 = vand.u32 4294901760, %v14308_v14  ;;  %v6601_v49 = vld [vmem:[#allocation5 + $0x258] sm:$0xff]   ;;  %v10943_v17 = vunpack.c.h.bf16 %v6594_v55 }
 0x1af   :  { %7470 = vmatpush3.msra.mxu1 %v14253_v9  ;;  %7444 = vmatprep.subr.mxu0 %v14290_v12  ;;  %v14294_v9 = vand.u32 4294901760, %v10566_v11  ;;  %v14297_v11 = vand.u32 4294901760, %v10592_v36  ;;  %14298 = vst [vmem:[#allocation13_spill] sm:$0xff] %v10871_v35  ;;  %v14299_v36 = vand.u32 4294901760, %v10603_v3  ;;  %v10921_v18 = vsub.f32 %v10871_v35, %v10871_v35  ;;  %14310 = vst [vmem:[#allocation25_spill] sm:$0xff] %v10926_v1  ;;  %v14311_v12 = vld [vmem:[#allocation38_spill] sm:$0xff] }
 0x1b0   :  { %7471 = vmatprep.subr.mxu1 %v14254_v28  ;;  %7445 = vmatpush3.msra.mxu0 %v14291_v54  ;;  %14293 = vst [vmem:[#allocation36_spill] sm:$0xff] %v10844_v61  ;;  %v13601_v28 = vand.u32 4294901760, %v10824_v34  ;;  %v10892_v23 = vsub.f32 %v10844_v61, %v10844_v61  ;;  %v14312_v54 = vand.u32 4294901760, %v14311_v12  ;;  %14314 = vst [vmem:[#allocation14_spill] sm:$0xff] %v10943_v17 }
 0x1b1   :  { %7472 = vmatpush3.msra.mxu1 %v14255_v2  ;;  %7446 = vmatprep.subr.mxu0 %v14292_v10  ;;  %v10852_v2 = vsub.f32 %v10820_v13, %v10820_v13  ;;  %v10991_v12 = vsub.f32 %v10926_v1, %v10926_v1 }
 0x1b2   :  { %7473 = vmatprep.subr.mxu1 %v14256_v31  ;;  %7447 = vmatpush3.msra.mxu0 %v14294_v9  ;;  %v10857_v31 = vunpack.c.h.bf16 %v6603_v62  ;;  %v10900_v3 = vsub.f32 %v10824_v34, %v13601_v28  ;;  %v13593_v58 = vand.u32 4294901760, %v10892_v23  ;;  %v10947_v9 = vsub.f32 %v10903_v24, %v10903_v24 }
 0x1b3   :  { %7474 = vmatpush3.msra.mxu1 %v10356_v47  ;;  %7448 = vmatprep.subr.mxu0 %v14295_v53  ;;  %v10869_v47 = vsub.f32 %v10812_v27, %v13602_v25  ;;  %v14315_v53 = vld [vmem:[#allocation37_spill] sm:$0xff] }
 0x1b4   :  { %7475 = vmatprep.subr.mxu1 %v14257_v51  ;;  %14296 = vst [vmem:[#allocation22_spill] sm:$0xff] %v10857_v31  ;;  %7449 = vmatpush3.msra.mxu0 %v14297_v11  ;;  %v10875_v51 = vsub.f32 %v10834_v48, %v10834_v48  ;;  %v10911_v29 = vsub.f32 %v10857_v31, %v10857_v31  ;;  %v14316_v11 = vld [vmem:[#allocation26_spill] sm:$0xff]  ;;  %v6592_v25 = vld [vmem:[#allocation5 + $0x210] sm:$0xff]  }
 0x1b5   :  { %7476 = vmatpush3.msra.mxu1 %v14258_v60  ;;  %7450 = vmatprep.subr.mxu0 %v14299_v36  ;;  %v10884_v60 = vunpack.c.l.bf16 %v6603_v62  ;;  %v3498_v8 = vand.u32 4294901760, %v10869_v47  ;;  %v14313_v62 = vld [vmem:[#allocation18_spill] sm:$0xff]  ;;  %v10954_v36 = vsub.f32 %v10861_v32, %v13598_v6  ;;  %v10986_v14 = vsub.f32 %v10892_v23, %v13593_v58 }
 0x1b6   :  { %7477 = vmatprep.subr.mxu1 %v14259_v21  ;;  %7451 = vmatpush3.msra.mxu0 %v14301_v20  ;;  %v13600_v21 = vand.u32 4294901760, %v10852_v2  ;;  %v13597_v44 = vand.u32 4294901760, %v10875_v51  ;;  %v10956_v20 = vunpack.c.l.bf16 %v6602_v45  ;;  %v10973_v45 = vunpack.c.h.bf16 %v6601_v49 }
 0x1b7   :  { %14300 = vst [vmem:[#allocation23_spill] sm:$0xff] %v10884_v60  ;;  %7478 = vmatpush3.msra.mxu1 %v14302_v57  ;;  %7452 = vmatprep.subr.mxu0 %v14304_v26  ;;  %v10932_v52 = vsub.f32 %v10884_v60, %v10884_v60  ;;  %v10958_v57 = vunpack.c.l.bf16 %v6594_v55  ;;  %v13596_v26 = vand.u32 4294901760, %v10911_v29  ;;  %v13599_v55 = vand.u32 4294901760, %v10921_v18 }
 0x1b8   :  { %7479 = vmatprep.subr.mxu1 %v14305_v37  ;;  %7453 = vmatpush3.msra.mxu0 %v14306_v16  ;;  %14317 = vst [vmem:[#allocation15_spill] sm:$0xff] %v10956_v20  ;;  %v6593_v37 = vld [vmem:[#allocation5 + $0x218] sm:$0xff]   ;;  %v10966_v16 = vsub.f32 %v10875_v51, %v13597_v44  ;;  %14318 = vst [vmem:[#allocation35_spill] sm:$0xff] %v10973_v45  ;;  %v11001_v58 = vsub.f32 %v10943_v17, %v10943_v17 }
 0x1b9   :  { %7480 = vmatpush3.msra.mxu1 %v14307_v59  ;;  %7454 = vmatprep.subr.mxu0 %v14309_v63  ;;  %v10971_v59 = vsub.f32 %v10879_v4, %v13595_v5  ;;  %v13603_v63 = vand.u32 4294901760, %v10932_v52  ;;  %v11017_v5 = vsub.f32 %v10958_v57, %v10958_v57  ;;  %v11030_v44 = vsub.f32 %v10973_v45, %v10973_v45 }
 0x1ba   :  { %7481 = vmatprep.subr.mxu1 %v14262_v40  ;;  %7455 = vmatpush3.msra.mxu0 %v14312_v54  ;;  %v10941_v40 = vsub.f32 %v10852_v2, %v13600_v21  ;;  %v10996_v54 = vunpack.c.h.bf16 %v6593_v37  ;;  %v11042_v21 = vld [vmem:[#allocation2 + $0x8] sm:$0xff] }
 0x1bb   :  { %3239 = vmatprep.mubr.f32.mxu0 %v14313_v62  ;;  %7482 = vmatpush3.msra.mxu1 %v14315_v53  ;;  %v13604_v53 = vand.u32 4294901760, %v10947_v9  ;;  %14320 = vst [vmem:[#allocation16_spill] sm:$0xff] %v11017_v5  ;;  %14321 = vst [vmem:[#allocation29_spill] sm:$0xff] %v11030_v44 }
 0x1bc   :  { %3241 = vmatmul.mubr.f32.vlgmr.msra.gmra.mxu0 %v14316_v11  ;;  %7483 = vmatprep.subr.mxu1 %v14266_v0  ;;  %v10981_v0 = vsub.f32 %v10888_v42, %v13594_v43  ;;  %14319 = vst [vmem:[#allocation30_spill] sm:$0xff] %v10996_v54  ;;  %v3408_v43 = vand.u32 4294901760, %v10954_v36  ;;  %v3414_v36 = vand.u32 4294901760, %v10971_v59  ;;  %v6600_v59 = vld [vmem:[#allocation5 + $0x250] sm:$0xff]   ;;  %14322 = vst [vmem:[#allocation12_spill] sm:$0xff] %v11042_v21 }
 0x1bd   :  { %7494 = vmatprep.subr.mxu0 %v10794_v22  ;;  %7484 = vmatpush3.msra.mxu1 %v10527_v39  ;;  %v3504_v39 = vand.u32 4294901760, %v10941_v40  ;;  %v11013_v40 = vsub.f32 %v10956_v20, %v10956_v20  ;;  %v11051_v28 = vsub.f32 %v10947_v9, %v13604_v53  ;;  %v11056_v6 = vsub.f32 %v10996_v54, %v10996_v54 }
 0x1be   :  { %7495 = vmatpush3.msra.mxu0 %v10802_v15  ;;  %7485 = vmatprep.subr.mxu1 %v14269_v7  ;;  %v11009_v7 = vsub.f32 %v10911_v29, %v13596_v26  ;;  %v11026_v26 = vsub.f32 %v10921_v18, %v13599_v55  ;;  %v11068_v10 = vunpack.c.h.bf16 %v6600_v59  ;;  %v14327_v55 = vld [vmem:[#allocation11_spill] sm:$0xff]  ;;  %v14329_v53 = vand.u32 4294901760, %v10991_v12 }
 0x1bf   :  { %7496 = vmatprep.subr.mxu0 %v10820_v13  ;;  %7486 = vmatpush3.msra.mxu1 %v10552_v56  ;;  %v3510_v56 = vand.u32 4294901760, %v10966_v16  ;;  %v11039_v16 = vsub.f32 %v10932_v52, %v13603_v63  ;;  %14324 = vst [vmem:[#allocation24_spill] sm:$0xff] %v11056_v6  ;;  %v3432_v47 = vand.u32 4294901760, %v11051_v28  ;;  %v14335_v28 = vand.u32 4294901760, %v11013_v40 }
 0x1c0   :  { %7497 = vmatpush3.msra.mxu0 %v10829_v33  ;;  %7487 = vmatprep.subr.mxu1 %v10562_v50  ;;  %v3426_v63 = vand.u32 4294901760, %v11026_v26  ;;  %14326 = vst [vmem:[#allocation39_spill] sm:$0xff] %v11068_v10  ;;  %v11083_v26 = vunpack.c.h.bf16 %v6592_v25 }
 0x1c1   :  { %7498 = vmatprep.subr.mxu0 %v10834_v48  ;;  %7488 = vmatpush3.msra.mxu1 %v10587_v41  ;;  %v11046_v41 = vunpack.c.l.bf16 %v6601_v49  ;;  %v11061_v49 = vunpack.c.l.bf16 %v6593_v37  ;;  %v3528_v37 = vand.u32 4294901760, %v11039_v16 }
 0x1c2   :  { %7499 = vmatpush3.msra.mxu0 %v10836_v46  ;;  %7489 = vmatprep.subr.mxu1 %v10598_v38  ;;  %v3522_v38 = vand.u32 4294901760, %v11009_v7  ;;  %14330 = vst [vmem:[#allocation19_spill] sm:$0xff] %v11083_v26 }
 0x1c3   :  { %7500 = vmatprep.subr.mxu0 %v10842_v30  ;;  %14323 = vst [vmem:[#allocation21_spill] sm:$0xff] %v11046_v41  ;;  %7490 = vmatpush3.msra.mxu1 %v10606_v19  ;;  %14325 = vst [vmem:[#allocation27_spill] sm:$0xff] %v11061_v49  ;;  %v14331_v19 = vsub.s32 0, %v14327_v55 }
 0x1c4   :  { %3311 = vmatprep.mubr.f32.mxu1 %v14313_v62  ;;  %7501 = vmatpush3.msra.mxu0 %v10844_v61  ;;  %v14328_v62 = vsub.s32 1, %v14327_v55  ;;  %v11100_v55 = vsub.f32 %v11046_v41, %v11046_v41  ;;  %v11117_v61 = vsub.f32 %v11061_v49, %v11061_v49 }
 0x1c5   :  { %3313 = vmatmul.mubr.f32.vlgmr.msra.gmra.mxu1 %v14316_v11  ;;  %7502 = vmatprep.subr.mxu0 %v10857_v31  ;;  %v11081_v11 = vsub.f32 %v10991_v12, %v14329_v53  ;;  %v593_v50 = vrot.slane %v11042_v21, %v14331_v19  ;;  %v6599_v53 = vld [vmem:[#allocation5 + $0x248] sm:$0xff]   ;;  %v11108_v19 = vsub.f32 %v11013_v40, %v14335_v28 }
 0x1c6   :  { %v597_v7 = vrot.slane %v11042_v21, %v14328_v62  ;;  %7529 = vmatprep.subr.mxu1 %v3498_v8  ;;  %7503 = vmatpush3.msra.mxu0 %v10871_v35  ;;  %v14332_v62 = vand.u32 4294901760, %v10900_v3  ;;  %v14333_v8 = vand.u32 4294901760, %v11001_v58  ;;  %v6591_v31 = vld [vmem:[#allocation5 + $0x208] sm:$0xff]   ;;  %v11103_v3 = vunpack.c.l.bf16 %v6600_v59 }
 0x1c7   :  { %7504 = vmatprep.subr.mxu0 %v10884_v60  ;;  %v14338_v59 = vand.u32 4294901760, %v11030_v44  ;;  %v11129_v28 = vsub.f32 %v11068_v10, %v11068_v10  ;;  %v3534_v60 = vand.u32 4294901760, %v11081_v11  ;;  %v14342_v35 = vand.u32 4294901760, %v11056_v6 }
 0x1c8   :  { %7530 = vmatpush3.msra.mxu1 %v14332_v62  ;;  %v11095_v16 = vsub.f32 %v11001_v58, %v14333_v8  ;;  %14334 = vst [vmem:[#allocation28_spill] sm:$0xff] %v11103_v3  ;;  %v14336_v62 = vand.u32 4294901760, %v11017_v5  ;;  %7505 = vmatpush3.msra.mxu0 %v10903_v24  ;;  %v11135_v24 = vunpack.c.h.bf16 %v6599_v53  ;;  %v11151_v11 = vsub.f32 %v11083_v26, %v11083_v26 }
 0x1c9   :  { %7531 = vmatprep.subr.mxu1 %v3504_v39  ;;  %v11120_v39 = vunpack.c.l.bf16 %v6592_v25  ;;  %v11125_v21 = vsub.f32 %v11030_v44, %v14338_v59  ;;  %7506 = vmatprep.subr.mxu0 %v10926_v1  ;;  %v11137_v25 = vunpack.c.h.bf16 %v6591_v31  ;;  %v11146_v44 = vsub.f32 %v11056_v6, %v14342_v35  ;;  %v6598_v1 = vld [vmem:[#allocation5 + $0x240] sm:$0xff]  }
 0x1ca   :  { %v11113_v8 = vsub.f32 %v11017_v5, %v14336_v62  ;;  %7532 = vmatpush3.msra.mxu1 %v3408_v43  ;;  %v11131_v62 = vand.u32 4294901760, %v597_v7  ;;  %14340 = vst [vmem:[#allocation32_spill] sm:$0xff] %v11135_v24  ;;  %v11139_v43 = vand.u32 4294901760, %v593_v50  ;;  %7507 = vmatpush3.msra.mxu0 %v10943_v17  ;;  %v3438_v59 = vand.u32 4294901760, %v11095_v16 }
 0x1cb   :  { %14337 = vst [vmem:[#allocation33_spill] sm:$0xff] %v11120_v39  ;;  %7533 = vmatprep.subr.mxu1 %v3510_v56  ;;  %7508 = vmatprep.subr.mxu0 %v10956_v20  ;;  %v14343_v5 = vand.u32 4294901760, %v10981_v0  ;;  %v11161_v35 = vsub.f32 %v11103_v3, %v11103_v3  ;;  %v14344_v56 = vand.u32 4294901760, %v10986_v14  ;;  %v3546_v20 = vand.u32 4294901760, %v11125_v21  ;;  %v6590_v0 = vld [vmem:[#allocation5 + $0x200] sm:$0xff]  }
 0x1cc   :  { %14339 = vst [vmem:[#allocation34_spill] sm:$0xff] %v11131_v62  ;;  %14341 = vst [vmem:[#allocation20_spill] sm:$0xff] %v11139_v43  ;;  %7534 = vmatpush3.msra.mxu1 %v3414_v36  ;;  %v3540_v36 = vand.u32 4294901760, %v11108_v19  ;;  %v3444_v16 = vand.u32 4294901760, %v11113_v8  ;;  %7509 = vmatpush3.msra.mxu0 %v10958_v57  ;;  %v11167_v6 = vunpack.c.l.bf16 %v6599_v53  ;;  %v11171_v19 = vsub.f32 %v597_v7, %v11131_v62 }
 0x1cd   :  { %7535 = vmatprep.subr.mxu1 %v14343_v5  ;;  %7510 = vmatprep.subr.mxu0 %v10973_v45  ;;  %v11174_v8 = vunpack.c.l.bf16 %v6591_v31  ;;  %v11176_v17 = vunpack.c.h.bf16 %v6598_v1  ;;  %v11180_v14 = vsub.f32 %v11120_v39, %v11120_v39  ;;  %v11183_v21 = vsub.f32 %v593_v50, %v11139_v43 }
 0x1ce   :  { %7536 = vmatpush3.msra.mxu1 %v14344_v56  ;;  %14345 = vst [vmem:[#allocation31_spill] sm:$0xff] %v11167_v6  ;;  %14346 = vst [vmem:[#allocation38_spill] sm:$0xff] %v11171_v19  ;;  %7511 = vmatpush3.msra.mxu0 %v10996_v54  ;;  %v3450_v7 = vand.u32 4294901760, %v11146_v44  ;;  %v14348_v53 = vand.u32 4294901760, %v11100_v55  ;;  %v11193_v56 = vsub.f32 %v11135_v24, %v11135_v24  ;;  %v14349_v50 = vand.u32 4294901760, %v11117_v61 }
 0x1cf   :  { %7537 = vmatprep.subr.mxu1 %v3522_v38  ;;  %14347 = vst [vmem:[#allocation18_spill] sm:$0xff] %v11183_v21  ;;  %7512 = vmatprep.subr.mxu0 %v11046_v41  ;;  %v14350_v31 = vand.u32 4294901760, %v11129_v28  ;;  %v11218_v44 = vunpack.c.l.bf16 %v6590_v0  ;;  %v14351_v54 = vand.u32 4294901760, %v11151_v11 }
 0x1d0   :  { %7538 = vmatpush3.msra.mxu1 %v3426_v63  ;;  %v3551_v38 = vsub.f32 %v11100_v55, %v14348_v53  ;;  %v3455_v5 = vsub.f32 %v11117_v61, %v14349_v50  ;;  %v11199_v63 = vunpack.c.h.bf16 %v6590_v0  ;;  %v11204_v53 = vsub.f32 %v11137_v25, %v11137_v25  ;;  %7513 = vmatpush3.msra.mxu0 %v11061_v49 }
 0x1d1   :  { %7539 = vmatprep.subr.mxu1 %v3528_v37  ;;  %v3557_v41 = vsub.f32 %v11129_v28, %v14350_v31  ;;  %v11210_v37 = vunpack.c.l.bf16 %v6598_v1  ;;  %v11215_v50 = vsub.f32 %v11167_v6, %v11167_v6  ;;  %7514 = vmatprep.subr.mxu0 %v11068_v10  ;;  %v11224_v31 = vsub.f32 %v11174_v8, %v11174_v8 }
 0x1d2   :  { %7540 = vmatpush3.msra.mxu1 %v3432_v47  ;;  %7515 = vmatpush3.msra.mxu0 %v11083_v26  ;;  %v3552_v1 = vand.u32 4294901760, %v3551_v38  ;;  %v3461_v45 = vsub.f32 %v11151_v11, %v14351_v54  ;;  %v11233_v0 = vsub.f32 %v11176_v17, %v11176_v17  ;;  %v3456_v47 = vand.u32 4294901760, %v3455_v5 }
 0x1d3   :  { %7541 = vmatprep.subr.mxu1 %v3534_v60  ;;  %7516 = vmatprep.subr.mxu0 %v11103_v3  ;;  %v14352_v49 = vand.u32 4294901760, %v11161_v35  ;;  %v11242_v38 = vsub.f32 %v11199_v63, %v11199_v63  ;;  %v3558_v54 = vand.u32 4294901760, %v3557_v41  ;;  %v14353_v60 = vand.u32 4294901760, %v11171_v19 }
 0x1d4   :  { %7542 = vmatpush3.msra.mxu1 %v3438_v59  ;;  %7517 = vmatpush3.msra.mxu0 %v11120_v39  ;;  %v11251_v5 = vsub.f32 %v11210_v37, %v11210_v37  ;;  %v14359_v39 = vand.u32 4294901760, %v11204_v53 }
 0x1d5   :  { %7543 = vmatprep.subr.mxu1 %v3540_v36  ;;  %v3563_v26 = vsub.f32 %v11161_v35, %v14352_v49  ;;  %v3385_v3 = vsub.f32 %v11171_v19, %v14353_v60  ;;  %7518 = vmatprep.subr.mxu0 %v11135_v24  ;;  %v14355_v49 = vand.u32 4294901760, %v11180_v14  ;;  %v11263_v60 = vsub.f32 %v11218_v44, %v11218_v44 }
 0x1d6   :  { %7544 = vmatpush3.msra.mxu1 %v3444_v16  ;;  %14354 = vst [vmem:[#allocation37_spill] sm:$0xff] %v11251_v5  ;;  %v14356_v16 = vand.u32 4294901760, %v11183_v21  ;;  %7519 = vmatpush3.msra.mxu0 %v11137_v25  ;;  %v3462_v36 = vand.u32 4294901760, %v3461_v45 }
 0x1d7   :  { %7545 = vmatprep.subr.mxu1 %v3546_v20  ;;  %v3467_v59 = vsub.f32 %v11180_v14, %v14355_v49  ;;  %14357 = vst [vmem:[#allocation26_spill] sm:$0xff] %v11263_v60  ;;  %v14358_v20 = vand.u32 4294901760, %v11193_v56  ;;  %7520 = vmatprep.subr.mxu0 %v11167_v6  ;;  %v3386_v45 = vand.u32 4294901760, %v3385_v3  ;;  %v13653_v49 = vand.u32 4294901760, %v11251_v5 }
 0x1d8   :  { %v3391_v41 = vsub.f32 %v11183_v21, %v14356_v16  ;;  %7546 = vmatpush3.msra.mxu1 %v3450_v7  ;;  %v3564_v16 = vand.u32 4294901760, %v3563_v26  ;;  %v3473_v21 = vsub.f32 %v11204_v53, %v14359_v39  ;;  %7521 = vmatpush3.msra.mxu0 %v11174_v8  ;;  %v14360_v7 = vand.u32 4294901760, %v11215_v50 }
 0x1d9   :  { %v3569_v24 = vsub.f32 %v11193_v56, %v14358_v20  ;;  %7547 = vmatprep.subr.mxu1 %v3552_v1  ;;  %7522 = vmatprep.subr.mxu0 %v11176_v17  ;;  %v3468_v26 = vand.u32 4294901760, %v3467_v59  ;;  %v14361_v6 = vand.u32 4294901760, %v11224_v31  ;;  %v13652_v19 = vand.u32 4294901760, %v11263_v60 }
 0x1da   :  { %7548 = vmatpush3.msra.mxu1 %v3456_v47  ;;  %v3575_v20 = vsub.f32 %v11215_v50, %v14360_v7  ;;  %v3392_v1 = vand.u32 4294901760, %v3391_v41  ;;  %7523 = vmatpush3.msra.mxu0 %v11199_v63  ;;  %v14362_v47 = vand.u32 4294901760, %v11233_v0  ;;  %v14363_v59 = vand.u32 4294901760, %v11242_v38 }
 0x1db   :  { %7549 = vmatprep.subr.mxu1 %v3558_v54  ;;  %v3479_v39 = vsub.f32 %v11224_v31, %v14361_v6  ;;  %v3570_v3 = vand.u32 4294901760, %v3569_v24  ;;  %7524 = vmatprep.subr.mxu0 %v11210_v37  ;;  %v3474_v54 = vand.u32 4294901760, %v3473_v21  ;;  %v3587_v24 = vsub.f32 %v11251_v5, %v13653_v49  ;;  %v14381_v49 = vld [vmem:[#allocation38_spill] sm:$0xff] }
 0x1dc   :  { %7550 = vmatpush3.msra.mxu1 %v3462_v36  ;;  %v3581_v7 = vsub.f32 %v11233_v0, %v14362_v47  ;;  %v3485_v41 = vsub.f32 %v11242_v38, %v14363_v59  ;;  %7525 = vmatpush3.msra.mxu0 %v11218_v44  ;;  %v3576_v6 = vand.u32 4294901760, %v3575_v20  ;;  %v14367_v47 = vld [vmem:[#allocation22_spill] sm:$0xff]  ;;  %v14370_v59 = vld [vmem:[#allocation23_spill] sm:$0xff] }
 0x1dd   :  { %7551 = vmatprep.subr.mxu1 %v3564_v16  ;;  %3387 = vmatprep.mubr.f32.mxu0 %v3386_v45  ;;  %v3480_v36 = vand.u32 4294901760, %v3479_v39  ;;  %v3491_v16 = vsub.f32 %v11263_v60, %v13652_v19  ;;  %v3588_v20 = vand.u32 4294901760, %v3587_v24  ;;  %v14365_v39 = vld [vmem:[#allocation36_spill] sm:$0xff]  ;;  %v14373_v24 = vld [vmem:[#allocation14_spill] sm:$0xff] }
 0x1de   :  { %7552 = vmatpush3.msra.mxu1 %v3468_v26  ;;  %3393 = vmatmul.mubr.f32.vlgmr.msra.gmra.mxu0 %v3392_v1  ;;  %v3582_v21 = vand.u32 4294901760, %v3581_v7  ;;  %v3486_v45 = vand.u32 4294901760, %v3485_v41  ;;  %v14364_v1 = vld [vmem:[#allocation16_spill] sm:$0xff]  ;;  %v14371_v41 = vld [vmem:[#allocation17_spill] sm:$0xff] }
 0x1df   :  { %7553 = vmatprep.subr.mxu1 %v3570_v3  ;;  %7564 = vmatprep.subr.mxu0 %v10812_v27  ;;  %v3492_v26 = vand.u32 4294901760, %v3491_v16  ;;  %v14366_v3 = vld [vmem:[#allocation29_spill] sm:$0xff]  ;;  %v14368_v7 = vld [vmem:[#allocation24_spill] sm:$0xff]  ;;  %v14375_v16 = vld [vmem:[#allocation35_spill] sm:$0xff] }
 0x1e0   :  { %7554 = vmatpush3.msra.mxu1 %v3474_v54  ;;  %7565 = vmatpush3.msra.mxu0 %v10824_v34  ;;  %v14369_v54 = vld [vmem:[#allocation13_spill] sm:$0xff]  ;;  %v14380_v19 = vld [vmem:[#allocation28_spill] sm:$0xff] }
 0x1e1   :  { %7555 = vmatprep.subr.mxu1 %v3576_v6  ;;  %7566 = vmatprep.subr.mxu0 %v10852_v2  ;;  %v14372_v6 = vld [vmem:[#allocation25_spill] sm:$0xff] }
 0x1e2   :  { %7556 = vmatpush3.msra.mxu1 %v3480_v36  ;;  %7567 = vmatpush3.msra.mxu0 %v10861_v32  ;;  %v14374_v36 = vld [vmem:[#allocation15_spill] sm:$0xff] }
 0x1e3   :  { %7557 = vmatprep.subr.mxu1 %v3582_v21  ;;  %7568 = vmatprep.subr.mxu0 %v10875_v51  ;;  %v14376_v21 = vld [vmem:[#allocation30_spill] sm:$0xff] }
 0x1e4   :  { %7558 = vmatpush3.msra.mxu1 %v3486_v45  ;;  %7569 = vmatpush3.msra.mxu0 %v10879_v4  ;;  %v14377_v45 = vld [vmem:[#allocation21_spill] sm:$0xff] }
 0x1e5   :  { %7559 = vmatprep.subr.mxu1 %v3588_v20  ;;  %7570 = vmatprep.subr.mxu0 %v10888_v42  ;;  %v14378_v20 = vld [vmem:[#allocation27_spill] sm:$0xff] }
 0x1e6   :  { %7560 = vmatpush3.msra.mxu1 %v3492_v26  ;;  %3591 = vmatprep.mubr.f32.mxu1 %v11131_v62  ;;  %v14379_v26 = vld [vmem:[#allocation19_spill] sm:$0xff]  ;;  %v14383_v62 = vld [vmem:[#allocation18_spill] sm:$0xff] }
 0x1e7   :  { %7571 = vmatpush3.msra.mxu0 %v10892_v23  ;;  %3593 = vmatmul.mubr.f32.vlgmr.msra.gmra.mxu1 %v11139_v43  ;;  %v14382_v43 = vld [vmem:[#allocation33_spill] sm:$0xff] }
 0x1e8   :  { %7572 = vmatprep.subr.mxu0 %v10911_v29  ;;  %7599 = vmatprep.subr.mxu1 %v10794_v22 }
 0x1e9   :  { %7573 = vmatpush3.msra.mxu0 %v10921_v18  ;;  %7600 = vmatpush3.msra.mxu1 %v10802_v15 }
 0x1ea   :  { %7574 = vmatprep.subr.mxu0 %v10932_v52  ;;  %7601 = vmatprep.subr.mxu1 %v10820_v13 }
 0x1eb   :  { %7575 = vmatpush3.msra.mxu0 %v10947_v9  ;;  %7602 = vmatpush3.msra.mxu1 %v10829_v33 }
 0x1ec   :  { %7576 = vmatprep.subr.mxu0 %v10991_v12  ;;  %7603 = vmatprep.subr.mxu1 %v10834_v48 }
 0x1ed   :  { %7577 = vmatpush3.msra.mxu0 %v11001_v58  ;;  %7604 = vmatpush3.msra.mxu1 %v10836_v46 }
 0x1ee   :  { %7578 = vmatprep.subr.mxu0 %v11013_v40  ;;  %7605 = vmatprep.subr.mxu1 %v10842_v30 }
 0x1ef   :  { %7579 = vmatpush3.msra.mxu0 %v14364_v1  ;;  %7606 = vmatpush3.msra.mxu1 %v14365_v39 }
 0x1f0   :  { %7580 = vmatprep.subr.mxu0 %v14366_v3  ;;  %7607 = vmatprep.subr.mxu1 %v14367_v47 }
 0x1f1   :  { %7581 = vmatpush3.msra.mxu0 %v14368_v7  ;;  %7608 = vmatpush3.msra.mxu1 %v14369_v54 }
 0x1f2   :  { %7582 = vmatprep.subr.mxu0 %v11100_v55  ;;  %7609 = vmatprep.subr.mxu1 %v14370_v59 }
 0x1f3   :  { %7583 = vmatpush3.msra.mxu0 %v11117_v61  ;;  %7610 = vmatpush3.msra.mxu1 %v14371_v41 }
 0x1f4   :  { %7584 = vmatprep.subr.mxu0 %v11129_v28  ;;  %7611 = vmatprep.subr.mxu1 %v14372_v6 }
 0x1f5   :  { %7585 = vmatpush3.msra.mxu0 %v11151_v11  ;;  %7612 = vmatpush3.msra.mxu1 %v14373_v24 }
 0x1f6   :  { %7586 = vmatprep.subr.mxu0 %v11161_v35  ;;  %7613 = vmatprep.subr.mxu1 %v14374_v36 }
 0x1f7   :  { %7587 = vmatpush3.msra.mxu0 %v11180_v14  ;;  %7614 = vmatpush3.msra.mxu1 %v10958_v57 }
 0x1f8   :  { %7588 = vmatprep.subr.mxu0 %v11193_v56  ;;  %7615 = vmatprep.subr.mxu1 %v14375_v16 }
 0x1f9   :  { %7589 = vmatpush3.msra.mxu0 %v11204_v53  ;;  %7616 = vmatpush3.msra.mxu1 %v14376_v21 }
 0x1fa   :  { %7590 = vmatprep.subr.mxu0 %v11215_v50  ;;  %7617 = vmatprep.subr.mxu1 %v14377_v45 }
 0x1fb   :  { %7591 = vmatpush3.msra.mxu0 %v11224_v31  ;;  %7618 = vmatpush3.msra.mxu1 %v14378_v20  ;;  %v14384_v20 = vld [vmem:[#allocation32_spill] sm:$0xff] }
 0x1fc   :  { %7592 = vmatprep.subr.mxu0 %v11233_v0  ;;  %7619 = vmatprep.subr.mxu1 %v11068_v10  ;;  %v14385_v10 = vand.u32 4294901760, %v10812_v27  ;;  %v14390_v27 = vand.u32 4294901760, %v10875_v51  ;;  %v14395_v51 = vand.u32 4294901760, %v14383_v62 }
 0x1fd   :  { %7593 = vmatpush3.msra.mxu0 %v11242_v38  ;;  %7620 = vmatpush3.msra.mxu1 %v14379_v26  ;;  %v14386_v26 = vand.u32 4294901760, %v10824_v34  ;;  %v14391_v34 = vand.u32 4294901760, %v10879_v4  ;;  %v14397_v4 = vand.u32 4294901760, %v10921_v18  ;;  %v14401_v18 = vand.u32 4294901760, %v11001_v58 }
 0x1fe   :  { %7594 = vmatprep.subr.mxu0 %v11251_v5  ;;  %7621 = vmatprep.subr.mxu1 %v14380_v19  ;;  %v14387_v5 = vld [vmem:[#allocation31_spill] sm:$0xff]  ;;  %v14406_v58 = vand.u32 4294901760, %v11100_v55 }
 0x1ff   :  { %7595 = vmatpush3.msra.mxu0 %v11263_v60  ;;  %3696 = vmatprep.mubr.f32.mxu0 %v14381_v49  ;;  %v14388_v60 = vand.u32 4294901760, %v10852_v2  ;;  %v14392_v2 = vand.u32 4294901760, %v10888_v42  ;;  %v14398_v42 = vand.u32 4294901760, %v10932_v52 }
 0x200   :  { %7622 = vmatpush3.msra.mxu1 %v14382_v43  ;;  %3699 = vmatmul.mubr.f32.vlgmr.msra.gmra.mxu0 %v14383_v62  ;;  %v14389_v43 = vand.u32 4294901760, %v10861_v32  ;;  %v14393_v32 = vand.u32 4294901760, %v14381_v49 }
 0x201   :  { %7623 = vmatprep.subr.mxu1 %v14384_v20  ;;  %7634 = vmatprep.subr.mxu0 %v14385_v10  ;;  %v14394_v10 = vand.u32 4294901760, %v10892_v23  ;;  %v6621_v23 = vld [vmem:[#allocation5 + $0x2f8] sm:$0xff]  }
 0x202   :  { %7624 = vmatpush3.msra.mxu1 %v11137_v25  ;;  %7635 = vmatpush3.msra.mxu0 %v14386_v26  ;;  %v11432_v62 = vunpack.c.l.bf16 %v6621_v23 }
 0x203   :  { %7625 = vmatprep.subr.mxu1 %v14387_v5  ;;  %7636 = vmatprep.subr.mxu0 %v14388_v60  ;;  %v14399_v60 = vand.u32 4294901760, %v10947_v9  ;;  %v6620_v9 = vld [vmem:[#allocation5 + $0x2f0] sm:$0xff]  }
 0x204   :  { %7626 = vmatpush3.msra.mxu1 %v11174_v8  ;;  %7637 = vmatpush3.msra.mxu0 %v14389_v43  ;;  %v14396_v43 = vand.u32 4294901760, %v10911_v29  ;;  %v14400_v29 = vand.u32 4294901760, %v10991_v12  ;;  %v6612_v12 = vld [vmem:[#allocation5 + $0x2b0] sm:$0xff]  }
 0x205   :  { %7627 = vmatprep.subr.mxu1 %v11176_v17  ;;  %7638 = vmatprep.subr.mxu0 %v14390_v27 }
 0x206   :  { %7628 = vmatpush3.msra.mxu1 %v11199_v63  ;;  %7639 = vmatpush3.msra.mxu0 %v14391_v34 }
 0x207   :  { %7629 = vmatprep.subr.mxu1 %v11210_v37  ;;  %7640 = vmatprep.subr.mxu0 %v14392_v2 }
 0x208   :  { %7630 = vmatpush3.msra.mxu1 %v11218_v44  ;;  %3771 = vmatprep.mubr.f32.mxu1 %v14393_v32  ;;  %v14419_v32 = vand.u32 4294901760, %v11224_v31 }
 0x209   :  { %7641 = vmatpush3.msra.mxu0 %v14394_v10  ;;  %3775 = vmatmul.mubr.f32.vlgmr.msra.gmra.mxu1 %v14395_v51  ;;  %v14420_v10 = vld [vmem:[#allocation27_spill] sm:$0xff] }
 0x20a   :  { %7642 = vmatprep.subr.mxu0 %v14396_v43  ;;  %7669 = vmatprep.subr.mxu1 %v10794_v22  ;;  %v6613_v22 = vld [vmem:[#allocation5 + $0x2b8] sm:$0xff]   ;;  %v6618_v43 = vld [vmem:[#allocation5 + $0x2e0] sm:$0xff]  }
 0x20b   :  { %7643 = vmatpush3.msra.mxu0 %v14397_v4  ;;  %7670 = vmatpush3.msra.mxu1 %v10802_v15  ;;  %v11406_v15 = vunpack.c.h.bf16 %v6621_v23  ;;  %v11414_v52 = vunpack.c.h.bf16 %v6613_v22  ;;  %v11441_v55 = vunpack.c.l.bf16 %v6613_v22  ;;  %v14422_v4 = vand.u32 4294901760, %v11233_v0  ;;  %v6610_v23 = vld [vmem:[#allocation5 + $0x2a0] sm:$0xff]  }
 0x20c   :  { %7644 = vmatprep.subr.mxu0 %v14398_v42  ;;  %7671 = vmatprep.subr.mxu1 %v10820_v13  ;;  %v14402_v13 = vand.u32 4294901760, %v11013_v40  ;;  %v14407_v40 = vand.u32 4294901760, %v11117_v61  ;;  %v11446_v61 = vunpack.c.h.bf16 %v6620_v9  ;;  %v14423_v42 = vld [vmem:[#allocation39_spill] sm:$0xff] }
 0x20d   :  { %7645 = vmatpush3.msra.mxu0 %v14399_v60  ;;  %7672 = vmatpush3.msra.mxu1 %v10829_v33  ;;  %v14403_v33 = vand.u32 4294901760, %v14364_v1  ;;  %v11436_v49 = vsub.f32 %v11414_v52, %v11414_v52  ;;  %v14408_v1 = vand.u32 4294901760, %v11129_v28  ;;  %v11454_v28 = vunpack.c.l.bf16 %v6620_v9  ;;  %v14425_v22 = vld [vmem:[#allocation19_spill] sm:$0xff] }
 0x20e   :  { %7646 = vmatprep.subr.mxu0 %v14400_v29  ;;  %7673 = vmatprep.subr.mxu1 %v10834_v48  ;;  %v14404_v48 = vand.u32 4294901760, %v14366_v3  ;;  %v11448_v3 = vunpack.c.h.bf16 %v6612_v12  ;;  %v11473_v26 = vsub.f32 %v11441_v55, %v11441_v55  ;;  %v14424_v29 = vand.u32 4294901760, %v11242_v38 }
 0x20f   :  { %7647 = vmatpush3.msra.mxu0 %v14401_v18  ;;  %7674 = vmatpush3.msra.mxu1 %v10836_v46  ;;  %v14405_v46 = vand.u32 4294901760, %v14368_v7  ;;  %v11500_v34 = vsub.f32 %v11454_v28, %v11454_v28 }
 0x210   :  { %7648 = vmatprep.subr.mxu0 %v14402_v13  ;;  %7675 = vmatprep.subr.mxu1 %v10842_v30  ;;  %v11424_v30 = vsub.f32 %v11406_v15, %v11406_v15  ;;  %v11491_v27 = vsub.f32 %v11448_v3, %v11448_v3  ;;  %v13666_v31 = vand.u32 4294901760, %v11473_v26 }
 0x211   :  { %7649 = vmatpush3.msra.mxu0 %v14403_v33  ;;  %7676 = vmatpush3.msra.mxu1 %v14365_v39  ;;  %v14409_v39 = vand.u32 4294901760, %v11151_v11  ;;  %v6611_v11 = vld [vmem:[#allocation5 + $0x2a8] sm:$0xff]   ;;  %v13662_v38 = vand.u32 4294901760, %v11500_v34 }
 0x212   :  { %7650 = vmatprep.subr.mxu0 %v14404_v48  ;;  %7677 = vmatprep.subr.mxu1 %v14367_v47  ;;  %v6619_v47 = vld [vmem:[#allocation5 + $0x2e8] sm:$0xff]   ;;  %v13670_v7 = vand.u32 4294901760, %v11424_v30  ;;  %v11515_v51 = vunpack.c.l.bf16 %v6611_v11  ;;  %v13663_v0 = vand.u32 4294901760, %v11491_v27  ;;  %v14426_v48 = vld [vmem:[#allocation37_spill] sm:$0xff] }
 0x213   :  { %7651 = vmatpush3.msra.mxu0 %v14405_v46  ;;  %7678 = vmatpush3.msra.mxu1 %v14369_v54  ;;  %v14410_v54 = vand.u32 4294901760, %v11161_v35  ;;  %v14413_v35 = vand.u32 4294901760, %v11193_v56  ;;  %v11483_v56 = vunpack.c.h.bf16 %v6611_v11  ;;  %v14427_v46 = vand.u32 4294901760, %v14426_v48 }
 0x214   :  { %7652 = vmatprep.subr.mxu0 %v14406_v58  ;;  %7679 = vmatprep.subr.mxu1 %v14370_v59  ;;  %v11456_v59 = vunpack.c.l.bf16 %v6612_v12  ;;  %14421 = vst [vmem:[#allocation24_spill] sm:$0xff] %v11515_v51  ;;  %v11538_v58 = vunpack.c.h.bf16 %v6618_v43  ;;  %v6617_v12 = vld [vmem:[#allocation5 + $0x2d8] sm:$0xff]   ;;  %v11555_v11 = vunpack.c.h.bf16 %v6610_v23 }
 0x215   :  { %7653 = vmatpush3.msra.mxu0 %v14407_v40  ;;  %7680 = vmatpush3.msra.mxu1 %v14371_v41  ;;  %v14412_v41 = vand.u32 4294901760, %v11180_v14  ;;  %v14415_v14 = vand.u32 4294901760, %v11204_v53  ;;  %14416 = vst [vmem:[#allocation29_spill] sm:$0xff] %v11483_v56  ;;  %v14417_v53 = vand.u32 4294901760, %v11215_v50  ;;  %v11533_v33 = vsub.f32 %v11483_v56, %v11483_v56 }
 0x216   :  { %7654 = vmatprep.subr.mxu0 %v14408_v1  ;;  %7681 = vmatprep.subr.mxu1 %v14372_v6  ;;  %14411 = vst [vmem:[#allocation16_spill] sm:$0xff] %v11456_v59  ;;  %v13669_v6 = vand.u32 4294901760, %v11436_v49  ;;  %v11504_v2 = vsub.f32 %v11456_v59, %v11456_v59  ;;  %14428 = vst [vmem:[#allocation13_spill] sm:$0xff] %v11538_v58  ;;  %v14429_v1 = vld [vmem:[#allocation26_spill] sm:$0xff] }
 0x217   :  { %7655 = vmatpush3.msra.mxu0 %v14409_v39  ;;  %7682 = vmatpush3.msra.mxu1 %v14373_v24  ;;  %v11464_v24 = vsub.f32 %v11432_v62, %v11432_v62  ;;  %v14430_v39 = vand.u32 4294901760, %v14429_v1  ;;  %14432 = vst [vmem:[#allocation23_spill] sm:$0xff] %v11555_v11  ;;  %v11603_v1 = vsub.f32 %v11538_v58, %v11538_v58 }
 0x218   :  { %7656 = vmatprep.subr.mxu0 %v14410_v54  ;;  %7683 = vmatprep.subr.mxu1 %v14374_v36  ;;  %v11469_v36 = vunpack.c.h.bf16 %v6619_v47  ;;  %v11512_v50 = vsub.f32 %v11436_v49, %v13669_v6  ;;  %v13661_v9 = vand.u32 4294901760, %v11504_v2  ;;  %v6608_v6 = vld [vmem:[#allocation5 + $0x290] sm:$0xff]   ;;  %v14444_v54 = vld [vmem:[#allocation11_spill] sm:$0xff] }
 0x219   :  { %7657 = vmatpush3.msra.mxu0 %v14412_v41  ;;  %7684 = vmatpush3.msra.mxu1 %v10958_v57  ;;  %v11481_v57 = vsub.f32 %v11424_v30, %v13670_v7  ;;  %v11559_v41 = vsub.f32 %v11515_v51, %v11515_v51 }
 0x21a   :  { %7658 = vmatprep.subr.mxu0 %v14413_v35  ;;  %7685 = vmatprep.subr.mxu1 %v14375_v16  ;;  %14414 = vst [vmem:[#allocation36_spill] sm:$0xff] %v11469_v36  ;;  %v11487_v16 = vsub.f32 %v11446_v61, %v11446_v61  ;;  %v11523_v60 = vsub.f32 %v11469_v36, %v11469_v36  ;;  %v14433_v35 = vld [vmem:[#allocation33_spill] sm:$0xff] }
 0x21b   :  { %7659 = vmatpush3.msra.mxu0 %v14415_v14  ;;  %7686 = vmatpush3.msra.mxu1 %v14376_v21  ;;  %v11496_v21 = vunpack.c.l.bf16 %v6619_v47  ;;  %v4168_v18 = vand.u32 4294901760, %v11481_v57  ;;  %v14431_v47 = vld [vmem:[#allocation34_spill] sm:$0xff]  ;;  %v14434_v14 = vld [vmem:[#allocation20_spill] sm:$0xff]  ;;  %v11598_v48 = vsub.f32 %v11504_v2, %v13661_v9  ;;  %v11613_v9 = vsub.f32 %v11555_v11, %v11555_v11 }
 0x21c   :  { %7660 = vmatprep.subr.mxu0 %v14417_v53  ;;  %7687 = vmatprep.subr.mxu1 %v14377_v45  ;;  %v13668_v45 = vand.u32 4294901760, %v11464_v24  ;;  %v13665_v13 = vand.u32 4294901760, %v11487_v16  ;;  %v11566_v53 = vsub.f32 %v11473_v26, %v13666_v31 }
 0x21d   :  { %14418 = vst [vmem:[#allocation22_spill] sm:$0xff] %v11496_v21  ;;  %7661 = vmatpush3.msra.mxu0 %v14419_v32  ;;  %7688 = vmatpush3.msra.mxu1 %v14420_v10  ;;  %v11544_v40 = vsub.f32 %v11496_v21, %v11496_v21  ;;  %v11568_v32 = vunpack.c.l.bf16 %v6618_v43  ;;  %v11570_v10 = vunpack.c.l.bf16 %v6610_v23  ;;  %v11585_v43 = vunpack.c.h.bf16 %v6617_v12 }
 0x21e   :  { %7662 = vmatprep.subr.mxu0 %v14422_v4  ;;  %7689 = vmatprep.subr.mxu1 %v14423_v42  ;;  %v13664_v4 = vand.u32 4294901760, %v11523_v60  ;;  %v6609_v42 = vld [vmem:[#allocation5 + $0x298] sm:$0xff]   ;;  %v13667_v23 = vand.u32 4294901760, %v11533_v33 }
 0x21f   :  { %7663 = vmatpush3.msra.mxu0 %v14424_v29  ;;  %7690 = vmatpush3.msra.mxu1 %v14425_v22  ;;  %14435 = vst [vmem:[#allocation17_spill] sm:$0xff] %v11568_v32  ;;  %v11578_v29 = vsub.f32 %v11487_v16, %v13665_v13  ;;  %v11583_v22 = vsub.f32 %v11491_v27, %v13663_v0  ;;  %14436 = vst [vmem:[#allocation25_spill] sm:$0xff] %v11585_v43 }
 0x220   :  { %7664 = vmatprep.subr.mxu0 %v14427_v46  ;;  %7691 = vmatprep.subr.mxu1 %v14380_v19  ;;  %v11553_v19 = vsub.f32 %v11464_v24, %v13668_v45  ;;  %v13671_v46 = vand.u32 4294901760, %v11544_v40  ;;  %v11629_v0 = vsub.f32 %v11570_v10, %v11570_v10  ;;  %v11642_v13 = vsub.f32 %v11585_v43, %v11585_v43 }
 0x221   :  { %7665 = vmatpush3.msra.mxu0 %v14430_v39  ;;  %3909 = vmatprep.mubr.f32.mxu0 %v14431_v47  ;;  %v11608_v39 = vunpack.c.h.bf16 %v6609_v42  ;;  %v11656_v45 = vunpack.c.l.bf16 %v6617_v12  ;;  %v11671_v12 = vunpack.c.l.bf16 %v6609_v42 }
 0x222   :  { %7692 = vmatpush3.msra.mxu1 %v14433_v35  ;;  %3911 = vmatmul.mubr.f32.vlgmr.msra.gmra.mxu0 %v14434_v14  ;;  %v13672_v35 = vand.u32 4294901760, %v11559_v41  ;;  %14438 = vst [vmem:[#allocation15_spill] sm:$0xff] %v11629_v0  ;;  %14439 = vst [vmem:[#allocation35_spill] sm:$0xff] %v11642_v13 }
 0x223   :  { %7693 = vmatprep.subr.mxu1 %v14384_v20  ;;  %7704 = vmatprep.subr.mxu0 %v11406_v15  ;;  %v11593_v20 = vsub.f32 %v11500_v34, %v13662_v38  ;;  %14437 = vst [vmem:[#allocation14_spill] sm:$0xff] %v11608_v39  ;;  %v4078_v38 = vand.u32 4294901760, %v11566_v53  ;;  %v4084_v53 = vand.u32 4294901760, %v11583_v22  ;;  %v6616_v22 = vld [vmem:[#allocation5 + $0x2d0] sm:$0xff]   ;;  %14440 = vst [vmem:[#allocation30_spill] sm:$0xff] %v11656_v45 }
 0x224   :  { %7694 = vmatpush3.msra.mxu1 %v11137_v25  ;;  %7705 = vmatpush3.msra.mxu0 %v11414_v52  ;;  %v4174_v25 = vand.u32 4294901760, %v11553_v19  ;;  %v11625_v19 = vsub.f32 %v11568_v32, %v11568_v32  ;;  %14442 = vst [vmem:[#allocation28_spill] sm:$0xff] %v11671_v12  ;;  %v11678_v7 = vunpack.c.h.bf16 %v6616_v22 }
 0x225   :  { %7695 = vmatprep.subr.mxu1 %v14387_v5  ;;  %7706 = vmatprep.subr.mxu0 %v11432_v62  ;;  %v11621_v5 = vsub.f32 %v11523_v60, %v13664_v4  ;;  %v11638_v4 = vsub.f32 %v11533_v33, %v13667_v23  ;;  %v14446_v23 = vld [vmem:[#allocation12_spill] sm:$0xff] }
 0x226   :  { %7696 = vmatpush3.msra.mxu1 %v11174_v8  ;;  %7707 = vmatpush3.msra.mxu0 %v11441_v55  ;;  %v4180_v8 = vand.u32 4294901760, %v11578_v29  ;;  %v11651_v29 = vsub.f32 %v11544_v40, %v13671_v46  ;;  %v11666_v46 = vsub.f32 %v11608_v39, %v11608_v39  ;;  %14443 = vst [vmem:[#allocation38_spill] sm:$0xff] %v11678_v7 }
 0x227   :  { %7697 = vmatprep.subr.mxu1 %v11176_v17  ;;  %7708 = vmatprep.subr.mxu0 %v11446_v61  ;;  %v4096_v17 = vand.u32 4294901760, %v11638_v4  ;;  %v11693_v4 = vunpack.c.h.bf16 %v6608_v6 }
 0x228   :  { %7698 = vmatpush3.msra.mxu1 %v11199_v63  ;;  %7709 = vmatpush3.msra.mxu0 %v11448_v3  ;;  %v11661_v63 = vsub.f32 %v11559_v41, %v13672_v35  ;;  %14441 = vst [vmem:[#allocation21_spill] sm:$0xff] %v11666_v46  ;;  %v4198_v42 = vand.u32 4294901760, %v11651_v29  ;;  %v14447_v35 = vand.u32 4294901760, %v11603_v1 }
 0x229   :  { %7699 = vmatprep.subr.mxu1 %v11210_v37  ;;  %7710 = vmatprep.subr.mxu0 %v11454_v28  ;;  %v4192_v37 = vand.u32 4294901760, %v11621_v5  ;;  %14448 = vst [vmem:[#allocation18_spill] sm:$0xff] %v11693_v4 }
 0x22a   :  { %7700 = vmatpush3.msra.mxu1 %v11218_v44  ;;  %3981 = vmatprep.mubr.f32.mxu1 %v14431_v47  ;;  %v14445_v47 = vsub.s32 3, %v14444_v54  ;;  %v14449_v44 = vsub.s32 2, %v14444_v54  ;;  %v4102_v57 = vand.u32 4294901760, %v11661_v63  ;;  %v11710_v54 = vsub.f32 %v11656_v45, %v11656_v45 }
 0x22b   :  { %7711 = vmatpush3.msra.mxu0 %v11456_v59  ;;  %3983 = vmatmul.mubr.f32.vlgmr.msra.gmra.mxu1 %v14434_v14  ;;  %v11691_v14 = vsub.f32 %v11603_v1, %v14447_v35  ;;  %v6615_v35 = vld [vmem:[#allocation5 + $0x2c8] sm:$0xff]  }
 0x22c   :  { %v605_v5 = vrot.slane %v14446_v23, %v14445_v47  ;;  %7712 = vmatprep.subr.mxu0 %v11469_v36  ;;  %7739 = vmatprep.subr.mxu1 %v4168_v18  ;;  %v601_v31 = vrot.slane %v14446_v23, %v14449_v44  ;;  %v14450_v47 = vand.u32 4294901760, %v11512_v50  ;;  %v14451_v18 = vand.u32 4294901760, %v11613_v9  ;;  %v6607_v36 = vld [vmem:[#allocation5 + $0x288] sm:$0xff]  }
 0x22d   :  { %7713 = vmatpush3.msra.mxu0 %v11483_v56  ;;  %v11713_v50 = vunpack.c.l.bf16 %v6616_v22  ;;  %v14453_v23 = vand.u32 4294901760, %v11625_v19  ;;  %v14454_v44 = vand.u32 4294901760, %v11629_v0  ;;  %v14456_v22 = vand.u32 4294901760, %v11642_v13 }
 0x22e   :  { %7740 = vmatpush3.msra.mxu1 %v14450_v47  ;;  %v11705_v29 = vsub.f32 %v11613_v9, %v14451_v18  ;;  %7714 = vmatprep.subr.mxu0 %v11496_v21  ;;  %v11727_v18 = vsub.f32 %v11671_v12, %v11671_v12  ;;  %v4204_v21 = vand.u32 4294901760, %v11691_v14  ;;  %v14460_v56 = vand.u32 4294901760, %v11666_v46 }
 0x22f   :  { %7741 = vmatprep.subr.mxu1 %v4174_v25  ;;  %14452 = vst [vmem:[#allocation32_spill] sm:$0xff] %v11713_v50  ;;  %v11718_v63 = vsub.f32 %v11625_v19, %v14453_v23  ;;  %v11723_v47 = vsub.f32 %v11629_v0, %v14454_v44  ;;  %7715 = vmatpush3.msra.mxu0 %v11515_v51  ;;  %v11730_v25 = vunpack.c.l.bf16 %v6608_v6  ;;  %v11741_v44 = vand.u32 4294901760, %v605_v5 }
 0x230   :  { %7742 = vmatpush3.msra.mxu1 %v4078_v38  ;;  %v11735_v59 = vsub.f32 %v11642_v13, %v14456_v22  ;;  %v11739_v23 = vsub.f32 %v11678_v7, %v11678_v7  ;;  %7716 = vmatprep.subr.mxu0 %v11538_v58  ;;  %v11745_v51 = vunpack.c.h.bf16 %v6615_v35  ;;  %v11747_v6 = vunpack.c.h.bf16 %v6607_v36  ;;  %v6614_v58 = vld [vmem:[#allocation5 + $0x2c0] sm:$0xff]  }
 0x231   :  { %14455 = vst [vmem:[#allocation31_spill] sm:$0xff] %v11730_v25  ;;  %14457 = vst [vmem:[#allocation27_spill] sm:$0xff] %v11741_v44  ;;  %7743 = vmatprep.subr.mxu1 %v4180_v8  ;;  %v11749_v38 = vand.u32 4294901760, %v601_v31  ;;  %7717 = vmatpush3.msra.mxu0 %v11555_v11  ;;  %v4108_v22 = vand.u32 4294901760, %v11705_v29  ;;  %v11756_v13 = vsub.f32 %v11666_v46, %v14460_v56  ;;  %v14461_v0 = vand.u32 4294901760, %v11593_v20  ;;  %v6606_v20 = vld [vmem:[#allocation5 + $0x280] sm:$0xff]  }
 0x232   :  { %14458 = vst [vmem:[#allocation39_spill] sm:$0xff] %v11745_v51  ;;  %7744 = vmatpush3.msra.mxu1 %v4084_v53  ;;  %v11761_v14 = vsub.f32 %v11693_v4, %v11693_v4  ;;  %7718 = vmatprep.subr.mxu0 %v11568_v32  ;;  %v4210_v53 = vand.u32 4294901760, %v11718_v63  ;;  %v4114_v29 = vand.u32 4294901760, %v11723_v47  ;;  %v11771_v56 = vsub.f32 %v11713_v50, %v11713_v50 }
 0x233   :  { %14459 = vst [vmem:[#allocation19_spill] sm:$0xff] %v11749_v38  ;;  %7745 = vmatprep.subr.mxu1 %v14461_v0  ;;  %7719 = vmatpush3.msra.mxu0 %v11570_v10  ;;  %v14462_v8 = vand.u32 4294901760, %v11598_v48  ;;  %v4216_v32 = vand.u32 4294901760, %v11735_v59  ;;  %v11777_v46 = vunpack.c.l.bf16 %v6615_v35  ;;  %v11781_v63 = vsub.f32 %v605_v5, %v11741_v44 }
 0x234   :  { %7720 = vmatprep.subr.mxu0 %v11585_v43  ;;  %v11784_v47 = vunpack.c.l.bf16 %v6607_v36  ;;  %v11786_v11 = vunpack.c.h.bf16 %v6614_v58  ;;  %v11790_v48 = vsub.f32 %v11730_v25, %v11730_v25  ;;  %v11793_v59 = vsub.f32 %v601_v31, %v11749_v38  ;;  %4261 = vmatprep.mubr.f32.mxu1 %v11741_v44 }
 0x235   :  { %7746 = vmatpush3.msra.mxu1 %v14462_v8  ;;  %14463 = vst [vmem:[#allocation37_spill] sm:$0xff] %v11777_v46  ;;  %14464 = vst [vmem:[#allocation26_spill] sm:$0xff] %v11781_v63  ;;  %7721 = vmatpush3.msra.mxu0 %v11608_v39  ;;  %v4120_v5 = vand.u32 4294901760, %v11756_v13  ;;  %v14466_v35 = vand.u32 4294901760, %v11710_v54  ;;  %v11803_v8 = vsub.f32 %v11745_v51, %v11745_v51  ;;  %v14467_v31 = vand.u32 4294901760, %v11727_v18 }
 0x236   :  { %7747 = vmatprep.subr.mxu1 %v4192_v37  ;;  %14465 = vst [vmem:[#allocation34_spill] sm:$0xff] %v11793_v59  ;;  %7722 = vmatprep.subr.mxu0 %v11656_v45  ;;  %v14468_v36 = vand.u32 4294901760, %v11739_v23  ;;  %v11828_v13 = vunpack.c.l.bf16 %v6606_v20  ;;  %v14469_v39 = vand.u32 4294901760, %v11761_v14 }
 0x237   :  { %7748 = vmatpush3.msra.mxu1 %v4096_v17  ;;  %v4221_v37 = vsub.f32 %v11710_v54, %v14466_v35  ;;  %v4125_v0 = vsub.f32 %v11727_v18, %v14467_v31  ;;  %v11809_v17 = vunpack.c.h.bf16 %v6606_v20  ;;  %v11814_v35 = vsub.f32 %v11747_v6, %v11747_v6  ;;  %7723 = vmatpush3.msra.mxu0 %v11671_v12 }
 0x238   :  { %7749 = vmatprep.subr.mxu1 %v4198_v42  ;;  %v4227_v45 = vsub.f32 %v11739_v23, %v14468_v36  ;;  %v11820_v42 = vunpack.c.l.bf16 %v6614_v58  ;;  %v11825_v31 = vsub.f32 %v11777_v46, %v11777_v46  ;;  %7724 = vmatprep.subr.mxu0 %v11678_v7  ;;  %v11834_v36 = vsub.f32 %v11784_v47, %v11784_v47 }
 0x239   :  { %7750 = vmatpush3.msra.mxu1 %v4102_v57  ;;  %7725 = vmatpush3.msra.mxu0 %v11693_v4  ;;  %v4222_v58 = vand.u32 4294901760, %v4221_v37  ;;  %v4131_v43 = vsub.f32 %v11761_v14, %v14469_v39  ;;  %v11843_v20 = vsub.f32 %v11786_v11, %v11786_v11  ;;  %v4126_v57 = vand.u32 4294901760, %v4125_v0 }
 0x23a   :  { %7751 = vmatprep.subr.mxu1 %v4204_v21  ;;  %7726 = vmatprep.subr.mxu0 %v11713_v50  ;;  %v14470_v12 = vand.u32 4294901760, %v11771_v56  ;;  %v11852_v37 = vsub.f32 %v11809_v17, %v11809_v17  ;;  %v4228_v39 = vand.u32 4294901760, %v4227_v45  ;;  %v14471_v21 = vand.u32 4294901760, %v11781_v63 }
 0x23b   :  { %7752 = vmatpush3.msra.mxu1 %v4108_v22  ;;  %7727 = vmatpush3.msra.mxu0 %v11730_v25  ;;  %v11861_v0 = vsub.f32 %v11820_v42, %v11820_v42  ;;  %v14477_v25 = vand.u32 4294901760, %v11814_v35 }
 0x23c   :  { %7753 = vmatprep.subr.mxu1 %v4210_v53  ;;  %v4233_v4 = vsub.f32 %v11771_v56, %v14470_v12  ;;  %v4055_v50 = vsub.f32 %v11781_v63, %v14471_v21  ;;  %7728 = vmatprep.subr.mxu0 %v11745_v51  ;;  %v14473_v12 = vand.u32 4294901760, %v11790_v48  ;;  %v11873_v21 = vsub.f32 %v11828_v13, %v11828_v13 }
 0x23d   :  { %7754 = vmatpush3.msra.mxu1 %v4114_v29  ;;  %14472 = vst [vmem:[#allocation33_spill] sm:$0xff] %v11861_v0  ;;  %v14474_v29 = vand.u32 4294901760, %v11793_v59  ;;  %7729 = vmatpush3.msra.mxu0 %v11747_v6  ;;  %v4132_v53 = vand.u32 4294901760, %v4131_v43  ;;  %v14501_v44 = vld [vmem:[#allocation34_spill] sm:$0xff] }
 0x23e   :  { %7755 = vmatprep.subr.mxu1 %v4216_v32  ;;  %v4137_v22 = vsub.f32 %v11790_v48, %v14473_v12  ;;  %14475 = vst [vmem:[#allocation20_spill] sm:$0xff] %v11873_v21  ;;  %v14476_v32 = vand.u32 4294901760, %v11803_v8  ;;  %7730 = vmatprep.subr.mxu0 %v11777_v46  ;;  %v4056_v43 = vand.u32 4294901760, %v4055_v50  ;;  %v13719_v12 = vand.u32 4294901760, %v11861_v0 }
 0x23f   :  { %v4061_v45 = vsub.f32 %v11793_v59, %v14474_v29  ;;  %7756 = vmatpush3.msra.mxu1 %v4120_v5  ;;  %v4234_v29 = vand.u32 4294901760, %v4233_v4  ;;  %v4143_v59 = vsub.f32 %v11814_v35, %v14477_v25  ;;  %7731 = vmatpush3.msra.mxu0 %v11784_v47  ;;  %v14478_v5 = vand.u32 4294901760, %v11825_v31 }
 0x240   :  { %v4239_v51 = vsub.f32 %v11803_v8, %v14476_v32  ;;  %7757 = vmatprep.subr.mxu1 %v4222_v58  ;;  %7732 = vmatprep.subr.mxu0 %v11786_v11  ;;  %v4138_v4 = vand.u32 4294901760, %v4137_v22  ;;  %v14479_v46 = vand.u32 4294901760, %v11834_v36  ;;  %v13718_v63 = vand.u32 4294901760, %v11873_v21 }
 0x241   :  { %7758 = vmatpush3.msra.mxu1 %v4126_v57  ;;  %v4245_v32 = vsub.f32 %v11825_v31, %v14478_v5  ;;  %v4062_v58 = vand.u32 4294901760, %v4061_v45  ;;  %7733 = vmatpush3.msra.mxu0 %v11809_v17  ;;  %v14480_v57 = vand.u32 4294901760, %v11843_v20  ;;  %v14481_v22 = vand.u32 4294901760, %v11852_v37 }
 0x242   :  { %7759 = vmatprep.subr.mxu1 %v4228_v39  ;;  %v4149_v25 = vsub.f32 %v11834_v36, %v14479_v46  ;;  %v4240_v50 = vand.u32 4294901760, %v4239_v51  ;;  %7734 = vmatprep.subr.mxu0 %v11820_v42  ;;  %v4144_v39 = vand.u32 4294901760, %v4143_v59  ;;  %v4257_v51 = vsub.f32 %v11861_v0, %v13719_v12  ;;  %v14499_v12 = vld [vmem:[#allocation26_spill] sm:$0xff] }
 0x243   :  { %7760 = vmatpush3.msra.mxu1 %v4132_v53  ;;  %v4251_v5 = vsub.f32 %v11843_v20, %v14480_v57  ;;  %v4155_v45 = vsub.f32 %v11852_v37, %v14481_v22  ;;  %7735 = vmatpush3.msra.mxu0 %v11828_v13  ;;  %v4246_v46 = vand.u32 4294901760, %v4245_v32  ;;  %v14485_v57 = vld [vmem:[#allocation36_spill] sm:$0xff]  ;;  %v14488_v22 = vld [vmem:[#allocation22_spill] sm:$0xff] }
 0x244   :  { %7761 = vmatprep.subr.mxu1 %v4234_v29  ;;  %4057 = vmatprep.mubr.f32.mxu0 %v4056_v43  ;;  %v4150_v53 = vand.u32 4294901760, %v4149_v25  ;;  %v4161_v29 = vsub.f32 %v11873_v21, %v13718_v63  ;;  %v4258_v32 = vand.u32 4294901760, %v4257_v51  ;;  %v14483_v25 = vld [vmem:[#allocation16_spill] sm:$0xff]  ;;  %v14491_v51 = vld [vmem:[#allocation23_spill] sm:$0xff] }
 0x245   :  { %7762 = vmatpush3.msra.mxu1 %v4138_v4  ;;  %4063 = vmatmul.mubr.f32.vlgmr.msra.gmra.mxu0 %v4062_v58  ;;  %v4252_v59 = vand.u32 4294901760, %v4251_v5  ;;  %v4156_v43 = vand.u32 4294901760, %v4155_v45  ;;  %v14482_v58 = vld [vmem:[#allocation15_spill] sm:$0xff]  ;;  %v14486_v5 = vld [vmem:[#allocation21_spill] sm:$0xff]  ;;  %v14489_v45 = vld [vmem:[#allocation24_spill] sm:$0xff] }
 0x246   :  { %7763 = vmatprep.subr.mxu1 %v4240_v50  ;;  %7774 = vmatprep.subr.mxu0 %v11424_v30  ;;  %v4162_v4 = vand.u32 4294901760, %v4161_v29  ;;  %v14484_v50 = vld [vmem:[#allocation35_spill] sm:$0xff]  ;;  %v14493_v29 = vld [vmem:[#allocation25_spill] sm:$0xff]  ;;  %v14498_v63 = vld [vmem:[#allocation32_spill] sm:$0xff] }
 0x247   :  { %7764 = vmatpush3.msra.mxu1 %v4144_v39  ;;  %7775 = vmatpush3.msra.mxu0 %v11436_v49  ;;  %v14487_v39 = vld [vmem:[#allocation29_spill] sm:$0xff] }
 0x248   :  { %7765 = vmatprep.subr.mxu1 %v4246_v46  ;;  %7776 = vmatprep.subr.mxu0 %v11464_v24  ;;  %v14490_v46 = vld [vmem:[#allocation13_spill] sm:$0xff] }
 0x249   :  { %7766 = vmatpush3.msra.mxu1 %v4150_v53  ;;  %7777 = vmatpush3.msra.mxu0 %v11473_v26  ;;  %v14492_v53 = vld [vmem:[#allocation17_spill] sm:$0xff] }
 0x24a   :  { %7767 = vmatprep.subr.mxu1 %v4252_v59  ;;  %7778 = vmatprep.subr.mxu0 %v11487_v16  ;;  %v14494_v59 = vld [vmem:[#allocation14_spill] sm:$0xff] }
 0x24b   :  { %7768 = vmatpush3.msra.mxu1 %v4156_v43  ;;  %7779 = vmatpush3.msra.mxu0 %v11491_v27  ;;  %v14495_v43 = vld [vmem:[#allocation30_spill] sm:$0xff] }
 0x24c   :  { %7769 = vmatprep.subr.mxu1 %v4258_v32  ;;  %7780 = vmatprep.subr.mxu0 %v11500_v34  ;;  %v14496_v32 = vld [vmem:[#allocation28_spill] sm:$0xff] }
 0x24d   :  { %7770 = vmatpush3.msra.mxu1 %v4162_v4  ;;  %7781 = vmatpush3.msra.mxu0 %v11504_v2  ;;  %v14497_v4 = vld [vmem:[#allocation18_spill] sm:$0xff] }
 0x24e   :  { %4263 = vmatmul.mubr.f32.vlgmr.msra.gmra.mxu1 %v11749_v38  ;;  %7782 = vmatprep.subr.mxu0 %v11523_v60  ;;  %v14500_v38 = vld [vmem:[#allocation31_spill] sm:$0xff] }
 0x24f   :  { %7809 = vmatprep.subr.mxu1 %v11406_v15  ;;  %7783 = vmatpush3.msra.mxu0 %v11533_v33 }
 0x250   :  { %7810 = vmatpush3.msra.mxu1 %v11414_v52  ;;  %7784 = vmatprep.subr.mxu0 %v11544_v40 }
 0x251   :  { %7811 = vmatprep.subr.mxu1 %v11432_v62  ;;  %7785 = vmatpush3.msra.mxu0 %v11559_v41 }
 0x252   :  { %7812 = vmatpush3.msra.mxu1 %v11441_v55  ;;  %7786 = vmatprep.subr.mxu0 %v11603_v1 }
 0x253   :  { %7813 = vmatprep.subr.mxu1 %v11446_v61  ;;  %7787 = vmatpush3.msra.mxu0 %v11613_v9 }
 0x254   :  { %7814 = vmatpush3.msra.mxu1 %v11448_v3  ;;  %7788 = vmatprep.subr.mxu0 %v11625_v19 }
 0x255   :  { %7815 = vmatprep.subr.mxu1 %v11454_v28  ;;  %7789 = vmatpush3.msra.mxu0 %v14482_v58 }
 0x256   :  { %7816 = vmatpush3.msra.mxu1 %v14483_v25  ;;  %7790 = vmatprep.subr.mxu0 %v14484_v50 }
 0x257   :  { %7817 = vmatprep.subr.mxu1 %v14485_v57  ;;  %7791 = vmatpush3.msra.mxu0 %v14486_v5 }
 0x258   :  { %7818 = vmatpush3.msra.mxu1 %v14487_v39  ;;  %7792 = vmatprep.subr.mxu0 %v11710_v54 }
 0x259   :  { %7819 = vmatprep.subr.mxu1 %v14488_v22  ;;  %7793 = vmatpush3.msra.mxu0 %v11727_v18 }
 0x25a   :  { %7820 = vmatpush3.msra.mxu1 %v14489_v45  ;;  %7794 = vmatprep.subr.mxu0 %v11739_v23 }
 0x25b   :  { %7821 = vmatprep.subr.mxu1 %v14490_v46  ;;  %7795 = vmatpush3.msra.mxu0 %v11761_v14 }
 0x25c   :  { %7822 = vmatpush3.msra.mxu1 %v14491_v51  ;;  %7796 = vmatprep.subr.mxu0 %v11771_v56 }
 0x25d   :  { %7823 = vmatprep.subr.mxu1 %v14492_v53  ;;  %7797 = vmatpush3.msra.mxu0 %v11790_v48 }
 0x25e   :  { %7824 = vmatpush3.msra.mxu1 %v11570_v10  ;;  %7798 = vmatprep.subr.mxu0 %v11803_v8 }
 0x25f   :  { %7825 = vmatprep.subr.mxu1 %v14493_v29  ;;  %7799 = vmatpush3.msra.mxu0 %v11814_v35 }
 0x260   :  { %7826 = vmatpush3.msra.mxu1 %v14494_v59  ;;  %7800 = vmatprep.subr.mxu0 %v11825_v31 }
 0x261   :  { %7827 = vmatprep.subr.mxu1 %v14495_v43  ;;  %7801 = vmatpush3.msra.mxu0 %v11834_v36 }
 0x262   :  { %7828 = vmatpush3.msra.mxu1 %v14496_v32  ;;  %7802 = vmatprep.subr.mxu0 %v11843_v20  ;;  %v14502_v32 = vld [vmem:[#allocation39_spill] sm:$0xff] }
 0x263   :  { %7829 = vmatprep.subr.mxu1 %v11678_v7  ;;  %7803 = vmatpush3.msra.mxu0 %v11852_v37  ;;  %v14503_v7 = vand.u32 4294901760, %v11424_v30  ;;  %v14508_v30 = vand.u32 4294901760, %v11487_v16  ;;  %v14513_v16 = vand.u32 4294901760, %v14501_v44 }
 0x264   :  { %7830 = vmatpush3.msra.mxu1 %v14497_v4  ;;  %7804 = vmatprep.subr.mxu0 %v11861_v0  ;;  %v14504_v4 = vand.u32 4294901760, %v11436_v49  ;;  %v14505_v0 = vld [vmem:[#allocation37_spill] sm:$0xff]  ;;  %v14509_v49 = vand.u32 4294901760, %v11491_v27  ;;  %v14515_v27 = vand.u32 4294901760, %v11533_v33  ;;  %v14519_v33 = vand.u32 4294901760, %v11613_v9 }
 0x265   :  { %7831 = vmatprep.subr.mxu1 %v14498_v63  ;;  %7805 = vmatpush3.msra.mxu0 %v11873_v21  ;;  %v14506_v21 = vand.u32 4294901760, %v11464_v24  ;;  %v14511_v24 = vand.u32 4294901760, %v14499_v12  ;;  %v14524_v9 = vand.u32 4294901760, %v11710_v54 }
 0x266   :  { %4366 = vmatprep.mubr.f32.mxu0 %v14499_v12  ;;  %7832 = vmatpush3.msra.mxu1 %v14500_v38  ;;  %v14507_v38 = vand.u32 4294901760, %v11473_v26  ;;  %v14512_v26 = vand.u32 4294901760, %v11504_v2  ;;  %v6637_v2 = vld [vmem:[#allocation5 + $0x378] sm:$0xff]  }
 0x267   :  { %4369 = vmatmul.mubr.f32.vlgmr.msra.gmra.mxu0 %v14501_v44  ;;  %7833 = vmatprep.subr.mxu1 %v14502_v32  ;;  %v12042_v44 = vunpack.c.l.bf16 %v6637_v2 }
 0x268   :  { %7844 = vmatprep.subr.mxu0 %v14503_v7  ;;  %7834 = vmatpush3.msra.mxu1 %v11747_v6  ;;  %v14510_v7 = vand.u32 4294901760, %v11500_v34  ;;  %v14516_v34 = vand.u32 4294901760, %v11544_v40 }
 0x269   :  { %7845 = vmatpush3.msra.mxu0 %v14504_v4  ;;  %7835 = vmatprep.subr.mxu1 %v14505_v0 }
 0x26a   :  { %7846 = vmatprep.subr.mxu0 %v14506_v21  ;;  %7836 = vmatpush3.msra.mxu1 %v11784_v47  ;;  %v14517_v21 = vand.u32 4294901760, %v11559_v41  ;;  %v6636_v41 = vld [vmem:[#allocation5 + $0x370] sm:$0xff]  }
 0x26b   :  { %7847 = vmatpush3.msra.mxu0 %v14507_v38  ;;  %7837 = vmatprep.subr.mxu1 %v11786_v11  ;;  %v14514_v38 = vand.u32 4294901760, %v11523_v60  ;;  %v14518_v60 = vand.u32 4294901760, %v11603_v1  ;;  %v6628_v1 = vld [vmem:[#allocation5 + $0x330] sm:$0xff]  }
 0x26c   :  { %7848 = vmatprep.subr.mxu0 %v14508_v30  ;;  %7838 = vmatpush3.msra.mxu1 %v11809_v17 }
 0x26d   :  { %7849 = vmatpush3.msra.mxu0 %v14509_v49  ;;  %7839 = vmatprep.subr.mxu1 %v11820_v42 }
 0x26e   :  { %7850 = vmatprep.subr.mxu0 %v14510_v7  ;;  %7840 = vmatpush3.msra.mxu1 %v11828_v13 }
 0x26f   :  { %4441 = vmatprep.mubr.f32.mxu1 %v14511_v24  ;;  %7851 = vmatpush3.msra.mxu0 %v14512_v26  ;;  %v14537_v24 = vand.u32 4294901760, %v11834_v36  ;;  %v14538_v26 = vld [vmem:[#allocation28_spill] sm:$0xff] }
 0x270   :  { %4445 = vmatmul.mubr.f32.vlgmr.msra.gmra.mxu1 %v14513_v16  ;;  %7852 = vmatprep.subr.mxu0 %v14514_v38  ;;  %v6634_v38 = vld [vmem:[#allocation5 + $0x360] sm:$0xff]  }
 0x271   :  { %7879 = vmatprep.subr.mxu1 %v11406_v15  ;;  %7853 = vmatpush3.msra.mxu0 %v14515_v27  ;;  %v6629_v15 = vld [vmem:[#allocation5 + $0x338] sm:$0xff]   ;;  %v14540_v27 = vand.u32 4294901760, %v11843_v20 }
 0x272   :  { %7880 = vmatpush3.msra.mxu1 %v11414_v52  ;;  %7854 = vmatprep.subr.mxu0 %v14516_v34  ;;  %v12016_v52 = vunpack.c.h.bf16 %v6637_v2  ;;  %v12024_v40 = vunpack.c.h.bf16 %v6629_v15  ;;  %v12051_v54 = vunpack.c.l.bf16 %v6629_v15  ;;  %v14541_v34 = vld [vmem:[#allocation38_spill] sm:$0xff] }
 0x273   :  { %7881 = vmatprep.subr.mxu1 %v11432_v62  ;;  %7855 = vmatpush3.msra.mxu0 %v14517_v21  ;;  %v14520_v62 = vand.u32 4294901760, %v11625_v19  ;;  %v14525_v19 = vand.u32 4294901760, %v11727_v18  ;;  %v12056_v18 = vunpack.c.h.bf16 %v6636_v41  ;;  %v6626_v2 = vld [vmem:[#allocation5 + $0x320] sm:$0xff]  }
 0x274   :  { %7882 = vmatpush3.msra.mxu1 %v11441_v55  ;;  %7856 = vmatprep.subr.mxu0 %v14518_v60  ;;  %v14521_v55 = vand.u32 4294901760, %v14482_v58  ;;  %v12046_v12 = vsub.f32 %v12024_v40, %v12024_v40  ;;  %v14526_v58 = vand.u32 4294901760, %v11739_v23  ;;  %v12064_v23 = vunpack.c.l.bf16 %v6636_v41  ;;  %v14543_v15 = vld [vmem:[#allocation18_spill] sm:$0xff] }
 0x275   :  { %7883 = vmatprep.subr.mxu1 %v11446_v61  ;;  %7857 = vmatpush3.msra.mxu0 %v14519_v33  ;;  %v14522_v61 = vand.u32 4294901760, %v14484_v50  ;;  %v12058_v50 = vunpack.c.h.bf16 %v6628_v1  ;;  %v12083_v4 = vsub.f32 %v12051_v54, %v12051_v54  ;;  %v14542_v60 = vand.u32 4294901760, %v11852_v37 }
 0x276   :  { %7884 = vmatpush3.msra.mxu1 %v11448_v3  ;;  %7858 = vmatprep.subr.mxu0 %v14520_v62  ;;  %v14523_v3 = vand.u32 4294901760, %v14486_v5  ;;  %v12110_v49 = vsub.f32 %v12064_v23, %v12064_v23 }
 0x277   :  { %7885 = vmatprep.subr.mxu1 %v11454_v28  ;;  %7859 = vmatpush3.msra.mxu0 %v14521_v55  ;;  %v12034_v28 = vsub.f32 %v12016_v52, %v12016_v52  ;;  %v12101_v30 = vsub.f32 %v12058_v50, %v12058_v50  ;;  %v13732_v36 = vand.u32 4294901760, %v12083_v4 }
 0x278   :  { %7886 = vmatpush3.msra.mxu1 %v14483_v25  ;;  %7860 = vmatprep.subr.mxu0 %v14522_v61  ;;  %v14527_v25 = vand.u32 4294901760, %v11761_v14  ;;  %v6627_v14 = vld [vmem:[#allocation5 + $0x328] sm:$0xff]   ;;  %v14544_v61 = vld [vmem:[#allocation33_spill] sm:$0xff]  ;;  %v13728_v37 = vand.u32 4294901760, %v12110_v49 }
 0x279   :  { %7887 = vmatprep.subr.mxu1 %v14485_v57  ;;  %7861 = vmatpush3.msra.mxu0 %v14523_v3  ;;  %v6635_v57 = vld [vmem:[#allocation5 + $0x368] sm:$0xff]   ;;  %v13736_v5 = vand.u32 4294901760, %v12034_v28  ;;  %v12125_v16 = vunpack.c.l.bf16 %v6627_v14  ;;  %v13729_v20 = vand.u32 4294901760, %v12101_v30  ;;  %v14545_v3 = vand.u32 4294901760, %v14544_v61 }
 0x27a   :  { %7888 = vmatpush3.msra.mxu1 %v14487_v39  ;;  %7862 = vmatprep.subr.mxu0 %v14524_v9  ;;  %v14528_v39 = vand.u32 4294901760, %v11771_v56  ;;  %v14531_v56 = vand.u32 4294901760, %v11803_v8  ;;  %v12093_v8 = vunpack.c.h.bf16 %v6627_v14  ;;  %v12148_v9 = vunpack.c.h.bf16 %v6634_v38 }
 0x27b   :  { %7889 = vmatprep.subr.mxu1 %v14488_v22  ;;  %7863 = vmatpush3.msra.mxu0 %v14525_v19  ;;  %v12066_v22 = vunpack.c.l.bf16 %v6628_v1  ;;  %14539 = vst [vmem:[#allocation36_spill] sm:$0xff] %v12125_v16  ;;  %v6633_v1 = vld [vmem:[#allocation5 + $0x358] sm:$0xff]   ;;  %v12165_v14 = vunpack.c.h.bf16 %v6626_v2 }
 0x27c   :  { %7890 = vmatpush3.msra.mxu1 %v14489_v45  ;;  %7864 = vmatprep.subr.mxu0 %v14526_v58  ;;  %v14530_v45 = vand.u32 4294901760, %v11790_v48  ;;  %v14533_v48 = vand.u32 4294901760, %v11814_v35  ;;  %14534 = vst [vmem:[#allocation16_spill] sm:$0xff] %v12093_v8  ;;  %v14535_v35 = vand.u32 4294901760, %v11825_v31  ;;  %v12143_v55 = vsub.f32 %v12093_v8, %v12093_v8  ;;  %14546 = vst [vmem:[#allocation21_spill] sm:$0xff] %v12148_v9  ;;  %v14547_v58 = vld [vmem:[#allocation20_spill] sm:$0xff] }
 0x27d   :  { %7891 = vmatprep.subr.mxu1 %v14490_v46  ;;  %7865 = vmatpush3.msra.mxu0 %v14527_v25  ;;  %14529 = vst [vmem:[#allocation12_spill] sm:$0xff] %v12066_v22  ;;  %v13735_v46 = vand.u32 4294901760, %v12046_v12  ;;  %v12114_v7 = vsub.f32 %v12066_v22, %v12066_v22  ;;  %v14548_v25 = vand.u32 4294901760, %v14547_v58  ;;  %14550 = vst [vmem:[#allocation29_spill] sm:$0xff] %v12165_v14 }
 0x27e   :  { %7892 = vmatpush3.msra.mxu1 %v14491_v51  ;;  %7866 = vmatprep.subr.mxu0 %v14528_v39  ;;  %v12074_v51 = vsub.f32 %v12042_v44, %v12042_v44  ;;  %v12213_v58 = vsub.f32 %v12148_v9, %v12148_v9  ;;  %v12291_v39 = vld [vmem:[#allocation2 + $0x8] sm:$0xff] }
 0x27f   :  { %7893 = vmatprep.subr.mxu1 %v14492_v53  ;;  %7867 = vmatpush3.msra.mxu0 %v14530_v45  ;;  %v12079_v53 = vunpack.c.h.bf16 %v6635_v57  ;;  %v12122_v31 = vsub.f32 %v12046_v12, %v13735_v46  ;;  %v13727_v41 = vand.u32 4294901760, %v12114_v7  ;;  %v12169_v45 = vsub.f32 %v12125_v16, %v12125_v16  ;;  %v6624_v46 = vld [vmem:[#allocation5 + $0x310] sm:$0xff]   ;;  %14562 = vst [vmem:[#allocation26_spill] sm:$0xff] %v12291_v39 }
 0x280   :  { %7894 = vmatpush3.msra.mxu1 %v11570_v10  ;;  %7868 = vmatprep.subr.mxu0 %v14531_v56  ;;  %v12091_v10 = vsub.f32 %v12034_v28, %v13736_v5  ;;  %v14551_v56 = vld [vmem:[#allocation31_spill] sm:$0xff] }
 0x281   :  { %7895 = vmatprep.subr.mxu1 %v14493_v29  ;;  %14532 = vst [vmem:[#allocation15_spill] sm:$0xff] %v12079_v53  ;;  %7869 = vmatpush3.msra.mxu0 %v14533_v48  ;;  %v12097_v29 = vsub.f32 %v12056_v18, %v12056_v18  ;;  %v12133_v21 = vsub.f32 %v12079_v53, %v12079_v53  ;;  %v14552_v48 = vld [vmem:[#allocation19_spill] sm:$0xff] }
 0x282   :  { %7896 = vmatpush3.msra.mxu1 %v14494_v59  ;;  %7870 = vmatprep.subr.mxu0 %v14535_v35  ;;  %v12106_v59 = vunpack.c.l.bf16 %v6635_v57  ;;  %v4838_v33 = vand.u32 4294901760, %v12091_v10  ;;  %v14549_v57 = vld [vmem:[#allocation27_spill] sm:$0xff]  ;;  %v12176_v35 = vsub.f32 %v12083_v4, %v13732_v36  ;;  %v12208_v61 = vsub.f32 %v12114_v7, %v13727_v41 }
 0x283   :  { %7897 = vmatprep.subr.mxu1 %v14495_v43  ;;  %7871 = vmatpush3.msra.mxu0 %v14537_v24  ;;  %v13734_v43 = vand.u32 4294901760, %v12074_v51  ;;  %v13731_v62 = vand.u32 4294901760, %v12097_v29  ;;  %v12178_v24 = vunpack.c.l.bf16 %v6634_v38  ;;  %v12195_v38 = vunpack.c.h.bf16 %v6633_v1 }
 0x284   :  { %14536 = vst [vmem:[#allocation35_spill] sm:$0xff] %v12106_v59  ;;  %7898 = vmatpush3.msra.mxu1 %v14538_v26  ;;  %7872 = vmatprep.subr.mxu0 %v14540_v27  ;;  %v12154_v19 = vsub.f32 %v12106_v59, %v12106_v59  ;;  %v12180_v26 = vunpack.c.l.bf16 %v6626_v2  ;;  %v13730_v27 = vand.u32 4294901760, %v12133_v21  ;;  %v13733_v2 = vand.u32 4294901760, %v12143_v55 }
 0x285   :  { %7899 = vmatprep.subr.mxu1 %v14541_v34  ;;  %7873 = vmatpush3.msra.mxu0 %v14542_v60  ;;  %14553 = vst [vmem:[#allocation22_spill] sm:$0xff] %v12178_v24  ;;  %v6625_v34 = vld [vmem:[#allocation5 + $0x318] sm:$0xff]   ;;  %v12188_v60 = vsub.f32 %v12097_v29, %v13731_v62  ;;  %v12223_v41 = vsub.f32 %v12165_v14, %v12165_v14 }
 0x286   :  { %7900 = vmatpush3.msra.mxu1 %v14543_v15  ;;  %7874 = vmatprep.subr.mxu0 %v14545_v3  ;;  %14554 = vst [vmem:[#allocation24_spill] sm:$0xff] %v12180_v26  ;;  %v12193_v15 = vsub.f32 %v12101_v30, %v13729_v20  ;;  %v13737_v3 = vand.u32 4294901760, %v12154_v19  ;;  %v12239_v20 = vsub.f32 %v12180_v26, %v12180_v26 }
 0x287   :  { %7901 = vmatprep.subr.mxu1 %v14498_v63  ;;  %7875 = vmatpush3.msra.mxu0 %v14548_v25  ;;  %v12163_v63 = vsub.f32 %v12074_v51, %v13734_v43  ;;  %v12218_v25 = vunpack.c.h.bf16 %v6625_v34  ;;  %v12252_v62 = vsub.f32 %v12195_v38, %v12195_v38  ;;  %v12266_v43 = vunpack.c.l.bf16 %v6633_v1 }
 0x288   :  { %4579 = vmatprep.mubr.f32.mxu0 %v14549_v57  ;;  %7902 = vmatpush3.msra.mxu1 %v14551_v56  ;;  %v13738_v56 = vand.u32 4294901760, %v12169_v45  ;;  %14556 = vst [vmem:[#allocation23_spill] sm:$0xff] %v12239_v20  ;;  %v12281_v1 = vunpack.c.l.bf16 %v6625_v34 }
 0x289   :  { %4581 = vmatmul.mubr.f32.vlgmr.msra.gmra.mxu0 %v14552_v48  ;;  %7903 = vmatprep.subr.mxu1 %v14502_v32  ;;  %v12203_v32 = vsub.f32 %v12110_v49, %v13728_v37  ;;  %14555 = vst [vmem:[#allocation13_spill] sm:$0xff] %v12218_v25  ;;  %v4748_v37 = vand.u32 4294901760, %v12176_v35  ;;  %v4754_v35 = vand.u32 4294901760, %v12193_v15  ;;  %14557 = vst [vmem:[#allocation17_spill] sm:$0xff] %v12252_v62  ;;  %v6632_v15 = vld [vmem:[#allocation5 + $0x350] sm:$0xff]  }
 0x28a   :  { %7914 = vmatprep.subr.mxu0 %v12016_v52  ;;  %7904 = vmatpush3.msra.mxu1 %v11747_v6  ;;  %v4844_v6 = vand.u32 4294901760, %v12163_v63  ;;  %v12235_v63 = vsub.f32 %v12178_v24, %v12178_v24  ;;  %14558 = vst [vmem:[#allocation25_spill] sm:$0xff] %v12266_v43  ;;  %14560 = vst [vmem:[#allocation30_spill] sm:$0xff] %v12281_v1  ;;  %v12288_v5 = vunpack.c.h.bf16 %v6632_v15 }
 0x28b   :  { %7915 = vmatpush3.msra.mxu0 %v12024_v40  ;;  %7905 = vmatprep.subr.mxu1 %v14505_v0  ;;  %v12231_v0 = vsub.f32 %v12133_v21, %v13730_v27  ;;  %v12248_v27 = vsub.f32 %v12143_v55, %v13733_v2  ;;  %v13739_v2 = vand.u32 4294901760, %v12213_v58 }
 0x28c   :  { %7916 = vmatprep.subr.mxu0 %v12042_v44  ;;  %7906 = vmatpush3.msra.mxu1 %v11784_v47  ;;  %v4850_v47 = vand.u32 4294901760, %v12188_v60  ;;  %v12261_v60 = vsub.f32 %v12154_v19, %v13737_v3  ;;  %v12276_v3 = vsub.f32 %v12218_v25, %v12218_v25  ;;  %14561 = vst [vmem:[#allocation32_spill] sm:$0xff] %v12288_v5 }
 0x28d   :  { %7917 = vmatpush3.msra.mxu0 %v12051_v54  ;;  %7907 = vmatprep.subr.mxu1 %v11786_v11  ;;  %v12305_v11 = vunpack.c.h.bf16 %v6624_v46 }
 0x28e   :  { %7918 = vmatprep.subr.mxu0 %v12056_v18  ;;  %7908 = vmatpush3.msra.mxu1 %v11809_v17  ;;  %v12271_v17 = vsub.f32 %v12169_v45, %v13738_v56  ;;  %14559 = vst [vmem:[#allocation14_spill] sm:$0xff] %v12276_v3  ;;  %v4868_v56 = vand.u32 4294901760, %v12261_v60 }
 0x28f   :  { %7919 = vmatpush3.msra.mxu0 %v12058_v50  ;;  %7909 = vmatprep.subr.mxu1 %v11820_v42  ;;  %14565 = vst [vmem:[#allocation34_spill] sm:$0xff] %v12305_v11 }
 0x290   :  { %7920 = vmatprep.subr.mxu0 %v12064_v23  ;;  %7910 = vmatpush3.msra.mxu1 %v11828_v13  ;;  %v4772_v10 = vand.u32 4294901760, %v12271_v17  ;;  %v14570_v17 = vand.u32 4294901760, %v12235_v63 }
 0x291   :  { %4651 = vmatprep.mubr.f32.mxu1 %v14549_v57  ;;  %7921 = vmatpush3.msra.mxu0 %v12066_v22  ;;  %v14563_v57 = vld [vmem:[#allocation11_spill] sm:$0xff]  ;;  %v12339_v22 = vsub.f32 %v12281_v1, %v12281_v1 }
 0x292   :  { %4653 = vmatmul.mubr.f32.vlgmr.msra.gmra.mxu1 %v14552_v48  ;;  %v14564_v42 = vsub.s32 5, %v14563_v57  ;;  %7922 = vmatprep.subr.mxu0 %v12079_v53  ;;  %v12303_v48 = vsub.f32 %v12213_v58, %v13739_v2  ;;  %v14566_v13 = vsub.s32 4, %v14563_v57  ;;  %v6631_v2 = vld [vmem:[#allocation5 + $0x348] sm:$0xff]   ;;  %v12322_v57 = vsub.f32 %v12266_v43, %v12266_v43 }
 0x293   :  { %7949 = vmatprep.subr.mxu1 %v4838_v33  ;;  %7923 = vmatpush3.msra.mxu0 %v12093_v8  ;;  %v14568_v33 = vand.u32 4294901760, %v12223_v41  ;;  %v6623_v53 = vld [vmem:[#allocation5 + $0x308] sm:$0xff]   ;;  %v14577_v8 = vand.u32 4294901760, %v12276_v3 }
 0x294   :  { %v613_v34 = vrot.slane %v12291_v39, %v14564_v42  ;;  %v609_v36 = vrot.slane %v12291_v39, %v14566_v13  ;;  %v14567_v42 = vand.u32 4294901760, %v12122_v31  ;;  %7924 = vmatprep.subr.mxu0 %v12106_v59  ;;  %v12325_v31 = vunpack.c.l.bf16 %v6632_v15 }
 0x295   :  { %v12317_v60 = vsub.f32 %v12223_v41, %v14568_v33  ;;  %v12330_v13 = vsub.f32 %v12235_v63, %v14570_v17  ;;  %7925 = vmatpush3.msra.mxu0 %v12125_v16  ;;  %v14573_v15 = vand.u32 4294901760, %v12252_v62  ;;  %v12351_v17 = vsub.f32 %v12288_v5, %v12288_v5 }
 0x296   :  { %7950 = vmatpush3.msra.mxu1 %v14567_v42  ;;  %14569 = vst [vmem:[#allocation39_spill] sm:$0xff] %v12325_v31  ;;  %v14571_v42 = vand.u32 4294901760, %v12239_v20  ;;  %7926 = vmatprep.subr.mxu0 %v12148_v9  ;;  %v4874_v59 = vand.u32 4294901760, %v12303_v48  ;;  %v12357_v16 = vunpack.c.h.bf16 %v6631_v2  ;;  %v6630_v9 = vld [vmem:[#allocation5 + $0x340] sm:$0xff]   ;;  %v12373_v48 = vsub.f32 %v12305_v11, %v12305_v11 }
 0x297   :  { %7951 = vmatprep.subr.mxu1 %v4844_v6  ;;  %v12342_v6 = vunpack.c.l.bf16 %v6624_v46  ;;  %v12347_v39 = vsub.f32 %v12252_v62, %v14573_v15  ;;  %v12359_v46 = vunpack.c.h.bf16 %v6623_v53  ;;  %7927 = vmatpush3.msra.mxu0 %v12165_v14  ;;  %v4778_v15 = vand.u32 4294901760, %v12317_v60 }
 0x298   :  { %v12335_v33 = vsub.f32 %v12239_v20, %v14571_v42  ;;  %7952 = vmatpush3.msra.mxu1 %v4748_v37  ;;  %v12353_v42 = vand.u32 4294901760, %v613_v34  ;;  %14575 = vst [vmem:[#allocation38_spill] sm:$0xff] %v12357_v16  ;;  %v12361_v37 = vand.u32 4294901760, %v609_v36  ;;  %v12368_v62 = vsub.f32 %v12276_v3, %v14577_v8  ;;  %7928 = vmatprep.subr.mxu0 %v12178_v24 }
 0x299   :  { %14572 = vst [vmem:[#allocation37_spill] sm:$0xff] %v12342_v6  ;;  %7953 = vmatprep.subr.mxu1 %v4850_v47  ;;  %v14578_v20 = vand.u32 4294901760, %v12203_v32  ;;  %v12383_v8 = vsub.f32 %v12325_v31, %v12325_v31  ;;  %7929 = vmatpush3.msra.mxu0 %v12180_v26  ;;  %v14579_v47 = vand.u32 4294901760, %v12208_v61  ;;  %v4886_v24 = vand.u32 4294901760, %v12347_v39  ;;  %v6622_v32 = vld [vmem:[#allocation5 + $0x300] sm:$0xff]  }
 0x29a   :  { %14574 = vst [vmem:[#allocation28_spill] sm:$0xff] %v12353_v42  ;;  %14576 = vst [vmem:[#allocation18_spill] sm:$0xff] %v12361_v37  ;;  %7954 = vmatpush3.msra.mxu1 %v4754_v35  ;;  %v4880_v35 = vand.u32 4294901760, %v12330_v13  ;;  %v4784_v60 = vand.u32 4294901760, %v12335_v33  ;;  %v12389_v3 = vunpack.c.l.bf16 %v6631_v2  ;;  %v12393_v13 = vsub.f32 %v613_v34, %v12353_v42  ;;  %7930 = vmatprep.subr.mxu0 %v12195_v38 }
 0x29b   :  { %7955 = vmatprep.subr.mxu1 %v14578_v20  ;;  %v13771_v20 = vand.u32 4294901760, %v12351_v17  ;;  %v14582_v33 = vand.u32 4294901760, %v12231_v0  ;;  %v12398_v14 = vunpack.c.l.bf16 %v6623_v53  ;;  %v12400_v26 = vunpack.c.h.bf16 %v6630_v9  ;;  %7931 = vmatpush3.msra.mxu0 %v12218_v25 }
 0x29c   :  { %7956 = vmatpush3.msra.mxu1 %v14579_v47  ;;  %14580 = vst [vmem:[#allocation33_spill] sm:$0xff] %v12389_v3  ;;  %14581 = vst [vmem:[#allocation20_spill] sm:$0xff] %v12393_v13  ;;  %v12404_v39 = vsub.f32 %v12342_v6, %v12342_v6  ;;  %v12407_v2 = vsub.f32 %v609_v36, %v12361_v37  ;;  %v14584_v61 = vand.u32 4294901760, %v12248_v27  ;;  %v4790_v34 = vand.u32 4294901760, %v12368_v62 }
 0x29d   :  { %7957 = vmatprep.subr.mxu1 %v14582_v33  ;;  %v14585_v0 = vand.u32 4294901760, %v12322_v57  ;;  %v12419_v33 = vsub.f32 %v12357_v16, %v12357_v16  ;;  %7932 = vmatprep.subr.mxu0 %v12266_v43  ;;  %v14586_v36 = vand.u32 4294901760, %v12339_v22  ;;  %v4897_v47 = vsub.f32 %v12351_v17, %v13771_v20 }
 0x29e   :  { %14583 = vst [vmem:[#allocation27_spill] sm:$0xff] %v12407_v2  ;;  %7958 = vmatpush3.msra.mxu1 %v14584_v61  ;;  %v12425_v61 = vunpack.c.h.bf16 %v6622_v32  ;;  %7933 = vmatpush3.msra.mxu0 %v12281_v1  ;;  %v12444_v62 = vunpack.c.l.bf16 %v6622_v32  ;;  %v12450_v20 = vsub.f32 %v12398_v14, %v12398_v14  ;;  %v14587_v43 = vand.u32 4294901760, %v12373_v48 }
 0x29f   :  { %v4891_v53 = vsub.f32 %v12322_v57, %v14585_v0  ;;  %7959 = vmatprep.subr.mxu1 %v4868_v56  ;;  %v4795_v27 = vsub.f32 %v12339_v22, %v14586_v36  ;;  %v12430_v0 = vsub.f32 %v12359_v46, %v12359_v46  ;;  %v12436_v56 = vunpack.c.l.bf16 %v6630_v9  ;;  %7934 = vmatprep.subr.mxu0 %v12288_v5 }
 0x2a0   :  { %7960 = vmatpush3.msra.mxu1 %v4772_v10  ;;  %v12441_v36 = vsub.f32 %v12389_v3, %v12389_v3  ;;  %7935 = vmatpush3.msra.mxu0 %v12305_v11  ;;  %v4801_v25 = vsub.f32 %v12373_v48, %v14587_v43  ;;  %v12459_v32 = vsub.f32 %v12400_v26, %v12400_v26  ;;  %v14588_v1 = vand.u32 4294901760, %v12383_v8 }
 0x2a1   :  { %7961 = vmatprep.subr.mxu1 %v4874_v59  ;;  %v4892_v9 = vand.u32 4294901760, %v4891_v53  ;;  %7936 = vmatprep.subr.mxu0 %v12325_v31  ;;  %v4796_v10 = vand.u32 4294901760, %v4795_v27  ;;  %v12468_v53 = vsub.f32 %v12425_v61, %v12425_v61  ;;  %v4898_v43 = vand.u32 4294901760, %v4897_v47 }
 0x2a2   :  { %7962 = vmatpush3.msra.mxu1 %v4778_v15  ;;  %v4903_v11 = vsub.f32 %v12383_v8, %v14588_v1  ;;  %7937 = vmatpush3.msra.mxu0 %v12342_v6  ;;  %v14589_v59 = vand.u32 4294901760, %v12393_v13  ;;  %v12477_v27 = vsub.f32 %v12436_v56, %v12436_v56  ;;  %v14591_v1 = vand.u32 4294901760, %v12404_v39 }
 0x2a3   :  { %7963 = vmatprep.subr.mxu1 %v4880_v35  ;;  %7938 = vmatprep.subr.mxu0 %v12357_v16  ;;  %v4802_v35 = vand.u32 4294901760, %v4801_v25  ;;  %v14595_v6 = vand.u32 4294901760, %v12430_v0 }
 0x2a4   :  { %7964 = vmatpush3.msra.mxu1 %v4784_v60  ;;  %v4725_v31 = vsub.f32 %v12393_v13, %v14589_v59  ;;  %14590 = vst [vmem:[#allocation31_spill] sm:$0xff] %v12477_v27  ;;  %v4807_v15 = vsub.f32 %v12404_v39, %v14591_v1  ;;  %v14592_v60 = vand.u32 4294901760, %v12407_v2  ;;  %v12489_v59 = vsub.f32 %v12444_v62, %v12444_v62 }
 0x2a5   :  { %7965 = vmatprep.subr.mxu1 %v4886_v24  ;;  %7939 = vmatpush3.msra.mxu0 %v12359_v46  ;;  %v14594_v24 = vand.u32 4294901760, %v12419_v33  ;;  %v13789_v1 = vand.u32 4294901760, %v12477_v27 }
 0x2a6   :  { %v4731_v47 = vsub.f32 %v12407_v2, %v14592_v60  ;;  %14593 = vst [vmem:[#allocation19_spill] sm:$0xff] %v12489_v59  ;;  %7966 = vmatpush3.msra.mxu1 %v4790_v34  ;;  %7940 = vmatprep.subr.mxu0 %v12389_v3  ;;  %v4904_v60 = vand.u32 4294901760, %v4903_v11  ;;  %v4813_v2 = vsub.f32 %v12430_v0, %v14595_v6  ;;  %v4726_v25 = vand.u32 4294901760, %v4725_v31 }
 0x2a7   :  { %v4909_v16 = vsub.f32 %v12419_v33, %v14594_v24  ;;  %7967 = vmatprep.subr.mxu1 %v4892_v9  ;;  %7941 = vmatpush3.msra.mxu0 %v12398_v14  ;;  %v14596_v34 = vand.u32 4294901760, %v12441_v36  ;;  %v4808_v11 = vand.u32 4294901760, %v4807_v15  ;;  %v14597_v3 = vand.u32 4294901760, %v12450_v20 }
 0x2a8   :  { %7968 = vmatpush3.msra.mxu1 %v4796_v10  ;;  %7942 = vmatprep.subr.mxu0 %v12400_v26  ;;  %v4732_v9 = vand.u32 4294901760, %v4731_v47  ;;  %v13788_v13 = vand.u32 4294901760, %v12489_v59  ;;  %v14598_v10 = vand.u32 4294901760, %v12459_v32  ;;  %v14599_v15 = vand.u32 4294901760, %v12468_v53 }
 0x2a9   :  { %v4915_v24 = vsub.f32 %v12441_v36, %v14596_v34  ;;  %7969 = vmatprep.subr.mxu1 %v4898_v43  ;;  %v4819_v6 = vsub.f32 %v12450_v20, %v14597_v3  ;;  %7943 = vmatpush3.msra.mxu0 %v12425_v61  ;;  %v4910_v31 = vand.u32 4294901760, %v4909_v16  ;;  %v4814_v43 = vand.u32 4294901760, %v4813_v2 }
 0x2aa   :  { %7970 = vmatpush3.msra.mxu1 %v4802_v35  ;;  %v4921_v34 = vsub.f32 %v12459_v32, %v14598_v10  ;;  %7944 = vmatprep.subr.mxu0 %v12436_v56  ;;  %v4825_v47 = vsub.f32 %v12468_v53, %v14599_v15  ;;  %v4927_v16 = vsub.f32 %v12477_v27, %v13789_v1  ;;  %v14603_v10 = vld [vmem:[#allocation15_spill] sm:$0xff]  ;;  %v14617_v1 = vld [vmem:[#allocation20_spill] sm:$0xff] }
 0x2ab   :  { %7971 = vmatprep.subr.mxu1 %v4904_v60  ;;  %7945 = vmatpush3.msra.mxu0 %v12444_v62  ;;  %v4916_v3 = vand.u32 4294901760, %v4915_v24  ;;  %v4820_v35 = vand.u32 4294901760, %v4819_v6  ;;  %v4831_v60 = vsub.f32 %v12489_v59, %v13788_v13  ;;  %v14601_v6 = vld [vmem:[#allocation12_spill] sm:$0xff]  ;;  %v14606_v15 = vld [vmem:[#allocation35_spill] sm:$0xff] }
 0x2ac   :  { %4727 = vmatprep.mubr.f32.mxu0 %v4726_v25  ;;  %7972 = vmatpush3.msra.mxu1 %v4808_v11  ;;  %v4922_v2 = vand.u32 4294901760, %v4921_v34  ;;  %v4826_v25 = vand.u32 4294901760, %v4825_v47  ;;  %v4928_v24 = vand.u32 4294901760, %v4927_v16  ;;  %v14604_v34 = vld [vmem:[#allocation14_spill] sm:$0xff]  ;;  %v14607_v47 = vld [vmem:[#allocation36_spill] sm:$0xff]  ;;  %v14609_v16 = vld [vmem:[#allocation29_spill] sm:$0xff] }
 0x2ad   :  { %4733 = vmatmul.mubr.f32.vlgmr.msra.gmra.mxu0 %v4732_v9  ;;  %7973 = vmatprep.subr.mxu1 %v4910_v31  ;;  %v4832_v11 = vand.u32 4294901760, %v4831_v60  ;;  %v14600_v9 = vld [vmem:[#allocation23_spill] sm:$0xff]  ;;  %v14602_v31 = vld [vmem:[#allocation17_spill] sm:$0xff]  ;;  %v14611_v60 = vld [vmem:[#allocation24_spill] sm:$0xff] }
 0x2ae   :  { %7984 = vmatprep.subr.mxu0 %v12034_v28  ;;  %7974 = vmatpush3.msra.mxu1 %v4814_v43  ;;  %v14605_v43 = vld [vmem:[#allocation16_spill] sm:$0xff]  ;;  %v14616_v13 = vld [vmem:[#allocation39_spill] sm:$0xff] }
 0x2af   :  { %7985 = vmatpush3.msra.mxu0 %v12046_v12  ;;  %7975 = vmatprep.subr.mxu1 %v4916_v3  ;;  %v14608_v3 = vld [vmem:[#allocation21_spill] sm:$0xff] }
 0x2b0   :  { %7986 = vmatprep.subr.mxu0 %v12074_v51  ;;  %7976 = vmatpush3.msra.mxu1 %v4820_v35  ;;  %v14610_v35 = vld [vmem:[#allocation22_spill] sm:$0xff] }
 0x2b1   :  { %7987 = vmatpush3.msra.mxu0 %v12083_v4  ;;  %7977 = vmatprep.subr.mxu1 %v4922_v2  ;;  %v14612_v2 = vld [vmem:[#allocation13_spill] sm:$0xff] }
 0x2b2   :  { %7988 = vmatprep.subr.mxu0 %v12097_v29  ;;  %7978 = vmatpush3.msra.mxu1 %v4826_v25  ;;  %v14613_v25 = vld [vmem:[#allocation25_spill] sm:$0xff] }
 0x2b3   :  { %7989 = vmatpush3.msra.mxu0 %v12101_v30  ;;  %7979 = vmatprep.subr.mxu1 %v4928_v24  ;;  %v14614_v24 = vld [vmem:[#allocation30_spill] sm:$0xff] }
 0x2b4   :  { %7990 = vmatprep.subr.mxu0 %v12110_v49  ;;  %7980 = vmatpush3.msra.mxu1 %v4832_v11  ;;  %v14615_v11 = vld [vmem:[#allocation34_spill] sm:$0xff] }
 0x2b5   :  { %4931 = vmatprep.mubr.f32.mxu1 %v12353_v42  ;;  %7991 = vmatpush3.msra.mxu0 %v12114_v7  ;;  %v14619_v42 = vld [vmem:[#allocation27_spill] sm:$0xff] }
 0x2b6   :  { %4933 = vmatmul.mubr.f32.vlgmr.msra.gmra.mxu1 %v12361_v37  ;;  %7992 = vmatprep.subr.mxu0 %v12133_v21  ;;  %v14618_v37 = vld [vmem:[#allocation37_spill] sm:$0xff] }
 0x2b7   :  { %8019 = vmatprep.subr.mxu1 %v12016_v52  ;;  %7993 = vmatpush3.msra.mxu0 %v12143_v55 }
 0x2b8   :  { %8020 = vmatpush3.msra.mxu1 %v12024_v40  ;;  %7994 = vmatprep.subr.mxu0 %v12154_v19 }
 0x2b9   :  { %8021 = vmatprep.subr.mxu1 %v12042_v44  ;;  %7995 = vmatpush3.msra.mxu0 %v12169_v45 }
 0x2ba   :  { %8022 = vmatpush3.msra.mxu1 %v12051_v54  ;;  %7996 = vmatprep.subr.mxu0 %v12213_v58 }
 0x2bb   :  { %8023 = vmatprep.subr.mxu1 %v12056_v18  ;;  %7997 = vmatpush3.msra.mxu0 %v12223_v41 }
 0x2bc   :  { %8024 = vmatpush3.msra.mxu1 %v12058_v50  ;;  %7998 = vmatprep.subr.mxu0 %v12235_v63 }
 0x2bd   :  { %8025 = vmatprep.subr.mxu1 %v12064_v23  ;;  %7999 = vmatpush3.msra.mxu0 %v14600_v9 }
 0x2be   :  { %8026 = vmatpush3.msra.mxu1 %v14601_v6  ;;  %8000 = vmatprep.subr.mxu0 %v14602_v31 }
 0x2bf   :  { %8027 = vmatprep.subr.mxu1 %v14603_v10  ;;  %8001 = vmatpush3.msra.mxu0 %v14604_v34 }
 0x2c0   :  { %8028 = vmatpush3.msra.mxu1 %v14605_v43  ;;  %8002 = vmatprep.subr.mxu0 %v12322_v57 }
 0x2c1   :  { %8029 = vmatprep.subr.mxu1 %v14606_v15  ;;  %8003 = vmatpush3.msra.mxu0 %v12339_v22 }
 0x2c2   :  { %8030 = vmatpush3.msra.mxu1 %v14607_v47  ;;  %8004 = vmatprep.subr.mxu0 %v12351_v17 }
 0x2c3   :  { %8031 = vmatprep.subr.mxu1 %v14608_v3  ;;  %8005 = vmatpush3.msra.mxu0 %v12373_v48 }
 0x2c4   :  { %8032 = vmatpush3.msra.mxu1 %v14609_v16  ;;  %8006 = vmatprep.subr.mxu0 %v12383_v8 }
 0x2c5   :  { %8033 = vmatprep.subr.mxu1 %v14610_v35  ;;  %8007 = vmatpush3.msra.mxu0 %v12404_v39 }
 0x2c6   :  { %8034 = vmatpush3.msra.mxu1 %v14611_v60  ;;  %8008 = vmatprep.subr.mxu0 %v12419_v33 }
 0x2c7   :  { %8035 = vmatprep.subr.mxu1 %v12195_v38  ;;  %8009 = vmatpush3.msra.mxu0 %v12430_v0 }
 0x2c8   :  { %8036 = vmatpush3.msra.mxu1 %v14612_v2  ;;  %8010 = vmatprep.subr.mxu0 %v12441_v36 }
 0x2c9   :  { %8037 = vmatprep.subr.mxu1 %v14613_v25  ;;  %8011 = vmatpush3.msra.mxu0 %v12450_v20 }
 0x2ca   :  { %8038 = vmatpush3.msra.mxu1 %v14614_v24  ;;  %8012 = vmatprep.subr.mxu0 %v12459_v32  ;;  %v14620_v24 = vld [vmem:[#allocation38_spill] sm:$0xff] }
 0x2cb   :  { %8039 = vmatprep.subr.mxu1 %v12288_v5  ;;  %8013 = vmatpush3.msra.mxu0 %v12468_v53  ;;  %v14621_v5 = vand.u32 4294901760, %v12034_v28  ;;  %v14626_v28 = vand.u32 4294901760, %v12097_v29  ;;  %v14631_v29 = vand.u32 4294901760, %v14619_v42 }
 0x2cc   :  { %8040 = vmatpush3.msra.mxu1 %v14615_v11  ;;  %8014 = vmatprep.subr.mxu0 %v12477_v27  ;;  %v14622_v11 = vand.u32 4294901760, %v12046_v12  ;;  %v14623_v27 = vld [vmem:[#allocation33_spill] sm:$0xff]  ;;  %v14627_v12 = vand.u32 4294901760, %v12101_v30  ;;  %v14633_v30 = vand.u32 4294901760, %v12143_v55  ;;  %v14637_v55 = vand.u32 4294901760, %v12223_v41 }
 0x2cd   :  { %8041 = vmatprep.subr.mxu1 %v14616_v13  ;;  %8015 = vmatpush3.msra.mxu0 %v12489_v59  ;;  %v14624_v59 = vand.u32 4294901760, %v12074_v51  ;;  %v14629_v51 = vand.u32 4294901760, %v14617_v1  ;;  %v14642_v41 = vand.u32 4294901760, %v12322_v57 }
 0x2ce   :  { %5036 = vmatprep.mubr.f32.mxu0 %v14617_v1  ;;  %8042 = vmatpush3.msra.mxu1 %v14618_v37  ;;  %v14625_v37 = vand.u32 4294901760, %v12083_v4  ;;  %v14630_v4 = vand.u32 4294901760, %v12114_v7  ;;  %v6653_v7 = vld [vmem:[#allocation5 + $0x3f8] sm:$0xff]  }
 0x2cf   :  { %5039 = vmatmul.mubr.f32.vlgmr.msra.gmra.mxu0 %v14619_v42  ;;  %8043 = vmatprep.subr.mxu1 %v14620_v24  ;;  %v12658_v42 = vunpack.c.l.bf16 %v6653_v7 }
 0x2d0   :  { %8054 = vmatprep.subr.mxu0 %v14621_v5  ;;  %8044 = vmatpush3.msra.mxu1 %v12359_v46  ;;  %v14628_v5 = vand.u32 4294901760, %v12110_v49  ;;  %v14634_v49 = vand.u32 4294901760, %v12154_v19 }
 0x2d1   :  { %8055 = vmatpush3.msra.mxu0 %v14622_v11  ;;  %8045 = vmatprep.subr.mxu1 %v14623_v27 }
 0x2d2   :  { %8056 = vmatprep.subr.mxu0 %v14624_v59  ;;  %8046 = vmatpush3.msra.mxu1 %v12398_v14  ;;  %v14635_v59 = vand.u32 4294901760, %v12169_v45  ;;  %v6652_v45 = vld [vmem:[#allocation5 + $0x3f0] sm:$0xff]  }
 0x2d3   :  { %8057 = vmatpush3.msra.mxu0 %v14625_v37  ;;  %8047 = vmatprep.subr.mxu1 %v12400_v26  ;;  %v14632_v37 = vand.u32 4294901760, %v12133_v21  ;;  %v14636_v21 = vand.u32 4294901760, %v12213_v58  ;;  %v6644_v58 = vld [vmem:[#allocation5 + $0x3b0] sm:$0xff]  }
 0x2d4   :  { %8058 = vmatprep.subr.mxu0 %v14626_v28  ;;  %8048 = vmatpush3.msra.mxu1 %v12425_v61 }
 0x2d5   :  { %8059 = vmatpush3.msra.mxu0 %v14627_v12  ;;  %8049 = vmatprep.subr.mxu1 %v12436_v56 }
 0x2d6   :  { %8060 = vmatprep.subr.mxu0 %v14628_v5  ;;  %8050 = vmatpush3.msra.mxu1 %v12444_v62 }
 0x2d7   :  { %5111 = vmatprep.mubr.f32.mxu1 %v14629_v51  ;;  %8061 = vmatpush3.msra.mxu0 %v14630_v4  ;;  %v14655_v51 = vand.u32 4294901760, %v12450_v20  ;;  %v14656_v4 = vld [vmem:[#allocation30_spill] sm:$0xff] }
 0x2d8   :  { %5115 = vmatmul.mubr.f32.vlgmr.msra.gmra.mxu1 %v14631_v29  ;;  %8062 = vmatprep.subr.mxu0 %v14632_v37  ;;  %v6650_v37 = vld [vmem:[#allocation5 + $0x3e0] sm:$0xff]  }
 0x2d9   :  { %8089 = vmatprep.subr.mxu1 %v12016_v52  ;;  %8063 = vmatpush3.msra.mxu0 %v14633_v30  ;;  %v6645_v52 = vld [vmem:[#allocation5 + $0x3b8] sm:$0xff]   ;;  %v14658_v30 = vand.u32 4294901760, %v12459_v32 }
 0x2da   :  { %8090 = vmatpush3.msra.mxu1 %v12024_v40  ;;  %8064 = vmatprep.subr.mxu0 %v14634_v49  ;;  %v12632_v40 = vunpack.c.h.bf16 %v6653_v7  ;;  %v12640_v19 = vunpack.c.h.bf16 %v6645_v52  ;;  %v12667_v57 = vunpack.c.l.bf16 %v6645_v52  ;;  %v14659_v49 = vld [vmem:[#allocation32_spill] sm:$0xff]  ;;  %v6642_v7 = vld [vmem:[#allocation5 + $0x3a0] sm:$0xff]  }
 0x2db   :  { %8091 = vmatprep.subr.mxu1 %v12042_v44  ;;  %8065 = vmatpush3.msra.mxu0 %v14635_v59  ;;  %v14638_v44 = vand.u32 4294901760, %v12235_v63  ;;  %v14643_v63 = vand.u32 4294901760, %v12339_v22  ;;  %v12672_v22 = vunpack.c.h.bf16 %v6652_v45  ;;  %v14661_v52 = vld [vmem:[#allocation34_spill] sm:$0xff] }
 0x2dc   :  { %8092 = vmatpush3.msra.mxu1 %v12051_v54  ;;  %8066 = vmatprep.subr.mxu0 %v14636_v21  ;;  %v14639_v54 = vand.u32 4294901760, %v14600_v9  ;;  %v12662_v1 = vsub.f32 %v12640_v19, %v12640_v19  ;;  %v14644_v9 = vand.u32 4294901760, %v12351_v17  ;;  %v12680_v17 = vunpack.c.l.bf16 %v6652_v45 }
 0x2dd   :  { %8093 = vmatprep.subr.mxu1 %v12056_v18  ;;  %8067 = vmatpush3.msra.mxu0 %v14637_v55  ;;  %v14640_v18 = vand.u32 4294901760, %v14602_v31  ;;  %v12674_v31 = vunpack.c.h.bf16 %v6644_v58  ;;  %v12699_v11 = vsub.f32 %v12667_v57, %v12667_v57  ;;  %v14660_v21 = vand.u32 4294901760, %v12468_v53 }
 0x2de   :  { %8094 = vmatpush3.msra.mxu1 %v12058_v50  ;;  %8068 = vmatprep.subr.mxu0 %v14638_v44  ;;  %v14641_v50 = vand.u32 4294901760, %v14604_v34  ;;  %v12726_v12 = vsub.f32 %v12680_v17, %v12680_v17 }
 0x2df   :  { %8095 = vmatprep.subr.mxu1 %v12064_v23  ;;  %8069 = vmatpush3.msra.mxu0 %v14639_v54  ;;  %v12650_v23 = vsub.f32 %v12632_v40, %v12632_v40  ;;  %v12717_v28 = vsub.f32 %v12674_v31, %v12674_v31  ;;  %v13802_v20 = vand.u32 4294901760, %v12699_v11 }
 0x2e0   :  { %8096 = vmatpush3.msra.mxu1 %v14601_v6  ;;  %8070 = vmatprep.subr.mxu0 %v14640_v18  ;;  %v14645_v6 = vand.u32 4294901760, %v12373_v48  ;;  %v6643_v48 = vld [vmem:[#allocation5 + $0x3a8] sm:$0xff]   ;;  %v13798_v53 = vand.u32 4294901760, %v12726_v12 }
 0x2e1   :  { %8097 = vmatprep.subr.mxu1 %v14603_v10  ;;  %8071 = vmatpush3.msra.mxu0 %v14641_v50  ;;  %v6651_v10 = vld [vmem:[#allocation5 + $0x3e8] sm:$0xff]   ;;  %v13806_v34 = vand.u32 4294901760, %v12650_v23  ;;  %v12741_v29 = vunpack.c.l.bf16 %v6643_v48  ;;  %v13799_v32 = vand.u32 4294901760, %v12717_v28 }
 0x2e2   :  { %8098 = vmatpush3.msra.mxu1 %v14605_v43  ;;  %8072 = vmatprep.subr.mxu0 %v14642_v41  ;;  %v14646_v43 = vand.u32 4294901760, %v12383_v8  ;;  %v14649_v8 = vand.u32 4294901760, %v12419_v33  ;;  %v12709_v33 = vunpack.c.h.bf16 %v6643_v48  ;;  %v14662_v18 = vld [vmem:[#allocation31_spill] sm:$0xff]  ;;  %v12764_v41 = vunpack.c.h.bf16 %v6650_v37 }
 0x2e3   :  { %8099 = vmatprep.subr.mxu1 %v14606_v15  ;;  %8073 = vmatpush3.msra.mxu0 %v14643_v63  ;;  %v12682_v15 = vunpack.c.l.bf16 %v6644_v58  ;;  %14657 = vst [vmem:[#allocation14_spill] sm:$0xff] %v12741_v29  ;;  %v14663_v50 = vand.u32 4294901760, %v14662_v18  ;;  %v6649_v58 = vld [vmem:[#allocation5 + $0x3d8] sm:$0xff]   ;;  %v12781_v48 = vunpack.c.h.bf16 %v6642_v7 }
 0x2e4   :  { %8100 = vmatpush3.msra.mxu1 %v14607_v47  ;;  %8074 = vmatprep.subr.mxu0 %v14644_v9  ;;  %v14648_v47 = vand.u32 4294901760, %v12404_v39  ;;  %v14651_v39 = vand.u32 4294901760, %v12430_v0  ;;  %14652 = vst [vmem:[#allocation17_spill] sm:$0xff] %v12709_v33  ;;  %v14653_v0 = vand.u32 4294901760, %v12441_v36  ;;  %v12759_v54 = vsub.f32 %v12709_v33, %v12709_v33  ;;  %14664 = vst [vmem:[#allocation16_spill] sm:$0xff] %v12764_v41  ;;  %v14665_v9 = vld [vmem:[#allocation19_spill] sm:$0xff] }
 0x2e5   :  { %8101 = vmatprep.subr.mxu1 %v14608_v3  ;;  %8075 = vmatpush3.msra.mxu0 %v14645_v6  ;;  %14647 = vst [vmem:[#allocation23_spill] sm:$0xff] %v12682_v15  ;;  %v13805_v3 = vand.u32 4294901760, %v12662_v1  ;;  %v12730_v5 = vsub.f32 %v12682_v15, %v12682_v15  ;;  %v14666_v6 = vand.u32 4294901760, %v14665_v9  ;;  %14668 = vst [vmem:[#allocation35_spill] sm:$0xff] %v12781_v48 }
 0x2e6   :  { %8102 = vmatpush3.msra.mxu1 %v14609_v16  ;;  %8076 = vmatprep.subr.mxu0 %v14646_v43  ;;  %v12690_v16 = vsub.f32 %v12658_v42, %v12658_v42  ;;  %v12829_v9 = vsub.f32 %v12764_v41, %v12764_v41  ;;  %v14680_v43 = vld [vmem:[#allocation11_spill] sm:$0xff] }
 0x2e7   :  { %8103 = vmatprep.subr.mxu1 %v14610_v35  ;;  %8077 = vmatpush3.msra.mxu0 %v14648_v47  ;;  %v12695_v35 = vunpack.c.h.bf16 %v6651_v10  ;;  %v12738_v36 = vsub.f32 %v12662_v1, %v13805_v3  ;;  %v13797_v45 = vand.u32 4294901760, %v12730_v5  ;;  %v12785_v47 = vsub.f32 %v12741_v29, %v12741_v29  ;;  %v6640_v3 = vld [vmem:[#allocation5 + $0x390] sm:$0xff]  }
 0x2e8   :  { %8104 = vmatpush3.msra.mxu1 %v14611_v60  ;;  %8078 = vmatprep.subr.mxu0 %v14649_v8  ;;  %v12707_v60 = vsub.f32 %v12650_v23, %v13806_v34  ;;  %v14669_v8 = vld [vmem:[#allocation37_spill] sm:$0xff] }
 0x2e9   :  { %8105 = vmatprep.subr.mxu1 %v12195_v38  ;;  %14650 = vst [vmem:[#allocation12_spill] sm:$0xff] %v12695_v35  ;;  %8079 = vmatpush3.msra.mxu0 %v14651_v39  ;;  %v12713_v38 = vsub.f32 %v12672_v22, %v12672_v22  ;;  %v12749_v59 = vsub.f32 %v12695_v35, %v12695_v35  ;;  %v14670_v39 = vld [vmem:[#allocation18_spill] sm:$0xff] }
 0x2ea   :  { %8106 = vmatpush3.msra.mxu1 %v14612_v2  ;;  %8080 = vmatprep.subr.mxu0 %v14653_v0  ;;  %v12722_v2 = vunpack.c.l.bf16 %v6651_v10  ;;  %v5508_v55 = vand.u32 4294901760, %v12707_v60  ;;  %v14667_v10 = vld [vmem:[#allocation28_spill] sm:$0xff]  ;;  %v12792_v0 = vsub.f32 %v12699_v11, %v13802_v20  ;;  %v12824_v18 = vsub.f32 %v12730_v5, %v13797_v45 }
 0x2eb   :  { %8107 = vmatprep.subr.mxu1 %v14613_v25  ;;  %8081 = vmatpush3.msra.mxu0 %v14655_v51  ;;  %v13804_v25 = vand.u32 4294901760, %v12690_v16  ;;  %v13801_v44 = vand.u32 4294901760, %v12713_v38  ;;  %v12794_v51 = vunpack.c.l.bf16 %v6650_v37  ;;  %v12811_v37 = vunpack.c.h.bf16 %v6649_v58 }
 0x2ec   :  { %14654 = vst [vmem:[#allocation15_spill] sm:$0xff] %v12722_v2  ;;  %8108 = vmatpush3.msra.mxu1 %v14656_v4  ;;  %8082 = vmatprep.subr.mxu0 %v14658_v30  ;;  %v12770_v63 = vsub.f32 %v12722_v2, %v12722_v2  ;;  %v12796_v4 = vunpack.c.l.bf16 %v6642_v7  ;;  %v13800_v30 = vand.u32 4294901760, %v12749_v59  ;;  %v13803_v7 = vand.u32 4294901760, %v12759_v54 }
 0x2ed   :  { %8109 = vmatprep.subr.mxu1 %v14659_v49  ;;  %8083 = vmatpush3.msra.mxu0 %v14660_v21  ;;  %14671 = vst [vmem:[#allocation36_spill] sm:$0xff] %v12794_v51  ;;  %v6641_v49 = vld [vmem:[#allocation5 + $0x398] sm:$0xff]   ;;  %v12804_v21 = vsub.f32 %v12713_v38, %v13801_v44  ;;  %14672 = vst [vmem:[#allocation21_spill] sm:$0xff] %v12811_v37  ;;  %v12839_v45 = vsub.f32 %v12781_v48, %v12781_v48 }
 0x2ee   :  { %8110 = vmatpush3.msra.mxu1 %v14661_v52  ;;  %8084 = vmatprep.subr.mxu0 %v14663_v50  ;;  %v12809_v52 = vsub.f32 %v12717_v28, %v13799_v32  ;;  %v13807_v50 = vand.u32 4294901760, %v12770_v63  ;;  %v12855_v32 = vsub.f32 %v12796_v4, %v12796_v4  ;;  %v12868_v44 = vsub.f32 %v12811_v37, %v12811_v37 }
 0x2ef   :  { %8111 = vmatprep.subr.mxu1 %v14616_v13  ;;  %8085 = vmatpush3.msra.mxu0 %v14666_v6  ;;  %v12779_v13 = vsub.f32 %v12690_v16, %v13804_v25  ;;  %v12834_v6 = vunpack.c.h.bf16 %v6641_v49  ;;  %v12882_v25 = vunpack.c.l.bf16 %v6649_v58  ;;  %v12897_v58 = vunpack.c.l.bf16 %v6641_v49 }
 0x2f0   :  { %5249 = vmatprep.mubr.f32.mxu0 %v14667_v10  ;;  %8112 = vmatpush3.msra.mxu1 %v14669_v8  ;;  %v13808_v8 = vand.u32 4294901760, %v12785_v47  ;;  %14674 = vst [vmem:[#allocation22_spill] sm:$0xff] %v12855_v32  ;;  %14675 = vst [vmem:[#allocation24_spill] sm:$0xff] %v12868_v44 }
 0x2f1   :  { %5251 = vmatmul.mubr.f32.vlgmr.msra.gmra.mxu0 %v14670_v39  ;;  %8113 = vmatprep.subr.mxu1 %v14620_v24  ;;  %v12819_v24 = vsub.f32 %v12726_v12, %v13798_v53  ;;  %14673 = vst [vmem:[#allocation29_spill] sm:$0xff] %v12834_v6  ;;  %v5418_v53 = vand.u32 4294901760, %v12792_v0  ;;  %v5424_v0 = vand.u32 4294901760, %v12809_v52  ;;  %v6648_v52 = vld [vmem:[#allocation5 + $0x3d0] sm:$0xff]   ;;  %14676 = vst [vmem:[#allocation13_spill] sm:$0xff] %v12882_v25 }
 0x2f2   :  { %8124 = vmatprep.subr.mxu0 %v12632_v40  ;;  %8114 = vmatpush3.msra.mxu1 %v12359_v46  ;;  %v5514_v46 = vand.u32 4294901760, %v12779_v13  ;;  %v12851_v13 = vsub.f32 %v12794_v51, %v12794_v51  ;;  %14678 = vst [vmem:[#allocation39_spill] sm:$0xff] %v12897_v58  ;;  %v12904_v34 = vunpack.c.h.bf16 %v6648_v52 }
 0x2f3   :  { %8125 = vmatpush3.msra.mxu0 %v12640_v19  ;;  %8115 = vmatprep.subr.mxu1 %v14623_v27  ;;  %v12847_v27 = vsub.f32 %v12749_v59, %v13800_v30  ;;  %v12864_v30 = vsub.f32 %v12759_v54, %v13803_v7  ;;  %v14682_v7 = vld [vmem:[#allocation26_spill] sm:$0xff] }
 0x2f4   :  { %8126 = vmatprep.subr.mxu0 %v12658_v42  ;;  %8116 = vmatpush3.msra.mxu1 %v12398_v14  ;;  %v5520_v14 = vand.u32 4294901760, %v12804_v21  ;;  %v12877_v21 = vsub.f32 %v12770_v63, %v13807_v50  ;;  %v12892_v50 = vsub.f32 %v12834_v6, %v12834_v6  ;;  %14679 = vst [vmem:[#allocation20_spill] sm:$0xff] %v12904_v34 }
 0x2f5   :  { %8127 = vmatpush3.msra.mxu0 %v12667_v57  ;;  %8117 = vmatprep.subr.mxu1 %v12400_v26  ;;  %v5436_v26 = vand.u32 4294901760, %v12864_v30  ;;  %v12919_v30 = vunpack.c.h.bf16 %v6640_v3 }
 0x2f6   :  { %8128 = vmatprep.subr.mxu0 %v12672_v22  ;;  %8118 = vmatpush3.msra.mxu1 %v12425_v61  ;;  %v12887_v61 = vsub.f32 %v12785_v47, %v13808_v8  ;;  %14677 = vst [vmem:[#allocation25_spill] sm:$0xff] %v12892_v50  ;;  %v5538_v49 = vand.u32 4294901760, %v12877_v21  ;;  %v14683_v8 = vand.u32 4294901760, %v12829_v9 }
 0x2f7   :  { %8129 = vmatpush3.msra.mxu0 %v12674_v31  ;;  %8119 = vmatprep.subr.mxu1 %v12436_v56  ;;  %v5532_v56 = vand.u32 4294901760, %v12847_v27  ;;  %14684 = vst [vmem:[#allocation27_spill] sm:$0xff] %v12919_v30 }
 0x2f8   :  { %8130 = vmatprep.subr.mxu0 %v12680_v17  ;;  %8120 = vmatpush3.msra.mxu1 %v12444_v62  ;;  %v14685_v62 = vsub.s32 6, %v14680_v43  ;;  %v5442_v60 = vand.u32 4294901760, %v12887_v61 }
 0x2f9   :  { %5321 = vmatprep.mubr.f32.mxu1 %v14667_v10  ;;  %8131 = vmatpush3.msra.mxu0 %v12682_v15  ;;  %v14681_v10 = vsub.s32 7, %v14680_v43  ;;  %v12936_v43 = vsub.f32 %v12882_v25, %v12882_v25 }
 0x2fa   :  { %5323 = vmatmul.mubr.f32.vlgmr.msra.gmra.mxu1 %v14670_v39  ;;  %8132 = vmatprep.subr.mxu0 %v12695_v35  ;;  %v12917_v39 = vsub.f32 %v12829_v9, %v14683_v8  ;;  %v617_v20 = vrot.slane %v14682_v7, %v14685_v62  ;;  %v6647_v8 = vld [vmem:[#allocation5 + $0x3c8] sm:$0xff]   ;;  %v14690_v62 = vand.u32 4294901760, %v12855_v32 }
 0x2fb   :  { %v621_v27 = vrot.slane %v14682_v7, %v14681_v10  ;;  %8159 = vmatprep.subr.mxu1 %v5508_v55  ;;  %8133 = vmatpush3.msra.mxu0 %v12709_v33  ;;  %v14686_v10 = vand.u32 4294901760, %v12738_v36  ;;  %v14687_v55 = vand.u32 4294901760, %v12839_v45  ;;  %v6639_v35 = vld [vmem:[#allocation5 + $0x388] sm:$0xff]   ;;  %v12939_v36 = vunpack.c.l.bf16 %v6648_v52 }
 0x2fc   :  { %8134 = vmatprep.subr.mxu0 %v12722_v2  ;;  %v14689_v7 = vand.u32 4294901760, %v12851_v13  ;;  %v14692_v52 = vand.u32 4294901760, %v12868_v44  ;;  %v5544_v2 = vand.u32 4294901760, %v12917_v39  ;;  %v14696_v33 = vand.u32 4294901760, %v12892_v50 }
 0x2fd   :  { %8160 = vmatpush3.msra.mxu1 %v14686_v10  ;;  %v12931_v21 = vsub.f32 %v12839_v45, %v14687_v55  ;;  %14688 = vst [vmem:[#allocation38_spill] sm:$0xff] %v12939_v36  ;;  %v12949_v10 = vsub.f32 %v12855_v32, %v14690_v62  ;;  %v12953_v55 = vsub.f32 %v12897_v58, %v12897_v58  ;;  %v12967_v62 = vand.u32 4294901760, %v621_v27 }
 0x2fe   :  { %8161 = vmatprep.subr.mxu1 %v5514_v46  ;;  %v12944_v61 = vsub.f32 %v12851_v13, %v14689_v7  ;;  %8135 = vmatpush3.msra.mxu0 %v12741_v29  ;;  %v12956_v46 = vunpack.c.l.bf16 %v6640_v3  ;;  %v12961_v15 = vsub.f32 %v12868_v44, %v14692_v52  ;;  %v12965_v7 = vsub.f32 %v12904_v34, %v12904_v34 }
 0x2ff   :  { %8162 = vmatpush3.msra.mxu1 %v5418_v53  ;;  %14693 = vst [vmem:[#allocation30_spill] sm:$0xff] %v12967_v62  ;;  %8136 = vmatprep.subr.mxu0 %v12764_v41  ;;  %v12971_v29 = vunpack.c.h.bf16 %v6647_v8  ;;  %v12973_v3 = vunpack.c.h.bf16 %v6639_v35  ;;  %v12975_v53 = vand.u32 4294901760, %v617_v20  ;;  %v5448_v52 = vand.u32 4294901760, %v12931_v21  ;;  %v6646_v41 = vld [vmem:[#allocation5 + $0x3c0] sm:$0xff]  }
 0x300   :  { %14691 = vst [vmem:[#allocation33_spill] sm:$0xff] %v12956_v46  ;;  %8163 = vmatprep.subr.mxu1 %v5520_v14  ;;  %8137 = vmatpush3.msra.mxu0 %v12781_v48  ;;  %v12982_v44 = vsub.f32 %v12892_v50, %v14696_v33  ;;  %v12987_v39 = vsub.f32 %v12919_v30, %v12919_v30  ;;  %v14697_v32 = vand.u32 4294901760, %v12819_v24  ;;  %v5454_v21 = vand.u32 4294901760, %v12949_v10  ;;  %v6638_v24 = vld [vmem:[#allocation5 + $0x380] sm:$0xff]  }
 0x301   :  { %14694 = vst [vmem:[#allocation32_spill] sm:$0xff] %v12971_v29  ;;  %14695 = vst [vmem:[#allocation34_spill] sm:$0xff] %v12975_v53  ;;  %8164 = vmatpush3.msra.mxu1 %v5424_v0  ;;  %8138 = vmatprep.subr.mxu0 %v12794_v51  ;;  %v5550_v0 = vand.u32 4294901760, %v12944_v61  ;;  %v12997_v33 = vsub.f32 %v12939_v36, %v12939_v36  ;;  %v14698_v14 = vand.u32 4294901760, %v12824_v18  ;;  %v5556_v51 = vand.u32 4294901760, %v12961_v15 }
 0x302   :  { %8165 = vmatprep.subr.mxu1 %v14697_v32  ;;  %8139 = vmatpush3.msra.mxu0 %v12796_v4  ;;  %v13003_v50 = vunpack.c.l.bf16 %v6647_v8  ;;  %v13007_v61 = vsub.f32 %v621_v27, %v12967_v62  ;;  %v13010_v10 = vunpack.c.l.bf16 %v6639_v35  ;;  %v13012_v48 = vunpack.c.h.bf16 %v6646_v41 }
 0x303   :  { %8166 = vmatpush3.msra.mxu1 %v14698_v14  ;;  %8140 = vmatprep.subr.mxu0 %v12811_v37  ;;  %v13016_v18 = vsub.f32 %v12956_v46, %v12956_v46  ;;  %v13019_v15 = vsub.f32 %v617_v20, %v12975_v53  ;;  %v5460_v27 = vand.u32 4294901760, %v12982_v44  ;;  %v14702_v8 = vand.u32 4294901760, %v12936_v43 }
 0x304   :  { %14699 = vst [vmem:[#allocation31_spill] sm:$0xff] %v13003_v50  ;;  %14700 = vst [vmem:[#allocation19_spill] sm:$0xff] %v13007_v61  ;;  %8167 = vmatprep.subr.mxu1 %v5532_v56  ;;  %8141 = vmatpush3.msra.mxu0 %v12834_v6  ;;  %v13029_v14 = vsub.f32 %v12971_v29, %v12971_v29  ;;  %v14703_v20 = vand.u32 4294901760, %v12953_v55  ;;  %v14704_v35 = vand.u32 4294901760, %v12965_v7  ;;  %v13054_v44 = vunpack.c.l.bf16 %v6638_v24 }
 0x305   :  { %14701 = vst [vmem:[#allocation28_spill] sm:$0xff] %v13019_v15  ;;  %8168 = vmatpush3.msra.mxu1 %v5436_v26  ;;  %v5561_v56 = vsub.f32 %v12936_v43, %v14702_v8  ;;  %8142 = vmatprep.subr.mxu0 %v12882_v25  ;;  %v13035_v26 = vunpack.c.h.bf16 %v6638_v24  ;;  %v13040_v8 = vsub.f32 %v12973_v3, %v12973_v3  ;;  %v14705_v6 = vand.u32 4294901760, %v12987_v39 }
 0x306   :  { %8169 = vmatprep.subr.mxu1 %v5538_v49  ;;  %v5465_v32 = vsub.f32 %v12953_v55, %v14703_v20  ;;  %8143 = vmatpush3.msra.mxu0 %v12897_v58  ;;  %v5567_v25 = vsub.f32 %v12965_v7, %v14704_v35  ;;  %v13046_v49 = vunpack.c.l.bf16 %v6646_v41  ;;  %v13051_v20 = vsub.f32 %v13003_v50, %v13003_v50 }
 0x307   :  { %8170 = vmatpush3.msra.mxu1 %v5442_v60  ;;  %8144 = vmatprep.subr.mxu0 %v12904_v34  ;;  %v13060_v35 = vsub.f32 %v13010_v10, %v13010_v10  ;;  %v5562_v41 = vand.u32 4294901760, %v5561_v56  ;;  %v5471_v37 = vsub.f32 %v12987_v39, %v14705_v6  ;;  %v13069_v24 = vsub.f32 %v13012_v48, %v13012_v48 }
 0x308   :  { %8171 = vmatprep.subr.mxu1 %v5544_v2  ;;  %8145 = vmatpush3.msra.mxu0 %v12919_v30  ;;  %v5466_v60 = vand.u32 4294901760, %v5465_v32  ;;  %v14706_v58 = vand.u32 4294901760, %v12997_v33  ;;  %v13078_v56 = vsub.f32 %v13035_v26, %v13035_v26  ;;  %v5568_v6 = vand.u32 4294901760, %v5567_v25 }
 0x309   :  { %8172 = vmatpush3.msra.mxu1 %v5448_v52  ;;  %8146 = vmatprep.subr.mxu0 %v12939_v36  ;;  %v14707_v2 = vand.u32 4294901760, %v13007_v61  ;;  %v13087_v32 = vsub.f32 %v13046_v49, %v13046_v49 }
 0x30a   :  { %8173 = vmatprep.subr.mxu1 %v5550_v0  ;;  %v5573_v30 = vsub.f32 %v12997_v33, %v14706_v58  ;;  %8147 = vmatpush3.msra.mxu0 %v12956_v46  ;;  %v14709_v58 = vand.u32 4294901760, %v13016_v18  ;;  %v5472_v0 = vand.u32 4294901760, %v5471_v37  ;;  %v14713_v46 = vand.u32 4294901760, %v13040_v8 }
 0x30b   :  { %8174 = vmatpush3.msra.mxu1 %v5454_v21  ;;  %v5395_v36 = vsub.f32 %v13007_v61, %v14707_v2  ;;  %14708 = vst [vmem:[#allocation37_spill] sm:$0xff] %v13087_v32  ;;  %8148 = vmatprep.subr.mxu0 %v12971_v29  ;;  %v14710_v21 = vand.u32 4294901760, %v13019_v15  ;;  %v13099_v2 = vsub.f32 %v13054_v44, %v13054_v44 }
 0x30c   :  { %8175 = vmatprep.subr.mxu1 %v5556_v51  ;;  %v5477_v52 = vsub.f32 %v13016_v18, %v14709_v58  ;;  %8149 = vmatpush3.msra.mxu0 %v12973_v3  ;;  %v14712_v51 = vand.u32 4294901760, %v13029_v14  ;;  %v13854_v58 = vand.u32 4294901760, %v13087_v32 }
 0x30d   :  { %v5401_v25 = vsub.f32 %v13019_v15, %v14710_v21  ;;  %14711 = vst [vmem:[#allocation18_spill] sm:$0xff] %v13099_v2  ;;  %8176 = vmatpush3.msra.mxu1 %v5460_v27  ;;  %8150 = vmatprep.subr.mxu0 %v13003_v50  ;;  %v5574_v21 = vand.u32 4294901760, %v5573_v30  ;;  %v5483_v15 = vsub.f32 %v13040_v8, %v14713_v46  ;;  %v5396_v37 = vand.u32 4294901760, %v5395_v36 }
 0x30e   :  { %v5579_v29 = vsub.f32 %v13029_v14, %v14712_v51  ;;  %8177 = vmatprep.subr.mxu1 %v5562_v41  ;;  %8151 = vmatpush3.msra.mxu0 %v13010_v10  ;;  %v14714_v27 = vand.u32 4294901760, %v13051_v20  ;;  %v5478_v30 = vand.u32 4294901760, %v5477_v52  ;;  %v14715_v50 = vand.u32 4294901760, %v13060_v35 }
 0x30f   :  { %8178 = vmatpush3.msra.mxu1 %v5466_v60  ;;  %8152 = vmatprep.subr.mxu0 %v13012_v48  ;;  %v5402_v41 = vand.u32 4294901760, %v5401_v25  ;;  %v13853_v61 = vand.u32 4294901760, %v13099_v2  ;;  %v14716_v60 = vand.u32 4294901760, %v13069_v24  ;;  %v14717_v52 = vand.u32 4294901760, %v13078_v56 }
 0x310   :  { %v5585_v51 = vsub.f32 %v13051_v20, %v14714_v27  ;;  %8179 = vmatprep.subr.mxu1 %v5568_v6  ;;  %v5489_v46 = vsub.f32 %v13060_v35, %v14715_v50  ;;  %8153 = vmatpush3.msra.mxu0 %v13035_v26  ;;  %v5580_v36 = vand.u32 4294901760, %v5579_v29  ;;  %v5484_v6 = vand.u32 4294901760, %v5483_v15 }
 0x311   :  { %8180 = vmatpush3.msra.mxu1 %v5472_v0  ;;  %v5591_v27 = vsub.f32 %v13069_v24, %v14716_v60  ;;  %8154 = vmatprep.subr.mxu0 %v13046_v49  ;;  %v5495_v25 = vsub.f32 %v13078_v56, %v14717_v52  ;;  %v5597_v29 = vsub.f32 %v13087_v32, %v13854_v58  ;;  %v14721_v60 = vld [vmem:[#allocation12_spill] sm:$0xff]  ;;  %v14724_v52 = vld [vmem:[#allocation15_spill] sm:$0xff] }
 0x312   :  { %8181 = vmatprep.subr.mxu1 %v5574_v21  ;;  %8155 = vmatpush3.msra.mxu0 %v13054_v44  ;;  %v5586_v50 = vand.u32 4294901760, %v5585_v51  ;;  %v5490_v0 = vand.u32 4294901760, %v5489_v46  ;;  %v5501_v21 = vsub.f32 %v13099_v2, %v13853_v61  ;;  %v14719_v46 = vld [vmem:[#allocation23_spill] sm:$0xff]  ;;  %v14734_v61 = vld [vmem:[#allocation38_spill] sm:$0xff] }
 0x313   :  { %5397 = vmatprep.mubr.f32.mxu0 %v5396_v37  ;;  %8182 = vmatpush3.msra.mxu1 %v5478_v30  ;;  %v5592_v15 = vand.u32 4294901760, %v5591_v27  ;;  %v5496_v37 = vand.u32 4294901760, %v5495_v25  ;;  %v5598_v51 = vand.u32 4294901760, %v5597_v29  ;;  %v14722_v27 = vld [vmem:[#allocation25_spill] sm:$0xff]  ;;  %v14725_v25 = vld [vmem:[#allocation14_spill] sm:$0xff]  ;;  %v14727_v29 = vld [vmem:[#allocation35_spill] sm:$0xff] }
 0x314   :  { %5403 = vmatmul.mubr.f32.vlgmr.msra.gmra.mxu0 %v5402_v41  ;;  %8183 = vmatprep.subr.mxu1 %v5580_v36  ;;  %v5502_v30 = vand.u32 4294901760, %v5501_v21  ;;  %v14718_v41 = vld [vmem:[#allocation22_spill] sm:$0xff]  ;;  %v14720_v36 = vld [vmem:[#allocation24_spill] sm:$0xff]  ;;  %v14729_v21 = vld [vmem:[#allocation21_spill] sm:$0xff] }
 0x315   :  { %8194 = vmatprep.subr.mxu0 %v12650_v23  ;;  %8184 = vmatpush3.msra.mxu1 %v5484_v6  ;;  %v14723_v6 = vld [vmem:[#allocation17_spill] sm:$0xff]  ;;  %v14735_v58 = vld [vmem:[#allocation19_spill] sm:$0xff] }
 0x316   :  { %8195 = vmatpush3.msra.mxu0 %v12662_v1  ;;  %8185 = vmatprep.subr.mxu1 %v5586_v50  ;;  %v14726_v50 = vld [vmem:[#allocation16_spill] sm:$0xff] }
 0x317   :  { %8196 = vmatprep.subr.mxu0 %v12690_v16  ;;  %8186 = vmatpush3.msra.mxu1 %v5490_v0  ;;  %v14728_v0 = vld [vmem:[#allocation36_spill] sm:$0xff] }
 0x318   :  { %8197 = vmatpush3.msra.mxu0 %v12699_v11  ;;  %8187 = vmatprep.subr.mxu1 %v5592_v15  ;;  %v14730_v15 = vld [vmem:[#allocation29_spill] sm:$0xff] }
 0x319   :  { %8198 = vmatprep.subr.mxu0 %v12713_v38  ;;  %8188 = vmatpush3.msra.mxu1 %v5496_v37  ;;  %v14731_v37 = vld [vmem:[#allocation13_spill] sm:$0xff] }
 0x31a   :  { %8199 = vmatpush3.msra.mxu0 %v12717_v28  ;;  %8189 = vmatprep.subr.mxu1 %v5598_v51  ;;  %v14732_v51 = vld [vmem:[#allocation39_spill] sm:$0xff] }
 0x31b   :  { %8200 = vmatprep.subr.mxu0 %v12726_v12  ;;  %8190 = vmatpush3.msra.mxu1 %v5502_v30  ;;  %v14733_v30 = vld [vmem:[#allocation27_spill] sm:$0xff] }
 0x31c   :  { %5601 = vmatprep.mubr.f32.mxu1 %v12967_v62  ;;  %8201 = vmatpush3.msra.mxu0 %v12730_v5  ;;  %v14737_v62 = vld [vmem:[#allocation28_spill] sm:$0xff] }
 0x31d   :  { %5603 = vmatmul.mubr.f32.vlgmr.msra.gmra.mxu1 %v12975_v53  ;;  %8202 = vmatprep.subr.mxu0 %v12749_v59  ;;  %v14736_v53 = vld [vmem:[#allocation33_spill] sm:$0xff] }
 0x31e   :  { %8229 = vmatprep.subr.mxu1 %v12632_v40  ;;  %8203 = vmatpush3.msra.mxu0 %v12759_v54 }
 0x31f   :  { %8230 = vmatpush3.msra.mxu1 %v12640_v19  ;;  %8204 = vmatprep.subr.mxu0 %v12770_v63 }
 0x320   :  { %8231 = vmatprep.subr.mxu1 %v12658_v42  ;;  %8205 = vmatpush3.msra.mxu0 %v12785_v47 }
 0x321   :  { %8232 = vmatpush3.msra.mxu1 %v12667_v57  ;;  %8206 = vmatprep.subr.mxu0 %v12829_v9 }
 0x322   :  { %8233 = vmatprep.subr.mxu1 %v12672_v22  ;;  %8207 = vmatpush3.msra.mxu0 %v12839_v45 }
 0x323   :  { %8234 = vmatpush3.msra.mxu1 %v12674_v31  ;;  %8208 = vmatprep.subr.mxu0 %v12851_v13 }
 0x324   :  { %8235 = vmatprep.subr.mxu1 %v12680_v17  ;;  %8209 = vmatpush3.msra.mxu0 %v14718_v41 }
 0x325   :  { %8236 = vmatpush3.msra.mxu1 %v14719_v46  ;;  %8210 = vmatprep.subr.mxu0 %v14720_v36 }
 0x326   :  { %8237 = vmatprep.subr.mxu1 %v14721_v60  ;;  %8211 = vmatpush3.msra.mxu0 %v14722_v27 }
 0x327   :  { %8238 = vmatpush3.msra.mxu1 %v14723_v6  ;;  %8212 = vmatprep.subr.mxu0 %v12936_v43 }
 0x328   :  { %8239 = vmatprep.subr.mxu1 %v14724_v52  ;;  %8213 = vmatpush3.msra.mxu0 %v12953_v55 }
 0x329   :  { %8240 = vmatpush3.msra.mxu1 %v14725_v25  ;;  %8214 = vmatprep.subr.mxu0 %v12965_v7 }
 0x32a   :  { %8241 = vmatprep.subr.mxu1 %v14726_v50  ;;  %8215 = vmatpush3.msra.mxu0 %v12987_v39 }
 0x32b   :  { %8242 = vmatpush3.msra.mxu1 %v14727_v29  ;;  %8216 = vmatprep.subr.mxu0 %v12997_v33 }
 0x32c   :  { %8243 = vmatprep.subr.mxu1 %v14728_v0  ;;  %8217 = vmatpush3.msra.mxu0 %v13016_v18 }
 0x32d   :  { %8244 = vmatpush3.msra.mxu1 %v12796_v4  ;;  %8218 = vmatprep.subr.mxu0 %v13029_v14 }
 0x32e   :  { %8245 = vmatprep.subr.mxu1 %v14729_v21  ;;  %8219 = vmatpush3.msra.mxu0 %v13040_v8 }
 0x32f   :  { %8246 = vmatpush3.msra.mxu1 %v14730_v15  ;;  %8220 = vmatprep.subr.mxu0 %v13051_v20 }
 0x330   :  { %8247 = vmatprep.subr.mxu1 %v14731_v37  ;;  %8221 = vmatpush3.msra.mxu0 %v13060_v35 }
 0x331   :  { %8248 = vmatpush3.msra.mxu1 %v14732_v51  ;;  %8222 = vmatprep.subr.mxu0 %v13069_v24  ;;  %v14738_v51 = vld [vmem:[#allocation32_spill] sm:$0xff] }
 0x332   :  { %8249 = vmatprep.subr.mxu1 %v12904_v34  ;;  %8223 = vmatpush3.msra.mxu0 %v13078_v56  ;;  %v14739_v34 = vand.u32 4294901760, %v12650_v23  ;;  %v14744_v23 = vand.u32 4294901760, %v12713_v38  ;;  %v14749_v38 = vand.u32 4294901760, %v14737_v62 }
 0x333   :  { %8250 = vmatpush3.msra.mxu1 %v14733_v30  ;;  %8224 = vmatprep.subr.mxu0 %v13087_v32  ;;  %v14740_v30 = vand.u32 4294901760, %v12662_v1  ;;  %v14741_v32 = vld [vmem:[#allocation31_spill] sm:$0xff]  ;;  %v14745_v1 = vand.u32 4294901760, %v12717_v28  ;;  %v14751_v28 = vand.u32 4294901760, %v12759_v54  ;;  %v14762_v54 = vand.u32 4294901760, %v12965_v7 }
 0x334   :  { %8251 = vmatprep.subr.mxu1 %v14734_v61  ;;  %8225 = vmatpush3.msra.mxu0 %v13099_v2  ;;  %v14742_v2 = vand.u32 4294901760, %v12690_v16  ;;  %v14747_v16 = vand.u32 4294901760, %v14735_v58  ;;  %v14770_v7 = vld [vmem:[#allocation39_spill] sm:$0xff] }
 0x335   :  { %5706 = vmatprep.mubr.f32.mxu0 %v14735_v58  ;;  %8252 = vmatpush3.msra.mxu1 %v14736_v53  ;;  %v14743_v53 = vand.u32 4294901760, %v12699_v11  ;;  %v14748_v11 = vand.u32 4294901760, %v12730_v5  ;;  %v14753_v5 = vand.u32 4294901760, %v12785_v47  ;;  %v14765_v47 = vand.u32 4294901760, %v13016_v18  ;;  %v14775_v18 = vld [vmem:[#allocation37_spill] sm:$0xff]  ;;  %v6721_v58 = vpop.f32.mrf.mxu1 }
 0x336   :  { %5709 = vmatmul.mubr.f32.vlgmr.msra.gmra.mxu0 %v14737_v62  ;;  %8253 = vmatprep.subr.mxu1 %v14738_v51  ;;  %v14772_v62 = vld [vmem:[#allocation20_spill] sm:$0xff] }
 0x337   :  { %8264 = vmatprep.subr.mxu0 %v14739_v34  ;;  %8254 = vmatpush3.msra.mxu1 %v12973_v3  ;;  %v14746_v34 = vand.u32 4294901760, %v12726_v12  ;;  %v14752_v12 = vand.u32 4294901760, %v12770_v63  ;;  %v14764_v63 = vand.u32 4294901760, %v12997_v33  ;;  %v14774_v33 = vld [vmem:[#allocation27_spill] sm:$0xff] }
 0x338   :  { %8265 = vmatpush3.msra.mxu0 %v14740_v30  ;;  %8255 = vmatprep.subr.mxu1 %v14741_v32 }
 0x339   :  { %8266 = vmatprep.subr.mxu0 %v14742_v2  ;;  %8256 = vmatpush3.msra.mxu1 %v13010_v10  ;;  %v14780_v2 = vld [vmem:[#allocation33_spill] sm:$0xff] }
 0x33a   :  { %8267 = vmatpush3.msra.mxu0 %v14743_v53  ;;  %8257 = vmatprep.subr.mxu1 %v13012_v48  ;;  %v14750_v53 = vand.u32 4294901760, %v12749_v59  ;;  %v14754_v59 = vand.u32 4294901760, %v12829_v9  ;;  %v14766_v9 = vand.u32 4294901760, %v13029_v14  ;;  %v14776_v14 = vand.u32 4294901760, %v14775_v18 }
 0x33b   :  { %8268 = vmatprep.subr.mxu0 %v14744_v23  ;;  %8258 = vmatpush3.msra.mxu1 %v13035_v26 }
 0x33c   :  { %8269 = vmatpush3.msra.mxu0 %v14745_v1  ;;  %8259 = vmatprep.subr.mxu1 %v13046_v49 }
 0x33d   :  { %8270 = vmatprep.subr.mxu0 %v14746_v34  ;;  %8260 = vmatpush3.msra.mxu1 %v13054_v44 }
 0x33e   :  { %5781 = vmatprep.mubr.f32.mxu1 %v14747_v16  ;;  %8271 = vmatpush3.msra.mxu0 %v14748_v11 }
 0x33f   :  { %5785 = vmatmul.mubr.f32.vlgmr.msra.gmra.mxu1 %v14749_v38  ;;  %8272 = vmatprep.subr.mxu0 %v14750_v53 }
 0x340   :  { %8299 = vmatprep.subr.mxu1 %v12632_v40  ;;  %8273 = vmatpush3.msra.mxu0 %v14751_v28  ;;  %v14755_v40 = vand.u32 4294901760, %v12839_v45  ;;  %v14763_v45 = vand.u32 4294901760, %v12987_v39  ;;  %v14773_v39 = vand.u32 4294901760, %v13078_v56 }
 0x341   :  { %8300 = vmatpush3.msra.mxu1 %v12640_v19  ;;  %8274 = vmatprep.subr.mxu0 %v14752_v12  ;;  %v14756_v19 = vand.u32 4294901760, %v12851_v13  ;;  %v14767_v13 = vand.u32 4294901760, %v13040_v8  ;;  %v14777_v8 = vld [vmem:[#allocation18_spill] sm:$0xff]  ;;  %v555_v12 = vld [vmem:[%s13316_s2] sm:$0x1]  ;;  %s8411_s2 = smov [#allocation7]  }
 0x342   :  { %8301 = vmatprep.subr.mxu1 %v12658_v42  ;;  %8275 = vmatpush3.msra.mxu0 %v14753_v5  ;;  %v14757_v42 = vand.u32 4294901760, %v14718_v41  ;;  %s6005_s24 = sshll.u32 %s8411_s2, 4  ;;  %s6006_s24 = int_to_ptr.vmem [resolvable:$true] %s6005_s24 }
 0x343   :  { %8302 = vmatpush3.msra.mxu1 %v12667_v57  ;;  %8276 = vmatprep.subr.mxu0 %v14754_v59  ;;  %v14758_v57 = vand.u32 4294901760, %v14720_v36  ;;  %s8381_s25 = scalar_lea.vmem %s6006_s24, 16  ;;  %s8385_s26 = scalar_lea.vmem %s6006_s24, 32 }
 0x344   :  { %8303 = vmatprep.subr.mxu1 %v12672_v22  ;;  %8277 = vmatpush3.msra.mxu0 %v14755_v40  ;;  %v14759_v22 = vand.u32 4294901760, %v14722_v27  ;;  %p8382_p10 = scmp.ne.s32.totalorder %s6006_s24, %s8381_s25  ;;  %p8386_p11 = scmp.lt.s32.totalorder %s6006_s24, %s6006_s24 }
 0x345   :  { %8304 = vmatpush3.msra.mxu1 %v12674_v31  ;;  %8278 = vmatprep.subr.mxu0 %v14756_v19  ;;  %v14760_v31 = vand.u32 4294901760, %v12936_v43  ;;  %v14768_v43 = vand.u32 4294901760, %v13051_v20  ;;  %v14778_v20 = vand.u32 4294901760, %v14777_v8  ;;  %p8387_p12 = scmp.lt.s32.totalorder %s8385_s26, %s8381_s25 }
 0x346   :  { %8305 = vmatprep.subr.mxu1 %v12680_v17  ;;  %8279 = vmatpush3.msra.mxu0 %v14757_v42  ;;  %v14761_v17 = vand.u32 4294901760, %v12953_v55  ;;  %v14769_v55 = vand.u32 4294901760, %v13060_v35  ;;  %v14779_v35 = vld [vmem:[#allocation30_spill] sm:$0xff] }
 0x347   :  { %8306 = vmatpush3.msra.mxu1 %v14719_v46  ;;  %8280 = vmatprep.subr.mxu0 %v14758_v57  ;;  %v6722_v46 = vpop.f32.mrf.mxu1  ;;  %p8388_p13 = por %p8387_p12, %p8386_p11 }
 0x348   :  { %8307 = vmatprep.subr.mxu1 %v14721_v60  ;;  %8281 = vmatpush3.msra.mxu0 %v14759_v22  ;;  %v6723_v42 = vadd.f32 %v6722_v46, %v6721_v58 }
 0x349   :  { %8308 = vmatpush3.msra.mxu1 %v14723_v6  ;;  %8282 = vmatprep.subr.mxu0 %v14760_v31  ;;  %v6791_v36 = vpop.f32.mrf.mxu1  ;;  %p8389_p0 = pnand %p8388_p13, %p8382_p10 }
 0x34a   :  { %8309 = vmatprep.subr.mxu1 %v14724_v52  ;;  %8283 = vmatpush3.msra.mxu0 %v14761_v17 }
 0x34b   :  { %8310 = vmatpush3.msra.mxu1 %v14725_v25  ;;  %8284 = vmatprep.subr.mxu0 %v14762_v54  ;;  %v6792_v60 = vpop.f32.mrf.mxu1 }
 0x34c   :  { %8311 = vmatprep.subr.mxu1 %v14726_v50  ;;  %8285 = vmatpush3.msra.mxu0 %v14763_v45  ;;  %v6793_v45 = vadd.f32 %v6792_v60, %v6791_v36 }
 0x34d   :  { %8312 = vmatpush3.msra.mxu1 %v14727_v29  ;;  %8286 = vmatprep.subr.mxu0 %v14764_v63  ;;  %v6861_v27 = vpop.f32.mrf.mxu1 }
 0x34e   :  { %8313 = vmatprep.subr.mxu1 %v14728_v0  ;;  %8287 = vmatpush3.msra.mxu0 %v14765_v47 }
 0x34f   :  { %8314 = vmatpush3.msra.mxu1 %v12796_v4  ;;  %8288 = vmatprep.subr.mxu0 %v14766_v9  ;;  %v14771_v4 = vand.u32 4294901760, %v13069_v24  ;;  %v14781_v24 = vld [vmem:[#allocation34_spill] sm:$0xff]  ;;  %v6862_v6 = vpop.f32.mrf.mxu1 }
 0x350   :  { %8315 = vmatprep.subr.mxu1 %v14729_v21  ;;  %8289 = vmatpush3.msra.mxu0 %v14767_v13 }
 0x351   :  { %8316 = vmatpush3.msra.mxu1 %v14730_v15  ;;  %8290 = vmatprep.subr.mxu0 %v14768_v43  ;;  %v6931_v52 = vpop.f32.mrf.mxu1 }
 0x352   :  { %8317 = vmatprep.subr.mxu1 %v14731_v37  ;;  %8291 = vmatpush3.msra.mxu0 %v14769_v55  ;;  %v6863_v55 = vadd.f32 %v6862_v6, %v6861_v27 }
 0x353   :  { %8318 = vmatpush3.msra.mxu1 %v14770_v7  ;;  %8292 = vmatprep.subr.mxu0 %v14771_v4  ;;  %v6932_v25 = vpop.f32.mrf.mxu1 }
 0x354   :  { %8319 = vmatprep.subr.mxu1 %v14772_v62  ;;  %8293 = vmatpush3.msra.mxu0 %v14773_v39 }
 0x355   :  { %8320 = vmatpush3.msra.mxu1 %v14774_v33  ;;  %8294 = vmatprep.subr.mxu0 %v14776_v14  ;;  %v7001_v50 = vpop.f32.mrf.mxu1  ;;  %v6933_v14 = vadd.f32 %v6932_v25, %v6931_v52 }
 0x356   :  { %8321 = vmatprep.subr.mxu1 %v14734_v61  ;;  %8295 = vmatpush3.msra.mxu0 %v14778_v20  ;;  %v6686_v61 = vpop.f32.mrf.mxu0 }
 0x357   :  { %5919 = vmatprep.mubr.f32.mxu0 %v14779_v35  ;;  %8322 = vmatpush3.msra.mxu1 %v14780_v2  ;;  %v7002_v0 = vpop.f32.mrf.mxu1 }
 0x358   :  { %5921 = vmatmul.mubr.f32.vlgmr.msra.gmra.mxu0 %v14781_v24  ;;  %8323 = vmatprep.subr.mxu1 %v14738_v51  ;;  %v6687_v56 = vpop.f32.mrf.mxu0 }
 0x359   :  { %5991 = vmatprep.mubr.f32.mxu1 %v14779_v35  ;;  %8324 = vmatpush3.msra.mxu1 %v12973_v3  ;;  %v7071_v15 = vpop.f32.mrf.mxu1  ;;  %v6688_v28 = vadd.f32 %v6687_v56, %v6686_v61  ;;  %v7003_v56 = vadd.f32 %v7002_v0, %v7001_v50 }
 0x35a   :  { %8325 = vmatprep.subr.mxu1 %v14741_v32  ;;  %v6756_v41 = vpop.f32.mrf.mxu0 }
 0x35b   :  { %8326 = vmatpush3.msra.mxu1 %v13010_v10  ;;  %v7072_v51 = vpop.f32.mrf.mxu1  ;;  %v715_v19 = vadd.f32 %v6688_v28, %v555_v12 }
 0x35c   :  { %8327 = vmatprep.subr.mxu1 %v13012_v48  ;;  %v6757_v3 = vpop.f32.mrf.mxu0 }
 0x35d   :  { %8328 = vmatpush3.msra.mxu1 %v13035_v26  ;;  %v7141_v23 = vpop.f32.mrf.mxu1  ;;  %v6758_v22 = vadd.f32 %v6757_v3, %v6756_v41  ;;  %v915_v54 = vadd.f32 %v6723_v42, %v715_v19 }
 0x35e   :  { %8329 = vmatprep.subr.mxu1 %v13046_v49  ;;  %v6826_v32 = vpop.f32.mrf.mxu0 }
 0x35f   :  { %8330 = vmatpush3.msra.mxu1 %v13054_v44  ;;  %v7142_v34 = vpop.f32.mrf.mxu1  ;;  %v1021_v47 = vadd.f32 %v6758_v22, %v915_v54 }
 0x360   :  { %5993 = vmatmul.mubr.f32.vlgmr.msra.gmra.mxu1 %v14781_v24  ;;  %v6827_v10 = vpop.f32.mrf.mxu0  ;;  %v7143_v52 = vadd.f32 %v7142_v34, %v7141_v23 }
 0x361   :  { %v7211_v11 = vpop.f32.mrf.mxu1  ;;  %v6828_v9 = vadd.f32 %v6827_v10, %v6826_v32  ;;  %v1097_v43 = vadd.f32 %v6793_v45, %v1021_v47  ;;  %v7073_v32 = vadd.f32 %v7072_v51, %v7071_v15 }
 0x362   :  { %v6896_v48 = vpop.f32.mrf.mxu0 }
 0x363   :  { %v7212_v53 = vpop.f32.mrf.mxu1  ;;  %v1233_v62 = vadd.f32 %v6828_v9, %v1097_v43 }
 0x364   :  { %v6897_v26 = vpop.f32.mrf.mxu0  ;;  %v7213_v50 = vadd.f32 %v7212_v53, %v7211_v11 }
 0x365   :  { %v7281_v59 = vpop.f32.mrf.mxu1  ;;  %v6898_v39 = vadd.f32 %v6897_v26, %v6896_v48  ;;  %v1305_v18 = vadd.f32 %v6863_v55, %v1233_v62 }
 0x366   :  { %v6966_v49 = vpop.f32.mrf.mxu0 }
 0x367   :  { %v7282_v57 = vpop.f32.mrf.mxu1  ;;  %v1385_v20 = vadd.f32 %v6898_v39, %v1305_v18 }
 0x368   :  { %v6967_v44 = vpop.f32.mrf.mxu0  ;;  %v7283_v15 = vadd.f32 %v7282_v57, %v7281_v59 }
 0x369   :  { %v7351_v17 = vpop.f32.mrf.mxu1  ;;  %v6968_v35 = vadd.f32 %v6967_v44, %v6966_v49  ;;  %v1585_v61 = vadd.f32 %v6933_v14, %v1385_v20 }
 0x36a   :  { %v7036_v29 = vpop.f32.mrf.mxu0 }
 0x36b   :  { %v7352_v13 = vpop.f32.mrf.mxu1  ;;  %v1691_v41 = vadd.f32 %v6968_v35, %v1585_v61 }
 0x36c   :  { %v7037_v21 = vpop.f32.mrf.mxu0  ;;  %v7353_v23 = vadd.f32 %v7352_v13, %v7351_v17 }
 0x36d   :  { %v7421_v4 = vpop.f32.mrf.mxu1  ;;  %v7038_v46 = vadd.f32 %v7037_v21, %v7036_v29  ;;  %v1767_v36 = vadd.f32 %v7003_v56, %v1691_v41 }
 0x36e   :  { %v7106_v37 = vpop.f32.mrf.mxu0 }
 0x36f   :  { %v7422_v8 = vpop.f32.mrf.mxu1  ;;  %v1903_v27 = vadd.f32 %v7038_v46, %v1767_v36 }
 0x370   :  { %v7107_v30 = vpop.f32.mrf.mxu0  ;;  %v7423_v11 = vadd.f32 %v7422_v8, %v7421_v4 }
 0x371   :  { %v7491_v24 = vpop.f32.mrf.mxu1  ;;  %v7108_v48 = vadd.f32 %v7107_v30, %v7106_v37  ;;  %v1975_v26 = vadd.f32 %v7073_v32, %v1903_v27 }
 0x372   :  { %v7176_v1 = vpop.f32.mrf.mxu0 }
 0x373   :  { %v7492_v3 = vpop.f32.mrf.mxu1  ;;  %v2055_v28 = vadd.f32 %v7108_v48, %v1975_v26 }
 0x374   :  { %v7177_v16 = vpop.f32.mrf.mxu0  ;;  %v7493_v59 = vadd.f32 %v7492_v3, %v7491_v24 }
 0x375   :  { %v7561_v10 = vpop.f32.mrf.mxu1  ;;  %v7178_v49 = vadd.f32 %v7177_v16, %v7176_v1  ;;  %v2255_v19 = vadd.f32 %v7143_v52, %v2055_v28 }
 0x376   :  { %v7246_v38 = vpop.f32.mrf.mxu0 }
 0x377   :  { %v7562_v25 = vpop.f32.mrf.mxu1  ;;  %v2361_v42 = vadd.f32 %v7178_v49, %v2255_v19 }
 0x378   :  { %v7247_v5 = vpop.f32.mrf.mxu0  ;;  %v7563_v17 = vadd.f32 %v7562_v25, %v7561_v10 }
 0x379   :  { %v7631_v12 = vpop.f32.mrf.mxu1  ;;  %v7248_v29 = vadd.f32 %v7247_v5, %v7246_v38  ;;  %v2437_v22 = vadd.f32 %v7213_v50, %v2361_v42 }
 0x37a   :  { %v7316_v40 = vpop.f32.mrf.mxu0 }
 0x37b   :  { %v7632_v21 = vpop.f32.mrf.mxu1  ;;  %v2573_v45 = vadd.f32 %v7248_v29, %v2437_v22 }
 0x37c   :  { %v7317_v31 = vpop.f32.mrf.mxu0  ;;  %v7633_v4 = vadd.f32 %v7632_v21, %v7631_v12 }
 0x37d   :  { %v7701_v54 = vpop.f32.mrf.mxu1  ;;  %v7318_v37 = vadd.f32 %v7317_v31, %v7316_v40  ;;  %v2645_v47 = vadd.f32 %v7283_v15, %v2573_v45 }
 0x37e   :  { %v7386_v63 = vpop.f32.mrf.mxu0 }
 0x37f   :  { %v7702_v34 = vpop.f32.mrf.mxu1  ;;  %v2725_v9 = vadd.f32 %v7318_v37, %v2645_v47 }
 0x380   :  { %v7387_v7 = vpop.f32.mrf.mxu0  ;;  %v7703_v24 = vadd.f32 %v7702_v34, %v7701_v54 }
 0x381   :  { %v7388_v1 = vadd.f32 %v7387_v7, %v7386_v63  ;;  %v7771_v43 = vpop.f32.mrf.mxu1  ;;  %v2925_v55 = vadd.f32 %v7353_v23, %v2725_v9 }
 0x382   :  { %v7456_v33 = vpop.f32.mrf.mxu0 }
 0x383   :  { %v3031_v62 = vadd.f32 %v7388_v1, %v2925_v55  ;;  %v7772_v5 = vpop.f32.mrf.mxu1 }
 0x384   :  { %v7457_v2 = vpop.f32.mrf.mxu0  ;;  %v7773_v10 = vadd.f32 %v7772_v5, %v7771_v43 }
 0x385   :  { %v7458_v38 = vadd.f32 %v7457_v2, %v7456_v33  ;;  %v3107_v39 = vadd.f32 %v7423_v11, %v3031_v62  ;;  %v7841_v18 = vpop.f32.mrf.mxu1 }
 0x386   :  { %v7526_v58 = vpop.f32.mrf.mxu0 }
 0x387   :  { %v3243_v14 = vadd.f32 %v7458_v38, %v3107_v39  ;;  %v7842_v13 = vpop.f32.mrf.mxu1 }
 0x388   :  { %v7527_v60 = vpop.f32.mrf.mxu0  ;;  %v7843_v49 = vadd.f32 %v7842_v13, %v7841_v18 }
 0x389   :  { %v7528_v40 = vadd.f32 %v7527_v60, %v7526_v58  ;;  %v3315_v20 = vadd.f32 %v7493_v59, %v3243_v14  ;;  %v7911_v61 = vpop.f32.mrf.mxu1 }
 0x38a   :  { %v7596_v6 = vpop.f32.mrf.mxu0 }
 0x38b   :  { %v3395_v35 = vadd.f32 %v7528_v40, %v3315_v20  ;;  %v7912_v2 = vpop.f32.mrf.mxu1 }
 0x38c   :  { %v7597_v44 = vpop.f32.mrf.mxu0  ;;  %v7913_v42 = vadd.f32 %v7912_v2, %v7911_v61 }
 0x38d   :  { %v7598_v63 = vadd.f32 %v7597_v44, %v7596_v6  ;;  %v3595_v56 = vadd.f32 %v7563_v17, %v3395_v35  ;;  %v7981_v36 = vpop.f32.mrf.mxu1 }
 0x38e   :  { %v7666_v0 = vpop.f32.mrf.mxu0 }
 0x38f   :  { %v3701_v41 = vadd.f32 %v7598_v63, %v3595_v56  ;;  %v7982_v48 = vpop.f32.mrf.mxu1 }
 0x390   :  { %v7667_v51 = vpop.f32.mrf.mxu0  ;;  %v7983_v45 = vadd.f32 %v7982_v48, %v7981_v36 }
 0x391   :  { %v7668_v33 = vadd.f32 %v7667_v51, %v7666_v0  ;;  %v3777_v46 = vadd.f32 %v7633_v4, %v3701_v41 }
 0x392   :  { %v7736_v30 = vpop.f32.mrf.mxu0 }
 0x393   :  { %v3913_v32 = vadd.f32 %v7668_v33, %v3777_v46 }
 0x394   :  { %v7737_v16 = vpop.f32.mrf.mxu0 }
 0x395   :  { %v7738_v58 = vadd.f32 %v7737_v16, %v7736_v30  ;;  %v3985_v27 = vadd.f32 %v7703_v24, %v3913_v32 }
 0x396   :  { %v7806_v53 = vpop.f32.mrf.mxu0 }
 0x397   :  { %v4065_v26 = vadd.f32 %v7738_v58, %v3985_v27 }
 0x398   :  { %v7807_v57 = vpop.f32.mrf.mxu0  ;;  %v8051_v25 = vpop.f32.mrf.mxu1 }
 0x399   :  { %v7808_v6 = vadd.f32 %v7807_v57, %v7806_v53  ;;  %v4265_v28 = vadd.f32 %v7773_v10, %v4065_v26 }
 0x39a   :  { %v7876_v31 = vpop.f32.mrf.mxu0  ;;  %v8052_v50 = vpop.f32.mrf.mxu1 }
 0x39b   :  { %v4371_v12 = vadd.f32 %v7808_v6, %v4265_v28  ;;  %v8053_v1 = vadd.f32 %v8052_v50, %v8051_v25 }
 0x39c   :  { %v7877_v7 = vpop.f32.mrf.mxu0 }
 0x39d   :  { %v7878_v19 = vadd.f32 %v7877_v7, %v7876_v31  ;;  %v4447_v0 = vadd.f32 %v7843_v49, %v4371_v12 }
 0x39e   :  { %v7946_v8 = vpop.f32.mrf.mxu0 }
 0x39f   :  { %v4583_v22 = vadd.f32 %v7878_v19, %v4447_v0 }
 0x3a0   :  { %v7947_v3 = vpop.f32.mrf.mxu0 }
 0x3a1   :  { %v7948_v15 = vadd.f32 %v7947_v3, %v7946_v8  ;;  %v4655_v54 = vadd.f32 %v7913_v42, %v4583_v22 }
 0x3a2   :  { %v8016_v60 = vpop.f32.mrf.mxu0 }
 0x3a3   :  { %v4735_v30 = vadd.f32 %v7948_v15, %v4655_v54 }
 0x3a4   :  { %v8017_v52 = vpop.f32.mrf.mxu0 }
 0x3a5   :  { %v8018_v47 = vadd.f32 %v8017_v52, %v8016_v60  ;;  %v4935_v9 = vadd.f32 %v7983_v45, %v4735_v30 }
 0x3a7   :  { %v5041_v43 = vadd.f32 %v8018_v47, %v4935_v9 }
 0x3a9   :  { %v5117_v53 = vadd.f32 %v8053_v1, %v5041_v43 }
 0x3b1   :  { %v8086_v44 = vpop.f32.mrf.mxu0 }
 0x3b3   :  { %v8087_v29 = vpop.f32.mrf.mxu0 }
 0x3b4   :  { %v8088_v55 = vadd.f32 %v8087_v29, %v8086_v44 }
 0x3b6   :  { %v5253_v39 = vadd.f32 %v8088_v55, %v5117_v53 }
 0x3ba   :  { %v8121_v21 = vpop.f32.mrf.mxu1 }
 0x3bc   :  { %v8122_v37 = vpop.f32.mrf.mxu1 }
 0x3bd   :  { %v8123_v62 = vadd.f32 %v8122_v37, %v8121_v21 }
 0x3bf   :  { %v5325_v18 = vadd.f32 %v8123_v62, %v5253_v39 }
 0x3d4   :  { %v8156_v51 = vpop.f32.mrf.mxu0 }
 0x3d6   :  { %v8157_v23 = vpop.f32.mrf.mxu0 }
 0x3d7   :  { %v8158_v59 = vadd.f32 %v8157_v23, %v8156_v51 }
 0x3d9   :  { %v5405_v31 = vadd.f32 %v8158_v59, %v5325_v18 }
 0x3dd   :  { %v8191_v34 = vpop.f32.mrf.mxu1 }
 0x3df   :  { %v8192_v11 = vpop.f32.mrf.mxu1 }
 0x3e0   :  { %v8193_v14 = vadd.f32 %v8192_v11, %v8191_v34 }
 0x3e2   :  { %v5605_v13 = vadd.f32 %v8193_v14, %v5405_v31 }
 0x3f6   :  { %v8226_v16 = vpop.f32.mrf.mxu0 }
 0x3f8   :  { %v8227_v38 = vpop.f32.mrf.mxu0 }
 0x3f9   :  { %v8228_v20 = vadd.f32 %v8227_v38, %v8226_v16 }
 0x3fb   :  { %v5711_v63 = vadd.f32 %v8228_v20, %v5605_v13 }
 0x3ff   :  { %v8261_v5 = vpop.f32.mrf.mxu1 }
 0x401   :  { %v8262_v40 = vpop.f32.mrf.mxu1 }
 0x402   :  { %v8263_v35 = vadd.f32 %v8262_v40, %v8261_v5 }
 0x404   :  { %v5787_v56 = vadd.f32 %v8263_v35, %v5711_v63 }
 0x418   :  { %v8296_v57 = vpop.f32.mrf.mxu0 }
 0x41a   :  { %v8297_v17 = vpop.f32.mrf.mxu0 }
 0x41b   :  { %v8298_v7 = vadd.f32 %v8297_v17, %v8296_v57 }
 0x41d   :  { %v5923_v8 = vadd.f32 %v8298_v7, %v5787_v56 }
 0x420   :  { %v8331_v61 = vpop.f32.mrf.mxu1 }
 0x422   :  { %v8332_v4 = vpop.f32.mrf.mxu1 }
 0x423   :  { %v8333_v41 = vadd.f32 %v8332_v4, %v8331_v61 }
 0x425   :  { %v5995_v33 = vadd.f32 %v8333_v41, %v5923_v8 }
 0x427   :  { %5998 = vst [vmem:[#allocation7] sm:$0x1] %v5995_v33 }
 0x428   :  { %8392 = shalt.err (!%p8389_p0)
}
 0x429   :  { %6008 = dma.vmem_to_hbm [thread:$0]  %s6006_s24, 16, %s13317_s3, [#allocation4]  }
 0x42a   :  { %8405 = dma.done.wait [#allocation4], 16  }
 0x42b   :  { %8406 = vsyncadd [#allocation4], 4294967280 }
 0x42c   :  { %6012 = vsyncpa [#allocation3], 1 }
 0x42d   :  { %6013 = vsyncpa [#allocation6], 1 }
 0x42e   :  { %6014 = vsyncpa [#allocation4], 1 }

</bundles_post_ra>
